<compile_context>
chip_gen: v5e
topology: v5e:2x2
jax: 0.10.0
libtpu: 0.0.40
codegen_flags: <defaults>
</compile_context>

<pallas_src>
import functools
import math

import numpy as np
import jax
import jax.numpy as jnp
from jax.experimental import pallas as pl
from jax.experimental.pallas import tpu as pltpu


LN_EPS = 1e-12  # ALBert default layer_norm_eps


def _layer_norm(v, g, b, eps=LN_EPS):
    mu = jnp.mean(v, axis=-1, keepdims=True)
    var = jnp.mean(jnp.square(v - mu), axis=-1, keepdims=True)
    return (v - mu) * jax.lax.rsqrt(var + eps) * g + b


def _gelu_new(x):
    # ALBert 'gelu_new' (tanh approximation) activation, computed in f32 (EUP tanh).
    c = math.sqrt(2.0 / math.pi)
    return 0.5 * x * (1.0 + jnp.tanh(c * (x + 0.044715 * x * x * x)))


def _mxu(a, b):
    """bf16-input MXU matmul with f32 accumulation."""
    return jnp.dot(a.astype(jnp.bfloat16), b.astype(jnp.bfloat16),
                   preferred_element_type=jnp.float32)


def albert_layer_kernel(x_ref,
                        ln0_g_ref, ln0_b_ref,
                        wqkv_ref, bqkv_ref,
                        wo_ref, bo_ref,
                        lna_g_ref, lna_b_ref,
                        wi_ref, bi_ref,
                        wf_ref, bf_ref,
                        ln1_g_ref, ln1_b_ref,
                        o_ref,
                        *, num_heads, apply_pre_ln):
    x = x_ref[0]                                   # (S, H) f32
    S, H = x.shape
    dh = H // num_heads
    inv_sqrt_dh = 1.0 / math.sqrt(dh)              # derived from head size, not hard-coded

    ln0_g = ln0_g_ref[...]
    ln0_b = ln0_b_ref[...]

    # idx == 0 pre-LayerNorm (static branch, resolved at trace time).
    h = _layer_norm(x, ln0_g, ln0_b) if apply_pre_ln else x

    # --- fused Q/K/V projection: one MXU matmul, sliced on lane boundaries
    h_bf16 = h.astype(jnp.bfloat16)                # cast once, reuse for qkv matmul
    qkv = jnp.dot(h_bf16, wqkv_ref[...],
                  preferred_element_type=jnp.float32) + bqkv_ref[...]   # (S, 3H) f32
    q = qkv[:, 0:H]
    k = qkv[:, H:2 * H]
    v = qkv[:, 2 * H:3 * H]

    # --- multi-head self-attention; static unrolled loop, all dots on the MXU
    ctx_heads = []
    for hh in range(num_heads):
        lo, hi = hh * dh, (hh + 1) * dh
        qh = q[:, lo:hi]                           # (S, dh)
        kh = k[:, lo:hi]
        vh = v[:, lo:hi]
        scores = jax.lax.dot_general(              # (S, S) = q @ k^T on the MXU
            qh.astype(jnp.bfloat16), kh.astype(jnp.bfloat16),
            dimension_numbers=(((1,), (1,)), ((), ())),
            preferred_element_type=jnp.float32) * inv_sqrt_dh
        # softmax over keys, f32
        scores = scores - jnp.max(scores, axis=-1, keepdims=True)
        p = jnp.exp(scores)
        p = p * pl.reciprocal(jnp.sum(p, axis=-1, keepdims=True), approx=False)
        ctx_heads.append(_mxu(p, vh))              # (S, dh)
    ctx = jnp.concatenate(ctx_heads, axis=-1)      # (S, H)

    # --- ALBertSelfOutput: dense + residual(h) + LayerNorm
    attn = _mxu(ctx, wo_ref[...]) + bo_ref[...]
    attn = _layer_norm(attn + h, lna_g_ref[...], lna_b_ref[...])

    # --- ALBertLayer: attention_norm = LayerNorm (shared params with pre-LN)
    attn_norm = _layer_norm(attn, ln0_g, ln0_b)

    # --- ALBertIntermediate (+ ALBertOutput residual, no LN inside)
    inter = _gelu_new(_mxu(attn_norm, wi_ref[...]) + bi_ref[...])   # (S, I)
    ffn = _mxu(inter, wf_ref[...]) + bf_ref[...] + attn_norm        # (S, H)

    # --- final LayerNorm_1
    out = _layer_norm(ffn, ln1_g_ref[...], ln1_b_ref[...])
    o_ref[0] = out.astype(o_ref.dtype)


def albert_layer(x, params, *, num_heads, idx=0):
    """x: (B, S, H) f32. params: dict of pre-transposed weights (in_dim, out_dim)
    and 1-D biases / LayerNorm params (matching nn.Linear weight.T / bias)."""
    B, S, H = x.shape

    def row(v):  # (D,) -> (1, D) f32
        return v.reshape(1, -1).astype(jnp.float32)

    # Fuse Q/K/V projection weights into one (H, 3H) bf16 matrix (one weight DMA,
    # one MXU pass instead of three).
    wqkv = jnp.concatenate(
        [params["wq_t"], params["wk_t"], params["wv_t"]], axis=1).astype(jnp.bfloat16)
    bqkv = jnp.concatenate(
        [params["bq"], params["bk"], params["bv"]], axis=0).reshape(1, 3 * H)

    inputs = (
        x,
        row(params["ln0_g"]), row(params["ln0_b"]),
        wqkv, bqkv,
        params["wo_t"].astype(jnp.bfloat16), row(params["bo"]),
        row(params["lna_g"]), row(params["lna_b"]),
        params["wi_t"].astype(jnp.bfloat16), row(params["bi"]),
        params["wf_t"].astype(jnp.bfloat16), row(params["bf"]),
        row(params["ln1_g"]), row(params["ln1_b"]),
    )

    # Activations are tiled per batch element; weights / LN params keep a constant
    # block index so they stay resident in VMEM across the batch grid.
    in_specs = [pl.BlockSpec((1, S, H), lambda b: (b, 0, 0))]
    for a in inputs[1:]:
        in_specs.append(pl.BlockSpec(a.shape, lambda b: (0, 0)))

    kernel = functools.partial(
        albert_layer_kernel, num_heads=num_heads, apply_pre_ln=(idx == 0))

    return pl.pallas_call(
        kernel,
        out_shape=jax.ShapeDtypeStruct((B, S, H), jnp.float32),
        grid=(B,),
        in_specs=in_specs,
        out_specs=pl.BlockSpec((1, S, H), lambda b: (b, 0, 0)),
        compiler_params=pltpu.CompilerParams(
            dimension_semantics=("parallel",)),
    )(*inputs)


def albert_layer_ref(x, params, *, num_heads, idx=0):
    """Pure-JAX reference mirroring the PyTorch module (same bf16-input /
    f32-accumulate matmul precision as the kernel)."""
    B, S, H = x.shape
    dh = H // num_heads

    def ln(v, g, b):
        mu = jnp.mean(v, axis=-1, keepdims=True)
        var = jnp.mean(jnp.square(v - mu), axis=-1, keepdims=True)
        return (v - mu) * jax.lax.rsqrt(var + LN_EPS) * g + b

    def mm(a, w):
        return jnp.dot(a.astype(jnp.bfloat16), w.astype(jnp.bfloat16),
                       preferred_element_type=jnp.float32)

    h = ln(x, params["ln0_g"], params["ln0_b"]) if idx == 0 else x

    q = mm(h, params["wq_t"]) + params["bq"]
    k = mm(h, params["wk_t"]) + params["bk"]
    v = mm(h, params["wv_t"]) + params["bv"]

    def split_heads(t):  # (B,S,H) -> (B,nH,S,dh)
        return t.reshape(B, S, num_heads, dh).transpose(0, 2, 1, 3)

    qh, kh, vh = split_heads(q), split_heads(k), split_heads(v)
    scores = jnp.einsum("bhqd,bhkd->bhqk",
                        qh.astype(jnp.bfloat16), kh.astype(jnp.bfloat16),
                        preferred_element_type=jnp.float32) / math.sqrt(dh)
    probs = jax.nn.softmax(scores, axis=-1)
    ctx = jnp.einsum("bhqk,bhkd->bhqd",
                     probs.astype(jnp.bfloat16), vh.astype(jnp.bfloat16),
                     preferred_element_type=jnp.float32)
    ctx = ctx.transpose(0, 2, 1, 3).reshape(B, S, H)

    attn = mm(ctx, params["wo_t"]) + params["bo"]
    attn = ln(attn + h, params["lna_g"], params["lna_b"])
    attn_norm = ln(attn, params["ln0_g"], params["ln0_b"])
    inter = _gelu_new(mm(attn_norm, params["wi_t"]) + params["bi"])
    ffn = mm(inter, params["wf_t"]) + params["bf"] + attn_norm
    return ln(ffn, params["ln1_g"], params["ln1_b"])


if __name__ == "__main__":
    # Small but TPU-friendly shapes: batch=2, seq=64, hidden=128 (4 heads of 32),
    # intermediate=512.  Hidden=128 keeps the lane axis dense.
    B, S, H, NH, I = 2, 64, 128, 4, 512

    key = jax.random.PRNGKey(0)
    keys = jax.random.split(key, 20)

    def rnd(k, shape, scale=0.05):
        return jax.random.normal(k, shape, dtype=jnp.float32) * scale

    params = dict(
        ln0_g=1.0 + rnd(keys[0], (H,)),  ln0_b=rnd(keys[1], (H,)),
        wq_t=rnd(keys[2], (H, H)),       bq=rnd(keys[3], (H,)),
        wk_t=rnd(keys[4], (H, H)),       bk=rnd(keys[5], (H,)),
        wv_t=rnd(keys[6], (H, H)),       bv=rnd(keys[7], (H,)),
        wo_t=rnd(keys[8], (H, H)),       bo=rnd(keys[9], (H,)),
        lna_g=1.0 + rnd(keys[10], (H,)), lna_b=rnd(keys[11], (H,)),
        wi_t=rnd(keys[12], (H, I)),      bi=rnd(keys[13], (I,)),
        wf_t=rnd(keys[14], (I, H)),      bf=rnd(keys[15], (H,)),
        ln1_g=1.0 + rnd(keys[16], (H,)), ln1_b=rnd(keys[17], (H,)),
    )
    x = jax.random.normal(keys[18], (B, S, H), dtype=jnp.float32)

    out = albert_layer(x, params, num_heads=NH, idx=0)
    out = jax.block_until_ready(out)

    ref = jax.block_until_ready(albert_layer_ref(x, params, num_heads=NH, idx=0))
    np.testing.assert_allclose(np.asarray(out), np.asarray(ref),
                               rtol=1e-3, atol=1e-3)

    print("KERNEL_OK")
</pallas_src>

<mosaic_0001>
module attributes {stable_mosaic.version = 11 : i64} {
  func.func @albert_layer_kernel(%arg0: i32, %arg1: memref<1x64x128xf32, #tpu.memory_space<vmem>>, %arg2: memref<1x128xf32, #tpu.memory_space<vmem>>, %arg3: memref<1x128xf32, #tpu.memory_space<vmem>>, %arg4: memref<128x384xbf16, #tpu.memory_space<vmem>>, %arg5: memref<1x384xf32, #tpu.memory_space<vmem>>, %arg6: memref<128x128xbf16, #tpu.memory_space<vmem>>, %arg7: memref<1x128xf32, #tpu.memory_space<vmem>>, %arg8: memref<1x128xf32, #tpu.memory_space<vmem>>, %arg9: memref<1x128xf32, #tpu.memory_space<vmem>>, %arg10: memref<128x512xbf16, #tpu.memory_space<vmem>>, %arg11: memref<1x512xf32, #tpu.memory_space<vmem>>, %arg12: memref<512x128xbf16, #tpu.memory_space<vmem>>, %arg13: memref<1x128xf32, #tpu.memory_space<vmem>>, %arg14: memref<1x128xf32, #tpu.memory_space<vmem>>, %arg15: memref<1x128xf32, #tpu.memory_space<vmem>>, %arg16: memref<1x64x128xf32, #tpu.memory_space<vmem>>) attributes {dimension_semantics = [#tpu.dimension_semantics<parallel>], iteration_bounds = array<i64: 2>, scalar_prefetch = 0 : i64, scratch_operands = 0 : i64, tpu.core_type = #tpu.core_type<tc>, window_params = [{transform_indices = @transform_0, window_bounds = array<i64: 1, 64, 128>}, {pipeline_mode = #tpu.pipeline_mode<synchronous>, transform_indices = @transform_1, window_bounds = array<i64: 1, 128>}, {pipeline_mode = #tpu.pipeline_mode<synchronous>, transform_indices = @transform_2, window_bounds = array<i64: 1, 128>}, {pipeline_mode = #tpu.pipeline_mode<synchronous>, transform_indices = @transform_3, window_bounds = array<i64: 128, 384>}, {pipeline_mode = #tpu.pipeline_mode<synchronous>, transform_indices = @transform_4, window_bounds = array<i64: 1, 384>}, {pipeline_mode = #tpu.pipeline_mode<synchronous>, transform_indices = @transform_5, window_bounds = array<i64: 128, 128>}, {pipeline_mode = #tpu.pipeline_mode<synchronous>, transform_indices = @transform_6, window_bounds = array<i64: 1, 128>}, {pipeline_mode = #tpu.pipeline_mode<synchronous>, transform_indices = @transform_7, window_bounds = array<i64: 1, 128>}, {pipeline_mode = #tpu.pipeline_mode<synchronous>, transform_indices = @transform_8, window_bounds = array<i64: 1, 128>}, {pipeline_mode = #tpu.pipeline_mode<synchronous>, transform_indices = @transform_9, window_bounds = array<i64: 128, 512>}, {pipeline_mode = #tpu.pipeline_mode<synchronous>, transform_indices = @transform_10, window_bounds = array<i64: 1, 512>}, {pipeline_mode = #tpu.pipeline_mode<synchronous>, transform_indices = @transform_11, window_bounds = array<i64: 512, 128>}, {pipeline_mode = #tpu.pipeline_mode<synchronous>, transform_indices = @transform_12, window_bounds = array<i64: 1, 128>}, {pipeline_mode = #tpu.pipeline_mode<synchronous>, transform_indices = @transform_13, window_bounds = array<i64: 1, 128>}, {pipeline_mode = #tpu.pipeline_mode<synchronous>, transform_indices = @transform_14, window_bounds = array<i64: 1, 128>}, {transform_indices = @transform_15, window_bounds = array<i64: 1, 64, 128>}]} {
    %c0 = arith.constant 0 : index
    %c0_0 = arith.constant 0 : index
    %c0_1 = arith.constant 0 : index
    %0 = vector.load %arg1[%c0, %c0_0, %c0_1] : memref<1x64x128xf32, #tpu.memory_space<vmem>>, vector<1x64x128xf32>
    %1 = vector.shape_cast %0 : vector<1x64x128xf32> to vector<64x128xf32>
    %c0_2 = arith.constant 0 : index
    %c0_3 = arith.constant 0 : index
    %2 = vector.load %arg2[%c0_2, %c0_3] : memref<1x128xf32, #tpu.memory_space<vmem>>, vector<1x128xf32>
    %c0_4 = arith.constant 0 : index
    %c0_5 = arith.constant 0 : index
    %3 = vector.load %arg3[%c0_4, %c0_5] : memref<1x128xf32, #tpu.memory_space<vmem>>, vector<1x128xf32>
    %cst = arith.constant dense<0.000000e+00> : vector<64xf32>
    %4 = vector.multi_reduction <add>, %1, %cst [1] : vector<64x128xf32> to vector<64xf32>
    %5 = vector.shape_cast %4 : vector<64xf32> to vector<64x1xf32>
    %cst_6 = arith.constant 1.280000e+02 : f32
    %6 = vector.broadcast %cst_6 : f32 to vector<64x1xf32>
    %7 = arith.divf %5, %6 : vector<64x1xf32>
    %8 = vector.broadcast %7 : vector<64x1xf32> to vector<64x128xf32>
    %9 = arith.subf %1, %8 : vector<64x128xf32>
    %10 = arith.mulf %9, %9 : vector<64x128xf32>
    %cst_7 = arith.constant dense<0.000000e+00> : vector<64xf32>
    %11 = vector.multi_reduction <add>, %10, %cst_7 [1] : vector<64x128xf32> to vector<64xf32>
    %12 = vector.shape_cast %11 : vector<64xf32> to vector<64x1xf32>
    %cst_8 = arith.constant 1.280000e+02 : f32
    %13 = vector.broadcast %cst_8 : f32 to vector<64x1xf32>
    %14 = arith.divf %12, %13 : vector<64x1xf32>
    %15 = vector.broadcast %7 : vector<64x1xf32> to vector<64x128xf32>
    %16 = arith.subf %1, %15 : vector<64x128xf32>
    %cst_9 = arith.constant 9.99999996E-13 : f32
    %17 = vector.broadcast %cst_9 : f32 to vector<64x1xf32>
    %18 = arith.addf %14, %17 : vector<64x1xf32>
    %19 = math.rsqrt %18 : vector<64x1xf32>
    %20 = vector.broadcast %19 : vector<64x1xf32> to vector<64x128xf32>
    %21 = arith.mulf %16, %20 : vector<64x128xf32>
    %22 = vector.broadcast %2 : vector<1x128xf32> to vector<64x128xf32>
    %23 = arith.mulf %21, %22 : vector<64x128xf32>
    %24 = vector.broadcast %3 : vector<1x128xf32> to vector<64x128xf32>
    %25 = arith.addf %23, %24 : vector<64x128xf32>
    %26 = arith.truncf %25 : vector<64x128xf32> to vector<64x128xbf16>
    %c0_10 = arith.constant 0 : index
    %c0_11 = arith.constant 0 : index
    %27 = vector.load %arg4[%c0_10, %c0_11] : memref<128x384xbf16, #tpu.memory_space<vmem>>, vector<128x384xbf16>
    %cst_12 = arith.constant dense<0.000000e+00> : vector<64x384xf32>
    %28 = tpu.matmul %26, %27, %cst_12 {dimension_numbers = #tpu.dot_dimension_numbers<[1], [0], [0], [1], [0, 0, 1, 1], [], []>} : vector<64x128xbf16>, vector<128x384xbf16>, vector<64x384xf32> -> vector<64x384xf32>
    %c0_13 = arith.constant 0 : index
    %c0_14 = arith.constant 0 : index
    %29 = vector.load %arg5[%c0_13, %c0_14] : memref<1x384xf32, #tpu.memory_space<vmem>>, vector<1x384xf32>
    %30 = vector.broadcast %29 : vector<1x384xf32> to vector<64x384xf32>
    %31 = arith.addf %28, %30 : vector<64x384xf32>
    %32 = vector.extract_strided_slice %31 {offsets = [0, 0], sizes = [64, 128], strides = [1, 1]} : vector<64x384xf32> to vector<64x128xf32>
    %33 = vector.extract_strided_slice %31 {offsets = [0, 128], sizes = [64, 128], strides = [1, 1]} : vector<64x384xf32> to vector<64x128xf32>
    %34 = vector.extract_strided_slice %31 {offsets = [0, 256], sizes = [64, 128], strides = [1, 1]} : vector<64x384xf32> to vector<64x128xf32>
    %35 = vector.extract_strided_slice %32 {offsets = [0, 0], sizes = [64, 32], strides = [1, 1]} : vector<64x128xf32> to vector<64x32xf32>
    %36 = vector.extract_strided_slice %33 {offsets = [0, 0], sizes = [64, 32], strides = [1, 1]} : vector<64x128xf32> to vector<64x32xf32>
    %37 = vector.extract_strided_slice %34 {offsets = [0, 0], sizes = [64, 32], strides = [1, 1]} : vector<64x128xf32> to vector<64x32xf32>
    %38 = arith.truncf %35 : vector<64x32xf32> to vector<64x32xbf16>
    %39 = arith.truncf %36 : vector<64x32xf32> to vector<64x32xbf16>
    %cst_15 = arith.constant dense<0.000000e+00> : vector<64x64xf32>
    %40 = tpu.matmul %38, %39, %cst_15 {dimension_numbers = #tpu.dot_dimension_numbers<[1], [1], [0], [0], [0, 0, 1, 0], [], []>} : vector<64x32xbf16>, vector<64x32xbf16>, vector<64x64xf32> -> vector<64x64xf32>
    %cst_16 = arith.constant 0.176776692 : f32
    %41 = vector.broadcast %cst_16 : f32 to vector<64x64xf32>
    %42 = arith.mulf %40, %41 : vector<64x64xf32>
    %cst_17 = arith.constant dense<0xFF800000> : vector<64xf32>
    %43 = vector.multi_reduction <maximumf>, %42, %cst_17 [1] : vector<64x64xf32> to vector<64xf32>
    %44 = vector.shape_cast %43 : vector<64xf32> to vector<64x1xf32>
    %45 = vector.broadcast %44 : vector<64x1xf32> to vector<64x64xf32>
    %46 = arith.subf %42, %45 : vector<64x64xf32>
    %47 = math.exp %46 : vector<64x64xf32>
    %cst_18 = arith.constant dense<0.000000e+00> : vector<64xf32>
    %48 = vector.multi_reduction <add>, %47, %cst_18 [1] : vector<64x64xf32> to vector<64xf32>
    %49 = vector.shape_cast %48 : vector<64xf32> to vector<64x1xf32>
    %50 = tpu.reciprocal %49 : vector<64x1xf32> -> vector<64x1xf32>
    %51 = vector.broadcast %50 : vector<64x1xf32> to vector<64x64xf32>
    %52 = arith.mulf %47, %51 : vector<64x64xf32>
    %53 = arith.truncf %52 : vector<64x64xf32> to vector<64x64xbf16>
    %54 = arith.truncf %37 : vector<64x32xf32> to vector<64x32xbf16>
    %cst_19 = arith.constant dense<0.000000e+00> : vector<64x32xf32>
    %55 = tpu.matmul %53, %54, %cst_19 {dimension_numbers = #tpu.dot_dimension_numbers<[1], [0], [0], [1], [0, 0, 1, 1], [], []>} : vector<64x64xbf16>, vector<64x32xbf16>, vector<64x32xf32> -> vector<64x32xf32>
    %56 = vector.extract_strided_slice %32 {offsets = [0, 32], sizes = [64, 32], strides = [1, 1]} : vector<64x128xf32> to vector<64x32xf32>
    %57 = vector.extract_strided_slice %33 {offsets = [0, 32], sizes = [64, 32], strides = [1, 1]} : vector<64x128xf32> to vector<64x32xf32>
    %58 = vector.extract_strided_slice %34 {offsets = [0, 32], sizes = [64, 32], strides = [1, 1]} : vector<64x128xf32> to vector<64x32xf32>
    %59 = arith.truncf %56 : vector<64x32xf32> to vector<64x32xbf16>
    %60 = arith.truncf %57 : vector<64x32xf32> to vector<64x32xbf16>
    %cst_20 = arith.constant dense<0.000000e+00> : vector<64x64xf32>
    %61 = tpu.matmul %59, %60, %cst_20 {dimension_numbers = #tpu.dot_dimension_numbers<[1], [1], [0], [0], [0, 0, 1, 0], [], []>} : vector<64x32xbf16>, vector<64x32xbf16>, vector<64x64xf32> -> vector<64x64xf32>
    %cst_21 = arith.constant 0.176776692 : f32
    %62 = vector.broadcast %cst_21 : f32 to vector<64x64xf32>
    %63 = arith.mulf %61, %62 : vector<64x64xf32>
    %cst_22 = arith.constant dense<0xFF800000> : vector<64xf32>
    %64 = vector.multi_reduction <maximumf>, %63, %cst_22 [1] : vector<64x64xf32> to vector<64xf32>
    %65 = vector.shape_cast %64 : vector<64xf32> to vector<64x1xf32>
    %66 = vector.broadcast %65 : vector<64x1xf32> to vector<64x64xf32>
    %67 = arith.subf %63, %66 : vector<64x64xf32>
    %68 = math.exp %67 : vector<64x64xf32>
    %cst_23 = arith.constant dense<0.000000e+00> : vector<64xf32>
    %69 = vector.multi_reduction <add>, %68, %cst_23 [1] : vector<64x64xf32> to vector<64xf32>
    %70 = vector.shape_cast %69 : vector<64xf32> to vector<64x1xf32>
    %71 = tpu.reciprocal %70 : vector<64x1xf32> -> vector<64x1xf32>
    %72 = vector.broadcast %71 : vector<64x1xf32> to vector<64x64xf32>
    %73 = arith.mulf %68, %72 : vector<64x64xf32>
    %74 = arith.truncf %73 : vector<64x64xf32> to vector<64x64xbf16>
    %75 = arith.truncf %58 : vector<64x32xf32> to vector<64x32xbf16>
    %cst_24 = arith.constant dense<0.000000e+00> : vector<64x32xf32>
    %76 = tpu.matmul %74, %75, %cst_24 {dimension_numbers = #tpu.dot_dimension_numbers<[1], [0], [0], [1], [0, 0, 1, 1], [], []>} : vector<64x64xbf16>, vector<64x32xbf16>, vector<64x32xf32> -> vector<64x32xf32>
    %77 = vector.extract_strided_slice %32 {offsets = [0, 64], sizes = [64, 32], strides = [1, 1]} : vector<64x128xf32> to vector<64x32xf32>
    %78 = vector.extract_strided_slice %33 {offsets = [0, 64], sizes = [64, 32], strides = [1, 1]} : vector<64x128xf32> to vector<64x32xf32>
    %79 = vector.extract_strided_slice %34 {offsets = [0, 64], sizes = [64, 32], strides = [1, 1]} : vector<64x128xf32> to vector<64x32xf32>
    %80 = arith.truncf %77 : vector<64x32xf32> to vector<64x32xbf16>
    %81 = arith.truncf %78 : vector<64x32xf32> to vector<64x32xbf16>
    %cst_25 = arith.constant dense<0.000000e+00> : vector<64x64xf32>
    %82 = tpu.matmul %80, %81, %cst_25 {dimension_numbers = #tpu.dot_dimension_numbers<[1], [1], [0], [0], [0, 0, 1, 0], [], []>} : vector<64x32xbf16>, vector<64x32xbf16>, vector<64x64xf32> -> vector<64x64xf32>
    %cst_26 = arith.constant 0.176776692 : f32
    %83 = vector.broadcast %cst_26 : f32 to vector<64x64xf32>
    %84 = arith.mulf %82, %83 : vector<64x64xf32>
    %cst_27 = arith.constant dense<0xFF800000> : vector<64xf32>
    %85 = vector.multi_reduction <maximumf>, %84, %cst_27 [1] : vector<64x64xf32> to vector<64xf32>
    %86 = vector.shape_cast %85 : vector<64xf32> to vector<64x1xf32>
    %87 = vector.broadcast %86 : vector<64x1xf32> to vector<64x64xf32>
    %88 = arith.subf %84, %87 : vector<64x64xf32>
    %89 = math.exp %88 : vector<64x64xf32>
    %cst_28 = arith.constant dense<0.000000e+00> : vector<64xf32>
    %90 = vector.multi_reduction <add>, %89, %cst_28 [1] : vector<64x64xf32> to vector<64xf32>
    %91 = vector.shape_cast %90 : vector<64xf32> to vector<64x1xf32>
    %92 = tpu.reciprocal %91 : vector<64x1xf32> -> vector<64x1xf32>
    %93 = vector.broadcast %92 : vector<64x1xf32> to vector<64x64xf32>
    %94 = arith.mulf %89, %93 : vector<64x64xf32>
    %95 = arith.truncf %94 : vector<64x64xf32> to vector<64x64xbf16>
    %96 = arith.truncf %79 : vector<64x32xf32> to vector<64x32xbf16>
    %cst_29 = arith.constant dense<0.000000e+00> : vector<64x32xf32>
    %97 = tpu.matmul %95, %96, %cst_29 {dimension_numbers = #tpu.dot_dimension_numbers<[1], [0], [0], [1], [0, 0, 1, 1], [], []>} : vector<64x64xbf16>, vector<64x32xbf16>, vector<64x32xf32> -> vector<64x32xf32>
    %98 = vector.extract_strided_slice %32 {offsets = [0, 96], sizes = [64, 32], strides = [1, 1]} : vector<64x128xf32> to vector<64x32xf32>
    %99 = vector.extract_strided_slice %33 {offsets = [0, 96], sizes = [64, 32], strides = [1, 1]} : vector<64x128xf32> to vector<64x32xf32>
    %100 = vector.extract_strided_slice %34 {offsets = [0, 96], sizes = [64, 32], strides = [1, 1]} : vector<64x128xf32> to vector<64x32xf32>
    %101 = arith.truncf %98 : vector<64x32xf32> to vector<64x32xbf16>
    %102 = arith.truncf %99 : vector<64x32xf32> to vector<64x32xbf16>
    %cst_30 = arith.constant dense<0.000000e+00> : vector<64x64xf32>
    %103 = tpu.matmul %101, %102, %cst_30 {dimension_numbers = #tpu.dot_dimension_numbers<[1], [1], [0], [0], [0, 0, 1, 0], [], []>} : vector<64x32xbf16>, vector<64x32xbf16>, vector<64x64xf32> -> vector<64x64xf32>
    %cst_31 = arith.constant 0.176776692 : f32
    %104 = vector.broadcast %cst_31 : f32 to vector<64x64xf32>
    %105 = arith.mulf %103, %104 : vector<64x64xf32>
    %cst_32 = arith.constant dense<0xFF800000> : vector<64xf32>
    %106 = vector.multi_reduction <maximumf>, %105, %cst_32 [1] : vector<64x64xf32> to vector<64xf32>
    %107 = vector.shape_cast %106 : vector<64xf32> to vector<64x1xf32>
    %108 = vector.broadcast %107 : vector<64x1xf32> to vector<64x64xf32>
    %109 = arith.subf %105, %108 : vector<64x64xf32>
    %110 = math.exp %109 : vector<64x64xf32>
    %cst_33 = arith.constant dense<0.000000e+00> : vector<64xf32>
    %111 = vector.multi_reduction <add>, %110, %cst_33 [1] : vector<64x64xf32> to vector<64xf32>
    %112 = vector.shape_cast %111 : vector<64xf32> to vector<64x1xf32>
    %113 = tpu.reciprocal %112 : vector<64x1xf32> -> vector<64x1xf32>
    %114 = vector.broadcast %113 : vector<64x1xf32> to vector<64x64xf32>
    %115 = arith.mulf %110, %114 : vector<64x64xf32>
    %116 = arith.truncf %115 : vector<64x64xf32> to vector<64x64xbf16>
    %117 = arith.truncf %100 : vector<64x32xf32> to vector<64x32xbf16>
    %cst_34 = arith.constant dense<0.000000e+00> : vector<64x32xf32>
    %118 = tpu.matmul %116, %117, %cst_34 {dimension_numbers = #tpu.dot_dimension_numbers<[1], [0], [0], [1], [0, 0, 1, 1], [], []>} : vector<64x64xbf16>, vector<64x32xbf16>, vector<64x32xf32> -> vector<64x32xf32>
    %119 = tpu.concatenate %55, %76, %97, %118 in 1 : vector<64x32xf32>, vector<64x32xf32>, vector<64x32xf32>, vector<64x32xf32> -> vector<64x128xf32>
    %c0_35 = arith.constant 0 : index
    %c0_36 = arith.constant 0 : index
    %120 = vector.load %arg6[%c0_35, %c0_36] : memref<128x128xbf16, #tpu.memory_space<vmem>>, vector<128x128xbf16>
    %121 = arith.truncf %119 : vector<64x128xf32> to vector<64x128xbf16>
    %cst_37 = arith.constant dense<0.000000e+00> : vector<64x128xf32>
    %122 = tpu.matmul %121, %120, %cst_37 {dimension_numbers = #tpu.dot_dimension_numbers<[1], [0], [0], [1], [0, 0, 1, 1], [], []>} : vector<64x128xbf16>, vector<128x128xbf16>, vector<64x128xf32> -> vector<64x128xf32>
    %c0_38 = arith.constant 0 : index
    %c0_39 = arith.constant 0 : index
    %123 = vector.load %arg7[%c0_38, %c0_39] : memref<1x128xf32, #tpu.memory_space<vmem>>, vector<1x128xf32>
    %124 = vector.broadcast %123 : vector<1x128xf32> to vector<64x128xf32>
    %125 = arith.addf %122, %124 : vector<64x128xf32>
    %126 = arith.addf %125, %25 : vector<64x128xf32>
    %c0_40 = arith.constant 0 : index
    %c0_41 = arith.constant 0 : index
    %127 = vector.load %arg8[%c0_40, %c0_41] : memref<1x128xf32, #tpu.memory_space<vmem>>, vector<1x128xf32>
    %c0_42 = arith.constant 0 : index
    %c0_43 = arith.constant 0 : index
    %128 = vector.load %arg9[%c0_42, %c0_43] : memref<1x128xf32, #tpu.memory_space<vmem>>, vector<1x128xf32>
    %cst_44 = arith.constant dense<0.000000e+00> : vector<64xf32>
    %129 = vector.multi_reduction <add>, %126, %cst_44 [1] : vector<64x128xf32> to vector<64xf32>
    %130 = vector.shape_cast %129 : vector<64xf32> to vector<64x1xf32>
    %cst_45 = arith.constant 1.280000e+02 : f32
    %131 = vector.broadcast %cst_45 : f32 to vector<64x1xf32>
    %132 = arith.divf %130, %131 : vector<64x1xf32>
    %133 = vector.broadcast %132 : vector<64x1xf32> to vector<64x128xf32>
    %134 = arith.subf %126, %133 : vector<64x128xf32>
    %135 = arith.mulf %134, %134 : vector<64x128xf32>
    %cst_46 = arith.constant dense<0.000000e+00> : vector<64xf32>
    %136 = vector.multi_reduction <add>, %135, %cst_46 [1] : vector<64x128xf32> to vector<64xf32>
    %137 = vector.shape_cast %136 : vector<64xf32> to vector<64x1xf32>
    %cst_47 = arith.constant 1.280000e+02 : f32
    %138 = vector.broadcast %cst_47 : f32 to vector<64x1xf32>
    %139 = arith.divf %137, %138 : vector<64x1xf32>
    %140 = vector.broadcast %132 : vector<64x1xf32> to vector<64x128xf32>
    %141 = arith.subf %126, %140 : vector<64x128xf32>
    %cst_48 = arith.constant 9.99999996E-13 : f32
    %142 = vector.broadcast %cst_48 : f32 to vector<64x1xf32>
    %143 = arith.addf %139, %142 : vector<64x1xf32>
    %144 = math.rsqrt %143 : vector<64x1xf32>
    %145 = vector.broadcast %144 : vector<64x1xf32> to vector<64x128xf32>
    %146 = arith.mulf %141, %145 : vector<64x128xf32>
    %147 = vector.broadcast %127 : vector<1x128xf32> to vector<64x128xf32>
    %148 = arith.mulf %146, %147 : vector<64x128xf32>
    %149 = vector.broadcast %128 : vector<1x128xf32> to vector<64x128xf32>
    %150 = arith.addf %148, %149 : vector<64x128xf32>
    %cst_49 = arith.constant dense<0.000000e+00> : vector<64xf32>
    %151 = vector.multi_reduction <add>, %150, %cst_49 [1] : vector<64x128xf32> to vector<64xf32>
    %152 = vector.shape_cast %151 : vector<64xf32> to vector<64x1xf32>
    %cst_50 = arith.constant 1.280000e+02 : f32
    %153 = vector.broadcast %cst_50 : f32 to vector<64x1xf32>
    %154 = arith.divf %152, %153 : vector<64x1xf32>
    %155 = vector.broadcast %154 : vector<64x1xf32> to vector<64x128xf32>
    %156 = arith.subf %150, %155 : vector<64x128xf32>
    %157 = arith.mulf %156, %156 : vector<64x128xf32>
    %cst_51 = arith.constant dense<0.000000e+00> : vector<64xf32>
    %158 = vector.multi_reduction <add>, %157, %cst_51 [1] : vector<64x128xf32> to vector<64xf32>
    %159 = vector.shape_cast %158 : vector<64xf32> to vector<64x1xf32>
    %cst_52 = arith.constant 1.280000e+02 : f32
    %160 = vector.broadcast %cst_52 : f32 to vector<64x1xf32>
    %161 = arith.divf %159, %160 : vector<64x1xf32>
    %162 = vector.broadcast %154 : vector<64x1xf32> to vector<64x128xf32>
    %163 = arith.subf %150, %162 : vector<64x128xf32>
    %cst_53 = arith.constant 9.99999996E-13 : f32
    %164 = vector.broadcast %cst_53 : f32 to vector<64x1xf32>
    %165 = arith.addf %161, %164 : vector<64x1xf32>
    %166 = math.rsqrt %165 : vector<64x1xf32>
    %167 = vector.broadcast %166 : vector<64x1xf32> to vector<64x128xf32>
    %168 = arith.mulf %163, %167 : vector<64x128xf32>
    %169 = vector.broadcast %2 : vector<1x128xf32> to vector<64x128xf32>
    %170 = arith.mulf %168, %169 : vector<64x128xf32>
    %171 = vector.broadcast %3 : vector<1x128xf32> to vector<64x128xf32>
    %172 = arith.addf %170, %171 : vector<64x128xf32>
    %c0_54 = arith.constant 0 : index
    %c0_55 = arith.constant 0 : index
    %173 = vector.load %arg10[%c0_54, %c0_55] : memref<128x512xbf16, #tpu.memory_space<vmem>>, vector<128x512xbf16>
    %174 = arith.truncf %172 : vector<64x128xf32> to vector<64x128xbf16>
    %cst_56 = arith.constant dense<0.000000e+00> : vector<64x512xf32>
    %175 = tpu.matmul %174, %173, %cst_56 {dimension_numbers = #tpu.dot_dimension_numbers<[1], [0], [0], [1], [0, 0, 1, 1], [], []>} : vector<64x128xbf16>, vector<128x512xbf16>, vector<64x512xf32> -> vector<64x512xf32>
    %c0_57 = arith.constant 0 : index
    %c0_58 = arith.constant 0 : index
    %176 = vector.load %arg11[%c0_57, %c0_58] : memref<1x512xf32, #tpu.memory_space<vmem>>, vector<1x512xf32>
    %177 = vector.broadcast %176 : vector<1x512xf32> to vector<64x512xf32>
    %178 = arith.addf %175, %177 : vector<64x512xf32>
    %cst_59 = arith.constant 5.000000e-01 : f32
    %179 = vector.broadcast %cst_59 : f32 to vector<64x512xf32>
    %180 = arith.mulf %179, %178 : vector<64x512xf32>
    %cst_60 = arith.constant 4.471500e-02 : f32
    %181 = vector.broadcast %cst_60 : f32 to vector<64x512xf32>
    %182 = arith.mulf %181, %178 : vector<64x512xf32>
    %183 = arith.mulf %182, %178 : vector<64x512xf32>
    %184 = arith.mulf %183, %178 : vector<64x512xf32>
    %185 = arith.addf %178, %184 : vector<64x512xf32>
    %cst_61 = arith.constant 0.797884583 : f32
    %186 = vector.broadcast %cst_61 : f32 to vector<64x512xf32>
    %187 = arith.mulf %186, %185 : vector<64x512xf32>
    %188 = math.tanh %187 : vector<64x512xf32>
    %cst_62 = arith.constant 1.000000e+00 : f32
    %189 = vector.broadcast %cst_62 : f32 to vector<64x512xf32>
    %190 = arith.addf %189, %188 : vector<64x512xf32>
    %191 = arith.mulf %180, %190 : vector<64x512xf32>
    %c0_63 = arith.constant 0 : index
    %c0_64 = arith.constant 0 : index
    %192 = vector.load %arg12[%c0_63, %c0_64] : memref<512x128xbf16, #tpu.memory_space<vmem>>, vector<512x128xbf16>
    %193 = arith.truncf %191 : vector<64x512xf32> to vector<64x512xbf16>
    %cst_65 = arith.constant dense<0.000000e+00> : vector<64x128xf32>
    %194 = tpu.matmul %193, %192, %cst_65 {dimension_numbers = #tpu.dot_dimension_numbers<[1], [0], [0], [1], [0, 0, 1, 1], [], []>} : vector<64x512xbf16>, vector<512x128xbf16>, vector<64x128xf32> -> vector<64x128xf32>
    %c0_66 = arith.constant 0 : index
    %c0_67 = arith.constant 0 : index
    %195 = vector.load %arg13[%c0_66, %c0_67] : memref<1x128xf32, #tpu.memory_space<vmem>>, vector<1x128xf32>
    %196 = vector.broadcast %195 : vector<1x128xf32> to vector<64x128xf32>
    %197 = arith.addf %194, %196 : vector<64x128xf32>
    %198 = arith.addf %197, %172 : vector<64x128xf32>
    %c0_68 = arith.constant 0 : index
    %c0_69 = arith.constant 0 : index
    %199 = vector.load %arg14[%c0_68, %c0_69] : memref<1x128xf32, #tpu.memory_space<vmem>>, vector<1x128xf32>
    %c0_70 = arith.constant 0 : index
    %c0_71 = arith.constant 0 : index
    %200 = vector.load %arg15[%c0_70, %c0_71] : memref<1x128xf32, #tpu.memory_space<vmem>>, vector<1x128xf32>
    %cst_72 = arith.constant dense<0.000000e+00> : vector<64xf32>
    %201 = vector.multi_reduction <add>, %198, %cst_72 [1] : vector<64x128xf32> to vector<64xf32>
    %202 = vector.shape_cast %201 : vector<64xf32> to vector<64x1xf32>
    %cst_73 = arith.constant 1.280000e+02 : f32
    %203 = vector.broadcast %cst_73 : f32 to vector<64x1xf32>
    %204 = arith.divf %202, %203 : vector<64x1xf32>
    %205 = vector.broadcast %204 : vector<64x1xf32> to vector<64x128xf32>
    %206 = arith.subf %198, %205 : vector<64x128xf32>
    %207 = arith.mulf %206, %206 : vector<64x128xf32>
    %cst_74 = arith.constant dense<0.000000e+00> : vector<64xf32>
    %208 = vector.multi_reduction <add>, %207, %cst_74 [1] : vector<64x128xf32> to vector<64xf32>
    %209 = vector.shape_cast %208 : vector<64xf32> to vector<64x1xf32>
    %cst_75 = arith.constant 1.280000e+02 : f32
    %210 = vector.broadcast %cst_75 : f32 to vector<64x1xf32>
    %211 = arith.divf %209, %210 : vector<64x1xf32>
    %212 = vector.broadcast %204 : vector<64x1xf32> to vector<64x128xf32>
    %213 = arith.subf %198, %212 : vector<64x128xf32>
    %cst_76 = arith.constant 9.99999996E-13 : f32
    %214 = vector.broadcast %cst_76 : f32 to vector<64x1xf32>
    %215 = arith.addf %211, %214 : vector<64x1xf32>
    %216 = math.rsqrt %215 : vector<64x1xf32>
    %217 = vector.broadcast %216 : vector<64x1xf32> to vector<64x128xf32>
    %218 = arith.mulf %213, %217 : vector<64x128xf32>
    %219 = vector.broadcast %199 : vector<1x128xf32> to vector<64x128xf32>
    %220 = arith.mulf %218, %219 : vector<64x128xf32>
    %221 = vector.broadcast %200 : vector<1x128xf32> to vector<64x128xf32>
    %222 = arith.addf %220, %221 : vector<64x128xf32>
    %c0_77 = arith.constant 0 : index
    %c0_78 = arith.constant 0 : index
    %c0_79 = arith.constant 0 : index
    %223 = vector.load %arg16[%c0_77, %c0_78, %c0_79] : memref<1x64x128xf32, #tpu.memory_space<vmem>>, vector<1x64x128xf32>
    %224 = vector.shape_cast %223 : vector<1x64x128xf32> to vector<64x128xf32>
    %225 = vector.shape_cast %222 : vector<64x128xf32> to vector<1x64x128xf32>
    tpu.vector_store %arg16[%c0_77, %c0_78, %c0_79], %225 {strides = array<i32>} : memref<1x64x128xf32, #tpu.memory_space<vmem>>, vector<1x64x128xf32>,
    return
  }
  func.func @transform_0(%arg0: i32) -> (i32, i32, i32) {
    %c0_i32 = arith.constant 0 : i32
    %c0_i32_0 = arith.constant 0 : i32
    %c0_i32_1 = arith.constant 0 : i32
    return %arg0, %c0_i32, %c0_i32_0 : i32, i32, i32
  }
  func.func @transform_1(%arg0: i32) -> (i32, i32) {
    %c0_i32 = arith.constant 0 : i32
    %c0_i32_0 = arith.constant 0 : i32
    %c0_i32_1 = arith.constant 0 : i32
    return %c0_i32, %c0_i32_0 : i32, i32
  }
  func.func @transform_2(%arg0: i32) -> (i32, i32) {
    %c0_i32 = arith.constant 0 : i32
    %c0_i32_0 = arith.constant 0 : i32
    %c0_i32_1 = arith.constant 0 : i32
    return %c0_i32, %c0_i32_0 : i32, i32
  }
  func.func @transform_3(%arg0: i32) -> (i32, i32) {
    %c0_i32 = arith.constant 0 : i32
    %c0_i32_0 = arith.constant 0 : i32
    %c0_i32_1 = arith.constant 0 : i32
    return %c0_i32, %c0_i32_0 : i32, i32
  }
  func.func @transform_4(%arg0: i32) -> (i32, i32) {
    %c0_i32 = arith.constant 0 : i32
    %c0_i32_0 = arith.constant 0 : i32
    %c0_i32_1 = arith.constant 0 : i32
    return %c0_i32, %c0_i32_0 : i32, i32
  }
  func.func @transform_5(%arg0: i32) -> (i32, i32) {
    %c0_i32 = arith.constant 0 : i32
    %c0_i32_0 = arith.constant 0 : i32
    %c0_i32_1 = arith.constant 0 : i32
    return %c0_i32, %c0_i32_0 : i32, i32
  }
  func.func @transform_6(%arg0: i32) -> (i32, i32) {
    %c0_i32 = arith.constant 0 : i32
    %c0_i32_0 = arith.constant 0 : i32
    %c0_i32_1 = arith.constant 0 : i32
    return %c0_i32, %c0_i32_0 : i32, i32
  }
  func.func @transform_7(%arg0: i32) -> (i32, i32) {
    %c0_i32 = arith.constant 0 : i32
    %c0_i32_0 = arith.constant 0 : i32
    %c0_i32_1 = arith.constant 0 : i32
    return %c0_i32, %c0_i32_0 : i32, i32
  }
  func.func @transform_8(%arg0: i32) -> (i32, i32) {
    %c0_i32 = arith.constant 0 : i32
    %c0_i32_0 = arith.constant 0 : i32
    %c0_i32_1 = arith.constant 0 : i32
    return %c0_i32, %c0_i32_0 : i32, i32
  }
  func.func @transform_9(%arg0: i32) -> (i32, i32) {
    %c0_i32 = arith.constant 0 : i32
    %c0_i32_0 = arith.constant 0 : i32
    %c0_i32_1 = arith.constant 0 : i32
    return %c0_i32, %c0_i32_0 : i32, i32
  }
  func.func @transform_10(%arg0: i32) -> (i32, i32) {
    %c0_i32 = arith.constant 0 : i32
    %c0_i32_0 = arith.constant 0 : i32
    %c0_i32_1 = arith.constant 0 : i32
    return %c0_i32, %c0_i32_0 : i32, i32
  }
  func.func @transform_11(%arg0: i32) -> (i32, i32) {
    %c0_i32 = arith.constant 0 : i32
    %c0_i32_0 = arith.constant 0 : i32
    %c0_i32_1 = arith.constant 0 : i32
    return %c0_i32, %c0_i32_0 : i32, i32
  }
  func.func @transform_12(%arg0: i32) -> (i32, i32) {
    %c0_i32 = arith.constant 0 : i32
    %c0_i32_0 = arith.constant 0 : i32
    %c0_i32_1 = arith.constant 0 : i32
    return %c0_i32, %c0_i32_0 : i32, i32
  }
  func.func @transform_13(%arg0: i32) -> (i32, i32) {
    %c0_i32 = arith.constant 0 : i32
    %c0_i32_0 = arith.constant 0 : i32
    %c0_i32_1 = arith.constant 0 : i32
    return %c0_i32, %c0_i32_0 : i32, i32
  }
  func.func @transform_14(%arg0: i32) -> (i32, i32) {
    %c0_i32 = arith.constant 0 : i32
    %c0_i32_0 = arith.constant 0 : i32
    %c0_i32_1 = arith.constant 0 : i32
    return %c0_i32, %c0_i32_0 : i32, i32
  }
  func.func @transform_15(%arg0: i32) -> (i32, i32, i32) {
    %c0_i32 = arith.constant 0 : i32
    %c0_i32_0 = arith.constant 0 : i32
    %c0_i32_1 = arith.constant 0 : i32
    return %arg0, %c0_i32, %c0_i32_0 : i32, i32, i32
  }
}

</mosaic_0001>

<bundles_post_ra>
// kernel: tpu_custom_call.1
= control target key start
LH: loop header
LB: loop body
LE: loop exit
PB: predicated region body
PF: predicated region fallthrough
CT: control target
= control target key end

     0   :  { %s7639_s0 = inlined_call_operand.hbm [shape: f32[2,64,128], index: 0, kind: input, shape index: {}]   ;;  %s7640_s1 = inlined_call_operand.hbm [shape: f32[1,128], index: 1, kind: input, shape index: {}]   ;;  %s7641_s2 = inlined_call_operand.hbm [shape: f32[1,128], index: 2, kind: input, shape index: {}]   ;;  %s7642_s3 = inlined_call_operand.hbm [shape: bf16[128,384], index: 3, kind: input, shape index: {}]   ;;  %s7643_s4 = inlined_call_operand.vmem [shape: f32[1,384], index: 4, kind: input, shape index: {}]   ;;  %s7644_s5 = inlined_call_operand.hbm [shape: bf16[128,128], index: 5, kind: input, shape index: {}]   ;;  %s7645_s6 = inlined_call_operand.hbm [shape: f32[1,128], index: 6, kind: input, shape index: {}]   ;;  %s7646_s7 = inlined_call_operand.hbm [shape: f32[1,128], index: 7, kind: input, shape index: {}]   ;;  %s7647_s8 = inlined_call_operand.hbm [shape: f32[1,128], index: 8, kind: input, shape index: {}]   ;;  %s7648_s9 = inlined_call_operand.hbm [shape: bf16[128,512], index: 9, kind: input, shape index: {}]   ;;  %s7649_s10 = inlined_call_operand.vmem [shape: f32[1,512], index: 10, kind: input, shape index: {}]   ;;  %s7650_s11 = inlined_call_operand.hbm [shape: bf16[512,128], index: 11, kind: input, shape index: {}]   ;;  %s7651_s12 = inlined_call_operand.vmem [shape: f32[1,128], index: 12, kind: input, shape index: {}]   ;;  %s7652_s13 = inlined_call_operand.vmem [shape: f32[1,128], index: 13, kind: input, shape index: {}]   ;;  %s7653_s14 = inlined_call_operand.vmem [shape: f32[1,128], index: 14, kind: input, shape index: {}]   ;;  %s7654_s15 = inlined_call_operand.hbm [shape: f32[2,64,128], index: 15, kind: output, shape index: {}]  }
   0x1   :  { %7666 = sst [smem:[#allocation36_spill]] %s7640_s1 }
   0x2   :  { %7667 = sst [smem:[#allocation37_spill]] %s7641_s2 }
   0x3   :  { %7668 = sst [smem:[#allocation38_spill]] %s7642_s3 }
   0x4   :  { %7669 = sst [smem:[#allocation39_spill]] %s7644_s5 }
   0x5   :  { %7670 = sst [smem:[#allocation40_spill]] %s7645_s6 }
   0x6   :  { %7671 = sst [smem:[#allocation41_spill]] %s7649_s10 }
   0x7   :  { %7672 = sst [smem:[#allocation42_spill]] %s7651_s12 }
   0x8   :  { %7673 = sst [smem:[#allocation43_spill]] %s7652_s13 }
   0x9   :  { %7674 = sst [smem:[#allocation44_spill]] %s7653_s14 }
   0xa   :  { %7675 = sst [smem:[#allocation45_spill]] %s7654_s15 }
   0xb   :  { %20 = vsyncpa [#allocation3], 0 }
   0xc   :  { %22 = vsyncpa [#allocation3 + $0x1], 0 }
   0xd   :  { %23 = vsyncpa [#allocation6], 0 }
   0xe   :  { %24 = vsyncpa [#allocation9], 0 }
   0xf   :  { %25 = vsyncpa [#allocation12], 0 }
  0x10   :  { %26 = vsyncpa [#allocation15], 0 }
  0x11   :  { %27 = vsyncpa [#allocation18], 0 }
  0x12   :  { %28 = vsyncpa [#allocation4], 0 }
  0x13   :  { %30 = vsyncpa [#allocation4 + $0x1], 0  ;;  %s5898_s18 = smov 0   ;;  %s5900_s19 = smov 0  }
  0x14   :  { %s5902_s20 = smov 0   ;;  %s5904_s21 = smov 0  }
  0x15 LB: > { %s7676_s1 = sld [smem:[#allocation36_spill]]  ;;  %s5922_s25 = sadd.s32 4294967295, %s5793_s21   ;;  %s5793_s21 = sphi %s5904_s21, %s7751_s21   ;;  %s5789_s20 = sphi %s5902_s20, %s7750_s20   ;;  %s5785_s19 = sphi %s5900_s19, %s7749_s19   ;;  %s5781_s18 = sphi %s5898_s18, %s7748_s18  }
  0x16   : > { %p4383_p0 = scmp.ge.s32.totalorder %s5793_s21, 1  ;;  %p57_p1 = scmp.eq.s32.totalorder %s5922_s25, 0 }
  0x17   : > { %p387_p2 = scmp.lt.s32.totalorder %s5793_s21, 3  ;;  %s5795_s27 = smov [#allocation5]  }
  0x18   : > { %s401_s28 = sshll.u32 %s5795_s27, 4  ;;  %s7678_s3 = sld [smem:[#allocation38_spill]]  ;;  %s402_s28 = int_to_ptr.vmem [resolvable:$true] %s401_s28 }
  0x19   : > { %p5927_p3 = pnand %p4383_p0, %p387_p2  ;;  %s5796_s22 = smov [#allocation8]  }
  0x1a   : > { %s424_s23 = sshll.u32 %s5796_s22, 4  ;;  %s5797_s27 = smov 192   ;;  %s425_s23 = int_to_ptr.vmem [resolvable:$true] %s424_s23 }
  0x1b   : > { %s399_s24 = sshll.u32 %s7676_s1, 4  ;;  %p4968_p5 = pneg %p5927_p3  ;;  %s400_s24 = int_to_ptr.hbm [resolvable:$true] %s399_s24 }
  0x1c   : > { %s5798_s1 = smov 12   ;;  %s7680_s6 = sld [smem:[#allocation40_spill]] }
  0x1d   : > { %p5939_p6 = pnand %p4968_p5, %p57_p1  ;;  %s5799_s15 = smov [#allocation11]  }
  0x1e   : > { %s422_s16 = sshll.u32 %s7678_s3, 4  ;;  %s456_s14 = sshll.u32 %s5799_s15, 4  ;;  %s423_s16 = int_to_ptr.hbm [resolvable:$true] %s422_s16  ;;  %s457_s14 = int_to_ptr.vmem [resolvable:$true] %s456_s14 }
  0x1f   : > { %4971 = dma.hbm_to_vmem [thread:$0]  (!%p5939_p6), %s400_s24, 16, %s402_s28, [#allocation6]  }
  0x20   : > { %4977 = dma.hbm_to_vmem [thread:$0]  (!%p5939_p6), %s423_s16, 3072, %s425_s23, [#allocation9], %s5797_s27, %s5797_s27, %s5798_s1  }
  0x21   : > { %s478_s22 = sshll.u32 %s7647_s8, 4  ;;  %s5800_s24 = smov [#allocation14]   ;;  %s479_s22 = int_to_ptr.hbm [resolvable:$true] %s478_s22 }
  0x22   : > { %s454_s3 = sshll.u32 %s7680_s6, 4  ;;  %s480_s28 = sshll.u32 %s5800_s24, 4  ;;  %s455_s3 = int_to_ptr.hbm [resolvable:$true] %s454_s3  ;;  %s481_s28 = int_to_ptr.vmem [resolvable:$true] %s480_s28 }
  0x23   : > { %4983 = dma.hbm_to_vmem [thread:$0]  (!%p5939_p6), %s455_s3, 16, %s457_s14, [#allocation12]  }
  0x24   : > { %s7681_s2 = sld [smem:[#allocation37_spill]]  ;;  %s5801_s12 = smov [#allocation7]  }
  0x25   : > { %4989 = dma.hbm_to_vmem [thread:$0]  (!%p5939_p6), %s479_s22, 16, %s481_s28, [#allocation15]  }
  0x26   : > { %s7682_s5 = sld [smem:[#allocation39_spill]]  ;;  %s413_s13 = sshll.u32 %s5801_s12, 4  ;;  %s414_s13 = int_to_ptr.vmem [resolvable:$true] %s413_s13 }
  0x27   : > { %s5802_s3 = smov [#allocation10]   ;;  %s5803_s10 = smov 64  }
  0x28   : > { %s441_s14 = sshll.u32 %s5802_s3, 4  ;;  %s5804_s29 = smov 4   ;;  %s442_s14 = int_to_ptr.vmem [resolvable:$true] %s441_s14 }
  0x29   : > { %s466_s24 = sshll.u32 %s7646_s7, 4  ;;  %s5805_s28 = smov [#allocation13]   ;;  %s467_s24 = int_to_ptr.hbm [resolvable:$true] %s466_s24 }
  0x2a   : > { %s411_s16 = sshll.u32 %s7681_s2, 4  ;;  %s468_s1 = sshll.u32 %s5805_s28, 4  ;;  %s412_s16 = int_to_ptr.hbm [resolvable:$true] %s411_s16  ;;  %s469_s1 = int_to_ptr.vmem [resolvable:$true] %s468_s1 }
  0x2b   : > { %4974 = dma.hbm_to_vmem [thread:$0]  (!%p5939_p6), %s412_s16, 16, %s414_s13, [#allocation6]  }
  0x2c   : > { %s439_s27 = sshll.u32 %s7682_s5, 4  ;;  %s489_s16 = sshll.u32 %s7648_s9, 4  ;;  %s440_s27 = int_to_ptr.hbm [resolvable:$true] %s439_s27  ;;  %s490_s16 = int_to_ptr.hbm [resolvable:$true] %s489_s16 }
  0x2d   : > { %4980 = dma.hbm_to_vmem [thread:$0]  (!%p5939_p6), %s440_s27, 1024, %s442_s14, [#allocation9], %s5803_s10, %s5803_s10, %s5804_s29  }
  0x2e   : > { %4986 = dma.hbm_to_vmem [thread:$0]  (!%p5939_p6), %s467_s24, 16, %s469_s1, [#allocation12]  }
  0x2f   : > { %s5806_s27 = smov [#allocation16]   ;;  %s5807_s13 = smov 256  }
  0x30   : > { %s491_s12 = sshll.u32 %s5806_s27, 4  ;;  %s5808_s3 = smov 16   ;;  %s492_s12 = int_to_ptr.vmem [resolvable:$true] %s491_s12 }
  0x31   : > { %4992 = dma.hbm_to_vmem [thread:$0]  (!%p5939_p6), %s490_s16, 4096, %s492_s12, [#allocation15], %s5807_s13, %s5807_s13, %s5808_s3  }
  0x32   : > { %s506_s22 = sshll.u32 %s7650_s11, 4  ;;  %s5809_s24 = smov [#allocation17]   ;;  %s507_s22 = int_to_ptr.hbm [resolvable:$true] %s506_s22 }
  0x33   : > { %s508_s28 = sshll.u32 %s5809_s24, 4  ;;  %s4382_s1 = sadd.s32 4294967294, %s5793_s21   ;;  %s509_s28 = int_to_ptr.vmem [resolvable:$true] %s508_s28 }
  0x34   : > { %4995 = dma.hbm_to_vmem [thread:$0]  (!%p5939_p6), %s507_s22, 4096, %s509_s28, [#allocation18], %s5803_s10, %s5803_s10, %s5804_s29  }
  0x35   : > { %s5984_s15 = sadd.s32 1, %s5793_s21   ;;  %s43_s23 = sadd.s32 1, %s5789_s20 }
  0x36   : > { %s40_s16 = ssub.s32 %s5793_s21, %s5984_s15  ;;  %p50_p7 = scmp.ne.s32.totalorder %s5789_s20, %s5785_s19 }
  0x37   : > { %p41_p8 = scmp.eq.s32.totalorder %s40_s16, 0  ;;  %p51_p9 = scmp.eq.s32.totalorder %s5793_s21, 0 }
  0x38   : > { %p56_p10 = scmp.ne.s32.totalorder %s5785_s19, %s5781_s18  ;;  %p374_p11 = scmp.eq.s32.totalorder %s5922_s25, 1 }
  0x39   : > { %s5996_s27 = scalar_select %p41_p8, %s5789_s20, %s43_s23  }
  0x3a   : > { %p5998_p12 = por %p51_p9, %p50_p7  ;;  %p6004_p13 = por %p57_p1, %p56_p10 }
  0x3b   : > { %p6008_p0 = por %p374_p11, %p50_p7  ;;  %p380_p2 = scmp.eq.s32.totalorder %s4382_s1, 1 }
  0x3c   : > { %p5013_p5 = scmp.lt.s32.totalorder %s5793_s21, 2  ;;  %s531_s29 = sand.u32 1, %s5789_s20  }
  0x3d   : > { %p6014_p6 = por %p380_p2, %p56_p10  ;;  %s4394_s3 = sshll.u32 %s531_s29, 6 }
  0x3e   : > { %s4830_s14 = sshll.u32 %s5793_s21, 6  ;;  %s535_s23 = scalar_lea.vmem [#allocation2], %s4394_s3 }
  0x3f   : > { %s540_s24 = scalar_lea.hbm %s7639_s0, %s4830_s14  ;;  %s543_s16 = sshll.u32 %s535_s23, 4  ;;  %s544_s16 = int_to_ptr.vmem [resolvable:$true] %s543_s16 }
  0x40   : > { %s541_s28 = sshll.u32 %s540_s24, 4  ;;  %p6024_p7 = pnand %p5013_p5, %p5998_p12  ;;  %s542_s28 = int_to_ptr.hbm [resolvable:$true] %s541_s28 }
  0x41   : > { %s532_s2 = scalar_lea.sflag [#allocation3], %s531_s29  ;;  %s5677_s5 = sshra.s32 %s542_s28, 4  ;;  %s5678_s5 = int_to_ptr.hbm [resolvable:$true] %s5677_s5 }
  0x42   : > { %s5679_s6 = scalar_lea.hbm %s5678_s5, 64  ;;  %p5681_p9 = pneg %p6024_p7 }
  0x43   : > { %p5680_p8 = scmp.ne.s32.totalorder %s5678_s5, %s5679_s6  ;;  %s5684_s30 = scalar_lea.hbm %s7639_s0, 128 }
  0x44   : > { %p5685_p12 = scmp.lt.s32.totalorder %s5678_s5, %s7639_s0  ;;  %p5686_p2 = scmp.lt.s32.totalorder %s5684_s30, %s5679_s6 }
  0x45   : > { %p5682_p10 = pnand %p5681_p9, %p5680_p8 }
  0x46   : > { %p5687_p5 = por %p5686_p2, %p5685_p12 }
  0x47   : > { %p5683_p11 = pneg %p5682_p10 }
  0x49   : > { %p5688_p4 = pnand %p5687_p5, %p5683_p11 }
  0x4b   : > { %5691 = shalt.err (!%p5688_p4)
}
  0x4c   : > { %s5810_s29 = smov 128   ;;  %s5811_s24 = smov 8  }
  0x4d   : > { %4999 = dma.hbm_to_vmem [thread:$0]  (!%p6024_p7), %s542_s28, 1024, %s544_s16, %s532_s2, %s5810_s29, %s5810_s29, %s5811_s24  }
  0x4e   : > { %555 = sbr.rel (%p5927_p3) target bundleno = 2947 (0xb83), region = 80 }
  0x53   : > { %s6041_s23 = sand.u32 1, %s5785_s19  }
  0x54   : > { %s4398_s5 = sshll.u32 %s6041_s23, 6  ;;  %s558_s6 = scalar_lea.sflag [#allocation3], %s6041_s23 }
  0x55   : > { %s6047_s14 = scalar_lea.vmem [#allocation2], %s4398_s5 }
  0x56   : > { %5752 = dma.done.wait (%p6004_p13), %s558_s6, 1024  }
  0x57   : > { %5754 = vsyncadd (%p6004_p13), %s558_s6, 4294966272 }
  0x58   : > { %5756 = dma.done.wait (%p57_p1), [#allocation6], 32  }
  0x59   : > { %5758 = vsyncadd (%p57_p1), [#allocation6], 4294967264 }
  0x5a   : > { %5760 = dma.done.wait (%p57_p1), [#allocation9], 4096  }
  0x5b   : > { %5762 = vsyncadd (%p57_p1), [#allocation9], 4294963200 }
  0x5c   : > { %5764 = dma.done.wait (%p57_p1), [#allocation12], 32  }
  0x5d   : > { %5766 = vsyncadd (%p57_p1), [#allocation12], 4294967264 }
  0x5e   : > { %5768 = dma.done.wait (%p57_p1), [#allocation15], 4112  }
  0x5f   : > { %5770 = vsyncadd (%p57_p1), [#allocation15], 4294963184 }
  0x60   : > { %5772 = dma.done.wait (%p57_p1), [#allocation18], 4096  }
  0x61   : > { %5774 = vsyncadd (%p57_p1), [#allocation18], 4294963200  ;;  %v659_v0 = vld [vmem:[%s6047_s14 + $0x20] sm:$0xff]  ;;  %v657_v1 = vld [vmem:[%s6047_s14 + $0x10] sm:$0xff]  ;;  %v5812_v7 = vmov 128.0   ;;  %s5813_s17 = smov 96  }
  0x62   : > { %v655_v2 = vld [vmem:[%s6047_s14] sm:$0xff]  ;;  %673 = vadd.xlane.f32.xlu2 %v659_v0  ;;  %669 = vadd.xlane.f32.xlu1 %v657_v1  ;;  %v660_v3 = vld [vmem:[%s6047_s14 + $0x28] sm:$0xff]  ;;  %v658_v4 = vld [vmem:[%s6047_s14 + $0x18] sm:$0xff]  ;;  %5147 = vrcp.f32 %v5812_v7  ;;  %s5814_s28 = smov 64   ;;  %s5815_s16 = smov 32  }
  0x63   : > { %665 = vadd.xlane.f32.xlu0 %v655_v2  ;;  %v656_v5 = vld [vmem:[%s6047_s14 + $0x8] sm:$0xff]  ;;  %v661_v6 = vld [vmem:[%s6047_s14 + $0x30] sm:$0xff]  ;;  %v6098_v30 = vld [vmem:[%s6047_s14 + $0x38] sm:$0xff]  ;;  %s7742_s30 = sld [smem:[#allocation41_spill]]  ;;  %s4208_s12 = scalar_lea.sflag [#allocation4], %s6041_s23 }
  0x64   : > { %v4495_v43 = vld [vmem:[#allocation8 + $0xa8] sm:$0xf]  ;;  %v4853_v44 = vld [vmem:[#allocation8 + $0xb0] sm:$0xf0]  ;;  %v4852_v45 = vld [vmem:[#allocation8 + $0xac] sm:$0xf] }
  0x65   : > { %v4496_v46 = vor.u32 %v4853_v44, %v4495_v43  ;;  %v4497_v47 = vld [vmem:[#allocation8 + $0xb4] sm:$0xf0]  ;;  %v4503_v48 = vld [vmem:[#allocation8 + $0xb0] sm:$0xf]  ;;  %v4854_v49 = vld [vmem:[#allocation8 + $0xb8] sm:$0xf0] }
  0x66   : > { %v4500_v50 = vor.u32 %v4852_v45, %v4497_v47  ;;  %v4504_v51 = vor.u32 %v4854_v49, %v4503_v48  ;;  %v4483_v52 = vld [vmem:[#allocation8 + $0x90] sm:$0xf]  ;;  %v4850_v53 = vld [vmem:[#allocation8 + $0x98] sm:$0xf0]  ;;  %v4849_v54 = vld [vmem:[#allocation8 + $0x94] sm:$0xf] }
  0x67   : > { %1026 = vmatpush.bf16.msra.mxu0 %v4496_v46  ;;  %v4484_v55 = vor.u32 %v4850_v53, %v4483_v52  ;;  %v4485_v56 = vld [vmem:[#allocation8 + $0x9c] sm:$0xf0]  ;;  %v4491_v57 = vld [vmem:[#allocation8 + $0x98] sm:$0xf]  ;;  %v4851_v58 = vld [vmem:[#allocation8 + $0xa0] sm:$0xf0] }
  0x68   : > { %v5148_v8 = vpop.eup %5147  ;;  %1055 = vmatpush.bf16.msra.mxu1 %v4500_v50  ;;  %1084 = vmatpush.bf16.msra.mxu2 %v4504_v51  ;;  %v4488_v59 = vor.u32 %v4849_v54, %v4485_v56  ;;  %v4492_v60 = vor.u32 %v4851_v58, %v4491_v57  ;;  %v4471_v61 = vld [vmem:[#allocation8 + $0x78] sm:$0xf]  ;;  %v4847_v62 = vld [vmem:[#allocation8 + $0x80] sm:$0xf0]  ;;  %v4846_v63 = vld [vmem:[#allocation8 + $0x7c] sm:$0xf] }
  0x69   : > { %v682_v9 = vmul.f32 128.0, %v5148_v8  ;;  %vm686_vm0 = vweird.f32 %v5148_v8  ;;  %v4844_v7 = vld [vmem:[#allocation8 + $0x68] sm:$0xf0]  ;;  %v4835_v43 = vld [vmem:[#allocation8 + $0x20] sm:$0xf0]  ;;  %s7743_s29 = sld [smem:[#allocation42_spill]] }
  0x6a   : > { %675 = vadd.xlane.f32.xlu2 %v660_v3  ;;  %671 = vadd.xlane.f32.xlu1 %v658_v4  ;;  %v4834_v44 = vld [vmem:[#allocation8 + $0x1c] sm:$0xf]  ;;  %v4425_v46 = vld [vmem:[#allocation8 + $0x24] sm:$0xf0]  ;;  %v4431_v47 = vld [vmem:[#allocation8 + $0x20] sm:$0xf] }
  0x6b   : > { %667 = vadd.xlane.f32.xlu0 %v656_v5  ;;  %v683_v10 = vsub.f32 1.0, %v682_v9  ;;  %1027 = vmatpush.bf16.msra.mxu0 %v4484_v55  ;;  %v4836_v48 = vld [vmem:[#allocation8 + $0x28] sm:$0xf0]  ;;  %v4428_v50 = vor.u32 %v4834_v44, %v4425_v46  ;;  %v4411_v53 = vld [vmem:[#allocation8] sm:$0xf]  ;;  %s7744_s14 = sld [smem:[#allocation43_spill]] }
  0x6c   : > { %1056 = vmatpush.bf16.msra.mxu1 %v4488_v59  ;;  %1085 = vmatpush.bf16.msra.mxu2 %v4492_v60  ;;  %v4432_v51 = vor.u32 %v4836_v48, %v4431_v47  ;;  %v4832_v54 = vld [vmem:[#allocation8 + $0x8] sm:$0xf0]  ;;  %v4831_v55 = vld [vmem:[#allocation8 + $0x4] sm:$0xf]  ;;  %v4413_v58 = vld [vmem:[#allocation8 + $0xc] sm:$0xf0] }
  0x6d   : > { %v684_v11 = vmul.f32 %v5148_v8, %v683_v10  ;;  %v4461_v10 = vld [vmem:[#allocation8 + $0x6c] sm:$0xf0]  ;;  %v4412_v57 = vor.u32 %v4832_v54, %v4411_v53  ;;  %v4419_v59 = vld [vmem:[#allocation8 + $0x8] sm:$0xf]  ;;  %v4416_v60 = vor.u32 %v4831_v55, %v4413_v58  ;;  %v6151_v46 = vld [vmem:[#allocation5] ss:$0 sm:$0xff] }
  0x6e   : > { %v6155_v53 = vld [vmem:[#allocation7] ss:$0 sm:$0xff]  ;;  %s7746_s3 = sld [smem:[#allocation45_spill]] }
  0x6f   : > { %v685_v12 = vadd.f32 %v5148_v8, %v684_v11  ;;  %v4467_v11 = vld [vmem:[#allocation8 + $0x68] sm:$0xf] }
  0x71   : > { %v6080_v13 = vsel %vm686_vm0, %v5148_v8, %v685_v12  ;;  %v4843_v8 = vld [vmem:[#allocation8 + $0x64] sm:$0xf]  ;;  %v4845_v12 = vld [vmem:[#allocation8 + $0x70] sm:$0xf0] }
  0x72   : > { %677 = vadd.xlane.f32.xlu2 %v661_v6  ;;  %7688 = vst [vmem:[#allocation27_spill] sm:$0xff] %v6080_v13 }
  0x74   : > { %s5727_s2 = scalar_lea.hbm %s7746_s3, 128 }
  0xd5   : > { %v674_v14 = vpop.xlane.xlu2 %673  ;;  %v670_v15 = vpop.xlane.xlu1 %669 }
  0xd6   : > { %v666_v16 = vpop.xlane.xlu0 %665  ;;  %v692_v26 = vmul.f32 %v6080_v13, %v674_v14  ;;  %v690_v27 = vmul.f32 %v6080_v13, %v670_v15  ;;  %v4464_v14 = vor.u32 %v4843_v8, %v4461_v10  ;;  %v4468_v15 = vor.u32 %v4845_v12, %v4467_v11 }
  0xd7   : > { %v688_v17 = vmul.f32 %v6080_v13, %v666_v16  ;;  %v4447_v16 = vld [vmem:[#allocation8 + $0x48] sm:$0xf] }
  0xd8   : > { %v6103_v33 = vsub.f32 %v659_v0, %v692_v26  ;;  %v6105_v34 = vsub.f32 %v657_v1, %v690_v27  ;;  %v4472_v0 = vor.u32 %v4847_v62, %v4471_v61  ;;  %v4473_v1 = vld [vmem:[#allocation8 + $0x84] sm:$0xf0]  ;;  %v4435_v27 = vld [vmem:[#allocation8 + $0x30] sm:$0xf]  ;;  %v4833_v61 = vld [vmem:[#allocation8 + $0x10] sm:$0xf0] }
  0xd9   : > { %v6083_v18 = vsub.f32 %v655_v2, %v688_v17  ;;  %v4479_v2 = vld [vmem:[#allocation8 + $0x80] sm:$0xf]  ;;  %v4841_v17 = vld [vmem:[#allocation8 + $0x50] sm:$0xf0]  ;;  %v4420_v62 = vor.u32 %v4833_v61, %v4419_v59 }
  0xda   : > { %v708_v38 = vmul.f32 %v6103_v33, %v6103_v33  ;;  %v706_v39 = vmul.f32 %v6105_v34, %v6105_v34  ;;  %1028 = vmatpush.bf16.msra.mxu0 %v4472_v0 }
  0xdb   : > { %v704_v19 = vmul.f32 %v6083_v18, %v6083_v18 }
  0xdd   : > { %712 = vadd.xlane.f32.xlu0 %v704_v19  ;;  %v676_v20 = vpop.xlane.xlu2 %675  ;;  %v672_v21 = vpop.xlane.xlu1 %671  ;;  %v4840_v19 = vld [vmem:[#allocation8 + $0x4c] sm:$0xf] }
  0xde   : > { %v691_v22 = vmul.f32 %v6080_v13, %v672_v21  ;;  %v668_v23 = vpop.xlane.xlu0 %667  ;;  %v693_v37 = vmul.f32 %v6080_v13, %v676_v20  ;;  %v4448_v20 = vor.u32 %v4841_v17, %v4447_v16  ;;  %v4449_v21 = vld [vmem:[#allocation8 + $0x54] sm:$0xf0] }
  0xdf   : > { %v689_v24 = vmul.f32 %v6080_v13, %v668_v23  ;;  %v4842_v23 = vld [vmem:[#allocation8 + $0x58] sm:$0xf0] }
  0xe0   : > { %v6089_v25 = vsub.f32 %v658_v4, %v691_v22  ;;  %v6117_v41 = vsub.f32 %v660_v3, %v693_v37  ;;  %v4848_v3 = vld [vmem:[#allocation8 + $0x88] sm:$0xf0]  ;;  %v4476_v4 = vor.u32 %v4846_v63, %v4473_v1  ;;  %v4455_v22 = vld [vmem:[#allocation8 + $0x50] sm:$0xf]  ;;  %v4443_v37 = vld [vmem:[#allocation8 + $0x38] sm:$0xf] }
  0xe1   : > { %v6093_v28 = vsub.f32 %v656_v5, %v689_v24  ;;  %v4480_v5 = vor.u32 %v4848_v3, %v4479_v2  ;;  %v4452_v24 = vor.u32 %v4840_v19, %v4449_v21  ;;  %v4456_v26 = vor.u32 %v4842_v23, %v4455_v22 }
  0xe2   : > { %v707_v29 = vmul.f32 %v6089_v25, %v6089_v25  ;;  %v709_v42 = vmul.f32 %v6117_v41, %v6117_v41  ;;  %1057 = vmatpush.bf16.msra.mxu1 %v4476_v4 }
  0xe3   : > { %v705_v31 = vmul.f32 %v6093_v28, %v6093_v28  ;;  %1086 = vmatpush.bf16.msra.mxu2 %v4480_v5 }
  0xe4   : > { %718 = vadd.xlane.f32.xlu2 %v707_v29  ;;  %v4838_v29 = vld [vmem:[#allocation8 + $0x38] sm:$0xf0] }
  0xe5   : > { %679 = vadd.xlane.f32.xlu0 %v6098_v30  ;;  %714 = vadd.xlane.f32.xlu1 %v705_v31  ;;  %v678_v32 = vpop.xlane.xlu2 %677  ;;  %v4837_v31 = vld [vmem:[#allocation8 + $0x34] sm:$0xf] }
  0xe6   : > { %v694_v35 = vmul.f32 %v6080_v13, %v678_v32  ;;  %1058 = vmatpush.bf16.msra.mxu1 %v4464_v14  ;;  %v4436_v32 = vor.u32 %v4838_v29, %v4435_v27 }
  0xe7   : > { %1087 = vmatpush.bf16.msra.mxu2 %v4468_v15 }
  0xe8   : > { %v6108_v36 = vsub.f32 %v661_v6, %v694_v35  ;;  %v4459_v6 = vld [vmem:[#allocation8 + $0x60] sm:$0xf] }
  0xe9   : > { %v4460_v9 = vor.u32 %v4844_v7, %v4459_v6  ;;  %v4437_v35 = vld [vmem:[#allocation8 + $0x3c] sm:$0xf0] }
  0xea   : > { %v710_v40 = vmul.f32 %v6108_v36, %v6108_v36  ;;  %1059 = vmatpush.bf16.msra.mxu1 %v4452_v24 }
  0xeb   : > { %1029 = vmatpush.bf16.msra.mxu0 %v4460_v9  ;;  %1088 = vmatpush.bf16.msra.mxu2 %v4456_v26 }
  0xec   : > { %724 = vadd.xlane.f32.xlu2 %v710_v40 }
  0xed   : > { %720 = vadd.xlane.f32.xlu0 %v708_v38  ;;  %716 = vadd.xlane.f32.xlu1 %v706_v39  ;;  %v4839_v38 = vld [vmem:[#allocation8 + $0x40] sm:$0xf0]  ;;  %v4440_v39 = vor.u32 %v4837_v31, %v4437_v35 }
  0xee   : > { %v4444_v40 = vor.u32 %v4839_v38, %v4443_v37 }
  0xef   : > { %1030 = vmatpush.bf16.msra.mxu0 %v4448_v20  ;;  %1060 = vmatpush.bf16.msra.mxu1 %v4440_v39 }
  0xf0   : > { %1089 = vmatpush.bf16.msra.mxu2 %v4444_v40 }
  0xf3   : > { %1031 = vmatpush.bf16.msra.mxu0 %v4436_v32  ;;  %1061 = vmatpush.bf16.msra.mxu1 %v4428_v50 }
  0xf4   : > { %1090 = vmatpush.bf16.msra.mxu2 %v4432_v51 }
  0xf5   : > { %722 = vadd.xlane.f32.xlu1 %v709_v42  ;;  %v4423_v42 = vld [vmem:[#allocation8 + $0x18] sm:$0xf] }
  0xf6   : > { %v4424_v45 = vor.u32 %v4835_v43, %v4423_v42 }
  0xf7   : > { %1062 = vmatpush.bf16.msra.mxu1 %v4416_v60 }
  0xf8   : > { %1032 = vmatpush.bf16.msra.mxu0 %v4424_v45  ;;  %1091 = vmatpush.bf16.msra.mxu2 %v4420_v62 }
  0xfc   : > { %1033 = vmatpush.bf16.msra.mxu0 %v4412_v57 }
 0x150   : > { %v713_v49 = vpop.xlane.xlu0 %712 }
 0x151   : > { %v728_v52 = vmul.f32 %v713_v49, %v6080_v13 }
 0x153   : > { %v736_v56 = vadd.f32 1e-12, %v728_v52 }
 0x155   : > { %5149 = vrsqrt.f32 %v736_v56  ;;  %vm750_vm2 = vweird.f32 %v736_v56 }
 0x157   : > { %v719_v63 = vpop.xlane.xlu2 %718 }
 0x158   : > { %v731_v0 = vmul.f32 %v719_v63, %v6080_v13  ;;  %v715_v1 = vpop.xlane.xlu1 %714  ;;  %v680_v2 = vpop.xlane.xlu0 %679 }
 0x159   : > { %v729_v3 = vmul.f32 %v715_v1, %v6080_v13  ;;  %v695_v4 = vmul.f32 %v6080_v13, %v680_v2 }
 0x15a   : > { %v6125_v5 = vadd.f32 1e-12, %v731_v0 }
 0x15b   : > { %v5150_v6 = vpop.eup %5149  ;;  %v737_v7 = vadd.f32 1e-12, %v729_v3  ;;  %v6128_v8 = vsub.f32 %v6098_v30, %v695_v4 }
 0x15c   : > { %v745_v9 = vmul.f32 %v5150_v6, %v736_v56  ;;  %5151 = vrsqrt.f32 %v6125_v5  ;;  %vm751_vm1 = vweird.f32 %v5150_v6  ;;  %vm780_vm9 = vweird.f32 %v6125_v5 }
 0x15d   : > { %5153 = vrsqrt.f32 %v737_v7  ;;  %v711_v10 = vmul.f32 %v6128_v8, %v6128_v8  ;;  %vm6139_vm3 = vmor %vm750_vm2, %vm751_vm1  ;;  %vm760_vm4 = vweird.f32 %v737_v7 }
 0x15e   : > { %v746_v11 = vmul.f32 %v5150_v6, %v745_v9 }
 0x15f   : > { %726 = vadd.xlane.f32.xlu0 %v711_v10  ;;  %v725_v27 = vpop.xlane.xlu2 %724 }
 0x160   : > { %v747_v12 = vmul.f32 0.5, %v746_v11  ;;  %v717_v14 = vpop.xlane.xlu1 %716  ;;  %v721_v16 = vpop.xlane.xlu0 %720 }
 0x161   : > { %v730_v15 = vmul.f32 %v717_v14, %v6080_v13  ;;  %v732_v22 = vmul.f32 %v721_v16, %v6080_v13 }
 0x162   : > { %v6134_v17 = vpop.eup %5151  ;;  %v748_v19 = vsub.f32 1.5, %v747_v12 }
 0x163   : > { %v5154_v20 = vpop.eup %5153  ;;  %v738_v30 = vadd.f32 1e-12, %v730_v15  ;;  %v775_v24 = vmul.f32 %v6134_v17, %v6125_v5  ;;  %v6143_v31 = vadd.f32 1e-12, %v732_v22  ;;  %vm781_vm10 = vweird.f32 %v6134_v17 }
 0x164   : > { %v755_v21 = vmul.f32 %v5154_v20, %v737_v7  ;;  %v749_v23 = vmul.f32 %v5150_v6, %v748_v19  ;;  %vm761_vm5 = vweird.f32 %v5154_v20  ;;  %vm782_vm12 = vmor %vm780_vm9, %vm781_vm10  ;;  %vm1121_vm9 = vcmask 261120  }
 0x165   : > { %5155 = vrsqrt.f32 %v738_v30  ;;  %v776_v37 = vmul.f32 %v6134_v17, %v775_v24  ;;  %vm762_vm6 = vmor %vm760_vm4, %vm761_vm5  ;;  %vm770_vm7 = vweird.f32 %v738_v30  ;;  %vm790_vm15 = vweird.f32 %v6143_v31 }
 0x166   : > { %v756_v26 = vmul.f32 %v5154_v20, %v755_v21  ;;  %v753_v35 = vsel %vm6139_vm3, %v5150_v6, %v749_v23  ;;  %5157 = vrsqrt.f32 %v6143_v31  ;;  %vm1183_vm10 = vcmask 523264  }
 0x167   : > { %v824_v45 = vmul.f32 %v753_v35, %v6083_v18  ;;  %v777_v47 = vmul.f32 0.5, %v776_v37 }
 0x168   : > { %v757_v29 = vmul.f32 0.5, %v756_v26  ;;  %v723_v32 = vpop.xlane.xlu1 %722 }
 0x169   : > { %v733_v38 = vmul.f32 %v723_v32, %v6080_v13  ;;  %v835_v52 = vmul.f32 %v6151_v46, %v824_v45  ;;  %v778_v54 = vsub.f32 1.5, %v777_v47 }
 0x16a   : > { %v758_v39 = vsub.f32 1.5, %v757_v29 }
 0x16b   : > { %v5156_v40 = vpop.eup %5155  ;;  %v741_v42 = vadd.f32 1e-12, %v733_v38  ;;  %v6164_v59 = vadd.f32 %v6155_v53, %v835_v52  ;;  %v779_v60 = vmul.f32 %v6134_v17, %v778_v54 }
 0x16c   : > { %v759_v43 = vmul.f32 %v5154_v20, %v758_v39  ;;  %v765_v44 = vmul.f32 %v5156_v40, %v738_v30  ;;  %vm771_vm8 = vweird.f32 %v5156_v40  ;;  %v5158_v56 = vpop.eup %5157 }
 0x16d   : > { %5159 = vrsqrt.f32 %v741_v42  ;;  %vm772_vm11 = vmor %vm770_vm7, %vm771_vm8  ;;  %7692 = vst [vmem:[#allocation29_spill] sm:$0xff] %v6164_v59  ;;  %v785_v61 = vmul.f32 %v5158_v56, %v6143_v31  ;;  %v783_v2 = vsel %vm782_vm12, %v6134_v17, %v779_v60  ;;  %vm800_vm13 = vweird.f32 %v741_v42 }
 0x16e   : > { %v763_v48 = vsel %vm762_vm6, %v5154_v20, %v759_v43  ;;  %v766_v49 = vmul.f32 %v5156_v40, %v765_v44  ;;  %v827_v6 = vmul.f32 %v783_v2, %v6089_v25  ;;  %vm791_vm0 = vweird.f32 %v5158_v56 }
 0x16f   : > { %v825_v50 = vmul.f32 %v763_v48, %v6093_v28  ;;  %v786_v3 = vmul.f32 %v5158_v56, %v785_v61  ;;  %vm792_vm2 = vmor %vm790_vm15, %vm791_vm0 }
 0x170   : > { %v767_v51 = vmul.f32 0.5, %v766_v49  ;;  %v838_v11 = vmul.f32 %v6151_v46, %v827_v6 }
 0x171   : > { %v836_v55 = vmul.f32 %v6151_v46, %v825_v50  ;;  %v787_v7 = vmul.f32 0.5, %v786_v3 }
 0x172   : > { %v768_v18 = vsub.f32 1.5, %v767_v51 }
 0x173   : > { %v6161_v57 = vadd.f32 %v6155_v53, %v836_v55  ;;  %v5160_v28 = vpop.eup %5159  ;;  %v788_v12 = vsub.f32 1.5, %v787_v7 }
 0x174   : > { %v769_v58 = vmul.f32 %v5156_v40, %v768_v18  ;;  %v795_v62 = vmul.f32 %v5160_v28, %v741_v42  ;;  %vm801_vm14 = vweird.f32 %v5160_v28 }
 0x175   : > { %7691 = vst [vmem:[#allocation28_spill] sm:$0xff] %v6161_v57  ;;  %v854_v63 = vpack.c.bf16 %v6161_v57, %v6164_v59  ;;  %vm802_vm1 = vmor %vm800_vm13, %vm801_vm14  ;;  %v789_v25 = vmul.f32 %v5158_v56, %v788_v12 }
 0x176   : > { %v773_v0 = vsel %vm772_vm11, %v5156_v40, %v769_v58  ;;  %v796_v1 = vmul.f32 %v5160_v28, %v795_v62 }
 0x177   : > { %1034 = vmatmul.bf16.vlgmr.msra.gmra.mxu0 %v854_v63  ;;  %1063 = vmatmul.bf16.vlgmr.msra.gmra.mxu1 %v854_v63  ;;  %v826_v4 = vmul.f32 %v773_v0, %v6105_v34  ;;  %v6180_v34 = vadd.f32 %v6155_v53, %v838_v11  ;;  %v793_v19 = vsel %vm792_vm2, %v5158_v56, %v789_v25 }
 0x178   : > { %1092 = vmatmul.bf16.vlgmr.msra.gmra.mxu2 %v854_v63  ;;  %v797_v5 = vmul.f32 0.5, %v796_v1  ;;  %v828_v30 = vmul.f32 %v793_v19, %v6103_v33 }
 0x179   : > { %v837_v9 = vmul.f32 %v6151_v46, %v826_v4  ;;  %7694 = vst [vmem:[#allocation31_spill] sm:$0xff] %v6180_v34 }
 0x17a   : > { %v798_v10 = vsub.f32 1.5, %v797_v5  ;;  %v839_v22 = vmul.f32 %v6151_v46, %v828_v30 }
 0x17b   : > { %v6176_v14 = vadd.f32 %v6155_v53, %v837_v9 }
 0x17c   : > { %v799_v15 = vmul.f32 %v5160_v28, %v798_v10  ;;  %v6192_v24 = vadd.f32 %v6155_v53, %v839_v22 }
 0x17d   : > { %7693 = vst [vmem:[#allocation30_spill] sm:$0xff] %v6176_v14  ;;  %v855_v16 = vpack.c.bf16 %v6180_v34, %v6176_v14 }
 0x17e   : > { %v803_v17 = vsel %vm802_vm1, %v5160_v28, %v799_v15  ;;  %7696 = vst [vmem:[#allocation33_spill] sm:$0xff] %v6192_v24 }
 0x17f   : > { %v829_v20 = vmul.f32 %v803_v17, %v6117_v41  ;;  %v734_v41 = vmul.f32 %v725_v27, %v6080_v13 }
 0x181   : > { %v840_v21 = vmul.f32 %v6151_v46, %v829_v20  ;;  %v742_v33 = vadd.f32 1e-12, %v734_v41 }
 0x183   : > { %v6189_v23 = vadd.f32 %v6155_v53, %v840_v21  ;;  %5161 = vrsqrt.f32 %v742_v33  ;;  %vm810_vm3 = vweird.f32 %v742_v33 }
 0x185   : > { %7695 = vst [vmem:[#allocation32_spill] sm:$0xff] %v6189_v23  ;;  %v856_v26 = vpack.c.bf16 %v6189_v23, %v6192_v24 }
 0x187   : > { %1039 = vmatmul.bf16.gmra.mxu0 %v855_v16  ;;  %1068 = vmatmul.bf16.gmra.mxu1 %v855_v16 }
 0x188   : > { %1097 = vmatmul.bf16.gmra.mxu2 %v855_v16 }
 0x189   : > { %v5162_v29 = vpop.eup %5161 }
 0x18a   : > { %v805_v31 = vmul.f32 %v5162_v29, %v742_v33  ;;  %vm811_vm4 = vweird.f32 %v5162_v29 }
 0x18b   : > { %vm812_vm5 = vmor %vm810_vm3, %vm811_vm4 }
 0x18c   : > { %v806_v32 = vmul.f32 %v5162_v29, %v805_v31 }
 0x18e   : > { %v807_v39 = vmul.f32 0.5, %v806_v32 }
 0x190   : > { %v808_v40 = vsub.f32 1.5, %v807_v39 }
 0x192   : > { %v809_v43 = vmul.f32 %v5162_v29, %v808_v40 }
 0x194   : > { %v813_v47 = vsel %vm812_vm5, %v5162_v29, %v809_v43 }
 0x195   : > { %v830_v50 = vmul.f32 %v813_v47, %v6108_v36 }
 0x197   : > { %1044 = vmatmul.bf16.gmra.mxu0 %v856_v26  ;;  %1073 = vmatmul.bf16.gmra.mxu1 %v856_v26  ;;  %v841_v55 = vmul.f32 %v6151_v46, %v830_v50 }
 0x198   : > { %1102 = vmatmul.bf16.gmra.mxu2 %v856_v26 }
 0x199   : > { %v6203_v18 = vadd.f32 %v6155_v53, %v841_v55 }
 0x19b   : > { %7697 = vst [vmem:[#allocation34_spill] sm:$0xff] %v6203_v18 }
 0x1d2   : > { %v727_v35 = vpop.xlane.xlu0 %726 }
 0x1d3   : > { %v735_v37 = vmul.f32 %v727_v35, %v6080_v13 }
 0x1d5   : > { %v743_v38 = vadd.f32 1e-12, %v735_v37 }
 0x1d7   : > { %5163 = vrsqrt.f32 %v743_v38  ;;  %vm820_vm7 = vweird.f32 %v743_v38 }
 0x1dd   : > { %v5164_v42 = vpop.eup %5163 }
 0x1de   : > { %v815_v44 = vmul.f32 %v5164_v42, %v743_v38  ;;  %vm821_vm6 = vweird.f32 %v5164_v42 }
 0x1df   : > { %vm822_vm8 = vmor %vm820_vm7, %vm821_vm6 }
 0x1e0   : > { %v816_v45 = vmul.f32 %v5164_v42, %v815_v44 }
 0x1e2   : > { %v817_v48 = vmul.f32 0.5, %v816_v45 }
 0x1e4   : > { %v818_v49 = vsub.f32 1.5, %v817_v48 }
 0x1e6   : > { %v819_v51 = vmul.f32 %v5164_v42, %v818_v49 }
 0x1e8   : > { %v823_v52 = vsel %vm822_vm8, %v5164_v42, %v819_v51 }
 0x1e9   : > { %v831_v54 = vmul.f32 %v823_v52, %v6128_v8  ;;  %v890_v8 = vld [vmem:[%s7643_s4] sm:$0x7] }
 0x1ea   : > { %v6213_v61 = vperm.slane %v890_v8, 2  ;;  %v893_v5 = vperm.slane %v890_v8, 1  ;;  %v6221_v12 = vperm.slane %v890_v8, 0 }
 0x1eb   : > { %v842_v56 = vmul.f32 %v6151_v46, %v831_v54 }
 0x1ed   : > { %v6206_v28 = vadd.f32 %v6155_v53, %v842_v56 }
 0x1ef   : > { %7698 = vst [vmem:[#allocation35_spill] sm:$0xff] %v6206_v28  ;;  %v857_v58 = vpack.c.bf16 %v6206_v28, %v6203_v18 }
 0x1f1   : > { %1049 = vmatmul.bf16.gmra.mxu0 %v857_v58  ;;  %1078 = vmatmul.bf16.gmra.mxu1 %v857_v58 }
 0x1f2   : > { %1107 = vmatmul.bf16.gmra.mxu2 %v857_v58 }
 0x1f4   : > { %v1035_v36 = vpop.f32.mrf.mxu0  ;;  %v1064_v60 = vpop.f32.mrf.mxu1 }
 0x1f5   : > { %v1065_v26 = vadd.f32 %v1064_v60, %v893_v5  ;;  %v1036_v33 = vadd.f32 %v1035_v36, %v6221_v12 }
 0x1fb   : > { %v1093_v46 = vpop.f32.mrf.mxu2 }
 0x1fc   : > { %v1094_v62 = vadd.f32 %v1093_v46, %v6213_v61  ;;  %v1037_v63 = vpop.f32.mrf.mxu0  ;;  %v1066_v53 = vpop.f32.mrf.mxu1 }
 0x1fd   : > { %v1067_v22 = vadd.f32 %v1066_v53, %v893_v5  ;;  %v1038_v41 = vadd.f32 %v1037_v63, %v6221_v12 }
 0x1ff   : > { %v1117_v27 = vpack.c.bf16 %v1067_v22, %v1065_v26  ;;  %v1113_v29 = vpack.c.bf16 %v1038_v41, %v1036_v33 }
 0x203   : > { %v1095_v0 = vpop.f32.mrf.mxu2 }
 0x204   : > { %v1096_v1 = vadd.f32 %v1095_v0, %v6213_v61  ;;  %v1069_v2 = vpop.f32.mrf.mxu1  ;;  %v1040_v4 = vpop.f32.mrf.mxu0 }
 0x205   : > { %v1070_v7 = vadd.f32 %v1069_v2, %v893_v5  ;;  %v1041_v16 = vadd.f32 %v1040_v4, %v6221_v12 }
 0x206   : > { %v6217_v3 = vpack.c.bf16 %v1096_v1, %v1094_v62 }
 0x20b   : > { %v1098_v31 = vpop.f32.mrf.mxu2 }
 0x20c   : > { %v1071_v6 = vpop.f32.mrf.mxu1  ;;  %v1042_v11 = vpop.f32.mrf.mxu0  ;;  %v1099_v63 = vadd.f32 %v1098_v31, %v6213_v61 }
 0x20d   : > { %v1072_v9 = vadd.f32 %v1071_v6, %v893_v5  ;;  %v1043_v15 = vadd.f32 %v1042_v11, %v6221_v12 }
 0x20f   : > { %v6219_v10 = vpack.c.bf16 %v1072_v9, %v1070_v7  ;;  %v6227_v17 = vpack.c.bf16 %v1043_v15, %v1041_v16 }
 0x211   : > { %1443 = vrot.lane.b32.xlu0 %v6219_v10, %s5813_s17  ;;  %v1138_v1 = vsel %vm1121_vm9, %v6219_v10, 0 }
 0x213   : > { %v1100_v32 = vpop.f32.mrf.mxu2 }
 0x214   : > { %v1074_v25 = vpop.f32.mrf.mxu1  ;;  %v1045_v38 = vpop.f32.mrf.mxu0  ;;  %v1101_v46 = vadd.f32 %v1100_v32, %v6213_v61 }
 0x215   : > { %v1075_v20 = vadd.f32 %v1074_v25, %v893_v5  ;;  %v1046_v54 = vadd.f32 %v1045_v38, %v6221_v12 }
 0x216   : > { %v6266_v53 = vpack.c.bf16 %v1101_v46, %v1099_v63 }
 0x219   : > { %1431 = vrot.lane.b32.xlu0 %v6227_v17, %s5813_s17 }
 0x21b   : > { %v1103_v35 = vpop.f32.mrf.mxu2 }
 0x21c   : > { %v1076_v19 = vpop.f32.mrf.mxu1  ;;  %v1047_v45 = vpop.f32.mrf.mxu0  ;;  %v1104_v60 = vadd.f32 %v1103_v35, %v6213_v61 }
 0x21d   : > { %v1077_v30 = vadd.f32 %v1076_v19, %v893_v5  ;;  %v1048_v49 = vadd.f32 %v1047_v45, %v6221_v12 }
 0x21f   : > { %v6231_v21 = vpack.c.bf16 %v1077_v30, %v1075_v20  ;;  %v1115_v36 = vpack.c.bf16 %v1048_v49, %v1046_v54 }
 0x221   : > { %1773 = vrot.lane.b32.xlu0 %v6219_v10, %s5814_s28  ;;  %1445 = vrot.lane.b32.xlu2 %v6231_v21, %s5813_s17  ;;  %v1141_v8 = vsel %vm1121_vm9, %v6231_v21, 0 }
 0x223   : > { %v1105_v37 = vpop.f32.mrf.mxu2 }
 0x224   : > { %v1106_v55 = vadd.f32 %v1105_v37, %v6213_v61 }
 0x226   : > { %v6261_v62 = vpack.c.bf16 %v1106_v55, %v1104_v60 }
 0x229   : > { %1771 = vrot.lane.b32.xlu0 %v1117_v27, %s5814_s28  ;;  %1441 = vrot.lane.b32.xlu2 %v1117_v27, %s5813_s17 }
 0x231   : > { %2089 = vrot.lane.b32.xlu0 %v1113_v29, %s5815_s16 }
 0x26e   : > { %v1079_v39 = vpop.f32.mrf.mxu1  ;;  %v1050_v56 = vpop.f32.mrf.mxu0 }
 0x26f   : > { %v1080_v43 = vadd.f32 %v1079_v39, %v893_v5  ;;  %v1051_v2 = vadd.f32 %v1050_v56, %v6221_v12 }
 0x275   : > { %v1108_v40 = vpop.f32.mrf.mxu2 }
 0x276   : > { %v1081_v42 = vpop.f32.mrf.mxu1  ;;  %v1109_v51 = vadd.f32 %v1108_v40, %v6213_v61  ;;  %v1052_v0 = vpop.f32.mrf.mxu0 }
 0x277   : > { %v1082_v44 = vadd.f32 %v1081_v42, %v893_v5  ;;  %v1135_v5 = vsel %vm1121_vm9, %v1117_v27, 0 }
 0x279   : > { %v1120_v47 = vpack.c.bf16 %v1082_v44, %v1080_v43 }
 0x27b   : > { %2103 = vrot.lane.b32.xlu0 %v1120_v47, %s5815_s16  ;;  %1777 = vrot.lane.b32.xlu2 %v1120_v47, %s5814_s28  ;;  %v1144_v48 = vsel %vm1121_vm9, %v1120_v47, 0  ;;  %v1446_v7 = vpop.permute.xlu2 %1445 }
 0x27c   : > { %1447 = vrot.lane.b32.xlu1 %v1120_v47, %s5813_s17  ;;  %1150 = vmatpush.bf16.xpose.msra.mxu3 %v1144_v48  ;;  %v1468_v31 = vsel %vm1121_vm9, %v1446_v7, 0 }
 0x27d   : > { %v1110_v50 = vpop.f32.mrf.mxu2 }
 0x27e   : > { %v1111_v52 = vadd.f32 %v1110_v50, %v6213_v61  ;;  %v1053_v61 = vadd.f32 %v1052_v0, %v6221_v12 }
 0x280   : > { %v6251_v58 = vpack.c.bf16 %v1111_v52, %v1109_v51  ;;  %v1116_v4 = vpack.c.bf16 %v1053_v61, %v1051_v2 }
 0x282   : > { %1400 = vmatpush.bf16.msrb.mxu0 %v6251_v58 }
 0x283   : > { %1767 = vrot.lane.b32.xlu0 %v1115_v36, %s5814_s28  ;;  %1775 = vrot.lane.b32.xlu2 %v6231_v21, %s5814_s28  ;;  %v1444_v6 = vpop.permute.xlu0 %1443 }
 0x284   : > { %1429 = vrot.lane.b32.xlu1 %v1113_v29, %s5813_s17  ;;  %1151 = vmatpush.bf16.xpose.msra.mxu3 %v1141_v8  ;;  %v1465_v38 = vsel %vm1121_vm9, %v1444_v6, 0 }
 0x286   : > { %1401 = vmatpush.bf16.msrb.mxu0 %v6261_v62 }
 0x28a   : > { %1402 = vmatpush.bf16.msrb.mxu0 %v6266_v53 }
 0x28b   : > { %1712 = vrot.lane.b32.xlu0 %v6266_v53, %s5813_s17  ;;  %2097 = vrot.lane.b32.xlu2 %v1117_v27, %s5815_s16  ;;  %v1432_v9 = vpop.permute.xlu0 %1431 }
 0x28c   : > { %1433 = vrot.lane.b32.xlu1 %v1115_v36, %s5813_s17  ;;  %1152 = vmatpush.bf16.xpose.msra.mxu3 %v1138_v1 }
 0x28e   : > { %1403 = vmatpush.bf16.msrb.mxu0 %v6217_v3 }
 0x293   : > { %2095 = vrot.lane.b32.xlu0 %v1116_v4, %s5815_s16  ;;  %1435 = vrot.lane.b32.xlu2 %v1116_v4, %s5813_s17  ;;  %v1774_v11 = vpop.permute.xlu0 %1773 }
 0x294   : > { %2101 = vrot.lane.b32.xlu1 %v6231_v21, %s5815_s16  ;;  %1153 = vmatpush.bf16.xpose.msra.mxu3 %v1135_v5  ;;  %v1795_v20 = vsel %vm1121_vm9, %v1774_v11, 0 }
 0x29b   : > { %4505 = vmatmul.msk.bf16.vlgmr.msra.gmra.mxu3 %vm1121_vm9, %v1113_v29  ;;  %1716 = vrot.lane.b32.xlu0 %v6251_v58, %s5813_s17  ;;  %v1772_v25 = vpop.permute.xlu0 %1771 }
 0x29c   : > { %2099 = vrot.lane.b32.xlu1 %v6219_v10, %s5815_s16  ;;  %1765 = vrot.lane.b32.xlu2 %v6227_v17, %s5814_s28  ;;  %v1442_v10 = vpop.permute.xlu2 %1441  ;;  %v1792_v26 = vsel %vm1121_vm9, %v1772_v25, 0 }
 0x29d   : > { %v1462_v43 = vsel %vm1121_vm9, %v1442_v10, 0 }
 0x2a3   : > { %v6307_v19 = vpop.permute.xlu0 %2089 }
 0x2a4   : > { %1763 = vrot.lane.b32.xlu1 %v1113_v29, %s5814_s28  ;;  %2093 = vrot.lane.b32.xlu2 %v1115_v36, %s5815_s16 }
 0x2ab   : > { %4506 = vmatmul.msk.bf16.gmra.mxu3 %vm1121_vm9, %v6227_v17 }
 0x2ac   : > { %2091 = vrot.lane.b32.xlu1 %v6227_v17, %s5815_s16  ;;  %1714 = vrot.lane.b32.xlu2 %v6261_v62, %s5813_s17 }
 0x2b4   : > { %1710 = vrot.lane.b32.xlu1 %v6217_v3, %s5813_s17 }
 0x2bb   : > { %4507 = vmatmul.msk.bf16.gmra.mxu3 %vm1121_vm9, %v1115_v36 }
 0x2bc   : > { %1769 = vrot.lane.b32.xlu1 %v1116_v4, %s5814_s28 }
 0x2c4   : > { %2368 = vrot.lane.b32.xlu1 %v6251_v58, %s5815_s16 }
 0x2cb   : > { %4508 = vmatmul.msk.bf16.gmra.mxu3 %vm1121_vm9, %v1116_v4 }
 0x2d5   : > { %v1778_v12 = vpop.permute.xlu2 %1777 }
 0x2d6   : > { %v1801_v15 = vsel %vm1121_vm9, %v1778_v12, 0 }
 0x2d7   : > { %1807 = vmatpush.bf16.xpose.msrb.mxu3 %v1801_v15 }
 0x2dd   : > { %v1776_v16 = vpop.permute.xlu2 %1775 }
 0x2de   : > { %v1798_v17 = vsel %vm1121_vm9, %v1776_v16, 0 }
 0x2df   : > { %1808 = vmatpush.bf16.xpose.msrb.mxu3 %v1798_v17 }
 0x2e5   : > { %v2098_v30 = vpop.permute.xlu2 %2097 }
 0x2e6   : > { %v2118_v56 = vsel %vm1121_vm9, %v2098_v30, 0 }
 0x2e7   : > { %1809 = vmatpush.bf16.xpose.msrb.mxu3 %v1795_v20 }
 0x2ed   : > { %v2104_v21 = vpop.permute.xlu0 %2103  ;;  %v1436_v41 = vpop.permute.xlu2 %1435 }
 0x2ee   : > { %v1448_v22 = vpop.permute.xlu1 %1447  ;;  %v2127_v44 = vsel %vm1121_vm9, %v2104_v21, 0 }
 0x2ef   : > { %v1471_v27 = vsel %vm1121_vm9, %v1448_v22, 0  ;;  %1810 = vmatpush.bf16.xpose.msrb.mxu3 %v1792_v26 }
 0x2f0   : > { %1477 = vmatpush.bf16.xpose.msrb.mxu1 %v1471_v27 }
 0x2f5   : > { %v1768_v33 = vpop.permute.xlu0 %1767 }
 0x2f6   : > { %v1430_v29 = vpop.permute.xlu1 %1429  ;;  %v1766_v32 = vpop.permute.xlu2 %1765 }
 0x2f8   : > { %1478 = vmatpush.bf16.xpose.msrb.mxu1 %v1468_v31 }
 0x2fd   : > { %v1713_v35 = vpop.permute.xlu0 %1712 }
 0x2fe   : > { %v1434_v37 = vpop.permute.xlu1 %1433  ;;  %v6316_v42 = vpop.permute.xlu2 %2093 }
 0x300   : > { %1479 = vmatpush.bf16.xpose.msrb.mxu1 %v1465_v38 }
 0x305   : > { %v6314_v39 = vpop.permute.xlu0 %2095 }
 0x306   : > { %v2102_v40 = vpop.permute.xlu1 %2101  ;;  %v1715_v49 = vpop.permute.xlu2 %1714 }
 0x307   : > { %v2124_v48 = vsel %vm1121_vm9, %v2102_v40, 0 }
 0x308   : > { %1480 = vmatpush.bf16.xpose.msrb.mxu1 %v1462_v43 }
 0x30d   : > { %v1717_v45 = vpop.permute.xlu0 %1716 }
 0x30e   : > { %v2100_v47 = vpop.permute.xlu1 %2099  ;;  %1738 = vmatpush.bf16.msrb.mxu2 %v1717_v45 }
 0x30f   : > { %4513 = vmatmul.msk.bf16.vlgmr.msrb.gmra.mxu1 %vm1121_vm9, %v1430_v29  ;;  %v2121_v51 = vsel %vm1121_vm9, %v2100_v47, 0 }
 0x310   : > { %2133 = vmatpush.bf16.xpose.msra.mxu1 %v2127_v44 }
 0x312   : > { %1739 = vmatpush.bf16.msrb.mxu2 %v1715_v49 }
 0x316   : > { %v1764_v50 = vpop.permute.xlu1 %1763  ;;  %1740 = vmatpush.bf16.msrb.mxu2 %v1713_v35 }
 0x317   : > { %4521 = vmatmul.msk.bf16.vlgmr.msrb.gmra.mxu3 %vm1121_vm9, %v1764_v50 }
 0x318   : > { %2134 = vmatpush.bf16.xpose.msra.mxu1 %v2124_v48 }
 0x31e   : > { %v2092_v52 = vpop.permute.xlu1 %2091  ;;  %v1155_v54 = vpop.f32.mrf.mxu3 }
 0x31f   : > { %v1175_v55 = vmul.f32 0.17677669, %v1155_v54  ;;  %4514 = vmatmul.msk.bf16.gmra.mxu1 %vm1121_vm9, %v1432_v9 }
 0x320   : > { %2135 = vmatpush.bf16.xpose.msra.mxu1 %v2121_v51 }
 0x321   : > { %v1184_v36 = vsel %vm1183_vm10, %v1175_v55, -inf }
 0x322   : > { %1185 = vmax.xlane.f32.xlu0 %v1184_v36 }
 0x326   : > { %v1711_v60 = vpop.permute.xlu1 %1710  ;;  %v1157_v8 = vpop.f32.mrf.mxu3 }
 0x327   : > { %v6327_v46 = vmul.f32 0.17677669, %v1157_v8  ;;  %1741 = vmatpush.bf16.msrb.mxu2 %v1711_v60  ;;  %4522 = vmatmul.msk.bf16.gmra.mxu3 %vm1121_vm9, %v1766_v32 }
 0x328   : > { %2136 = vmatpush.bf16.xpose.msra.mxu1 %v2118_v56 }
 0x329   : > { %v1187_v63 = vsel %vm1183_vm10, %v6327_v46, -inf }
 0x32a   : > { %1188 = vmax.xlane.f32.xlu2 %v1187_v63 }
 0x32e   : > { %v1770_v0 = vpop.permute.xlu1 %1769  ;;  %v1160_v1 = vpop.f32.mrf.mxu3 }
 0x32f   : > { %v6332_v61 = vmul.f32 0.17677669, %v1160_v1  ;;  %4515 = vmatmul.msk.bf16.gmra.mxu1 %vm1121_vm9, %v1434_v37 }
 0x331   : > { %v1190_v2 = vsel %vm1183_vm10, %v6332_v61, -inf }
 0x332   : > { %1191 = vmax.xlane.f32.xlu2 %v1190_v2 }
 0x336   : > { %v2369_v4 = vpop.permute.xlu1 %2368  ;;  %v1162_v5 = vpop.f32.mrf.mxu3 }
 0x337   : > { %v6337_v6 = vmul.f32 0.17677669, %v1162_v5  ;;  %4523 = vmatmul.msk.bf16.gmra.mxu3 %vm1121_vm9, %v1768_v33  ;;  %2390 = vmatpush.bf16.msra.mxu2 %v2369_v4 }
 0x339   : > { %v1193_v7 = vsel %vm1183_vm10, %v6337_v6, -inf }
 0x33a   : > { %1194 = vmax.xlane.f32.xlu1 %v1193_v7 }
 0x33e   : > { %v1165_v9 = vpop.f32.mrf.mxu3 }
 0x33f   : > { %v6342_v10 = vmul.f32 0.17677669, %v1165_v9  ;;  %4516 = vmatmul.msk.bf16.gmra.mxu1 %vm1121_vm9, %v1436_v41 }
 0x341   : > { %v1196_v11 = vsel %vm1183_vm10, %v6342_v10, -inf }
 0x342   : > { %1197 = vmax.xlane.f32.xlu1 %v1196_v11 }
 0x346   : > { %v1167_v12 = vpop.f32.mrf.mxu3 }
 0x347   : > { %v6347_v15 = vmul.f32 0.17677669, %v1167_v12  ;;  %4524 = vmatmul.msk.bf16.gmra.mxu3 %vm1121_vm9, %v1770_v0 }
 0x349   : > { %v1199_v25 = vsel %vm1183_vm10, %v6347_v15, -inf }
 0x34a   : > { %1200 = vmax.xlane.f32.xlu0 %v1199_v25 }
 0x34e   : > { %v1170_v16 = vpop.f32.mrf.mxu3 }
 0x34f   : > { %v6352_v17 = vmul.f32 0.17677669, %v1170_v16  ;;  %4529 = vmatmul.msk.bf16.vlgmr.msra.gmra.mxu1 %vm1121_vm9, %v6307_v19 }
 0x351   : > { %v1202_v20 = vsel %vm1183_vm10, %v6352_v17, -inf }
 0x352   : > { %1203 = vmax.xlane.f32.xlu1 %v1202_v20 }
 0x356   : > { %v1172_v30 = vpop.f32.mrf.mxu3 }
 0x357   : > { %v6358_v21 = vmul.f32 0.17677669, %v1172_v30 }
 0x359   : > { %v1205_v22 = vsel %vm1183_vm10, %v6358_v21, -inf }
 0x35a   : > { %1206 = vmax.xlane.f32.xlu0 %v1205_v22 }
 0x35f   : > { %4530 = vmatmul.msk.bf16.gmra.mxu1 %vm1121_vm9, %v2092_v52 }
 0x36f   : > { %4531 = vmatmul.msk.bf16.gmra.mxu1 %vm1121_vm9, %v6316_v42 }
 0x37f   : > { %4532 = vmatmul.msk.bf16.gmra.mxu1 %vm1121_vm9, %v6314_v39 }
 0x38c   : > { %v1482_v19 = vpop.f32.mrf.mxu1 }
 0x38d   : > { %v6367_v26 = vmul.f32 0.17677669, %v1482_v19 }
 0x38f   : > { %v1510_v27 = vsel %vm1183_vm10, %v6367_v26, -inf }
 0x390   : > { %1511 = vmax.xlane.f32.xlu2 %v1510_v27 }
 0x394   : > { %v1484_v41 = vpop.f32.mrf.mxu1 }
 0x395   : > { %v6371_v33 = vmul.f32 0.17677669, %v1484_v41  ;;  %v1186_v29 = vpop.xlane.xlu0 %1185 }
 0x396   : > { %v1208_v31 = vsub.f32 %v1175_v55, %v1186_v29 }
 0x397   : > { %v1513_v32 = vsel %vm1183_vm10, %v6371_v33, -inf }
 0x398   : > { %v1216_v35 = vmul.f32 1.442695, %v1208_v31  ;;  %1514 = vmax.xlane.f32.xlu1 %v1513_v32 }
 0x39a   : > { %5165 = vpow2.f32 %v1216_v35  ;;  %v1812_v37 = vpop.f32.mrf.mxu3 }
 0x39b   : > { %v6375_v38 = vmul.f32 0.17677669, %v1812_v37 }
 0x39c   : > { %v1487_v39 = vpop.f32.mrf.mxu1 }
 0x39d   : > { %v1840_v40 = vsel %vm1183_vm10, %v6375_v38, -inf  ;;  %v1189_v42 = vpop.xlane.xlu2 %1188  ;;  %v6388_v52 = vmul.f32 0.17677669, %v1487_v39 }
 0x39e   : > { %1841 = vmax.xlane.f32.xlu0 %v1840_v40  ;;  %v1209_v48 = vsub.f32 %v6327_v46, %v1189_v42 }
 0x39f   : > { %v1516_v46 = vsel %vm1183_vm10, %v6388_v52, -inf }
 0x3a0   : > { %v6379_v43 = vpop.eup %5165  ;;  %v1218_v51 = vmul.f32 1.442695, %v1209_v48 }
 0x3a1   : > { %v1232_v44 = vsel %vm1183_vm10, %v6379_v43, 0.0 }
 0x3a2   : > { %v1814_v45 = vpop.f32.mrf.mxu3  ;;  %1233 = vadd.xlane.f32.xlu2 %v1232_v44  ;;  %5167 = vpow2.f32 %v1218_v51 }
 0x3a3   : > { %v6383_v47 = vmul.f32 0.17677669, %v1814_v45 }
 0x3a4   : > { %v1489_v49 = vpop.f32.mrf.mxu1 }
 0x3a5   : > { %v1843_v50 = vsel %vm1183_vm10, %v6383_v47, -inf  ;;  %v1192_v54 = vpop.xlane.xlu2 %1191  ;;  %v6397_v1 = vmul.f32 0.17677669, %v1489_v49 }
 0x3a6   : > { %1844 = vmax.xlane.f32.xlu1 %v1843_v50  ;;  %v1210_v36 = vsub.f32 %v6332_v61, %v1192_v54 }
 0x3a7   : > { %v1519_v12 = vsel %vm1183_vm10, %v6397_v1, -inf }
 0x3a8   : > { %v1220_v0 = vmul.f32 1.442695, %v1210_v36  ;;  %v6399_v2 = vpop.eup %5167 }
 0x3a9   : > { %v1235_v11 = vsel %vm1183_vm10, %v6399_v2, 0.0 }
 0x3aa   : > { %v1817_v55 = vpop.f32.mrf.mxu3  ;;  %5169 = vpow2.f32 %v1220_v0 }
 0x3ab   : > { %v6390_v56 = vmul.f32 0.17677669, %v1817_v55 }
 0x3ac   : > { %v1492_v60 = vpop.f32.mrf.mxu1 }
 0x3ad   : > { %v1195_v8 = vpop.xlane.xlu1 %1194  ;;  %v1846_v63 = vsel %vm1183_vm10, %v6390_v56, -inf  ;;  %v6411_v30 = vmul.f32 0.17677669, %v1492_v60 }
 0x3ae   : > { %1517 = vmax.xlane.f32.xlu1 %v1516_v46  ;;  %1847 = vmax.xlane.f32.xlu0 %v1846_v63  ;;  %v1211_v7 = vsub.f32 %v6337_v6, %v1195_v8 }
 0x3b0   : > { %v1222_v22 = vmul.f32 1.442695, %v1211_v7  ;;  %v6413_v6 = vpop.eup %5169 }
 0x3b1   : > { %v1238_v29 = vsel %vm1183_vm10, %v6413_v6, 0.0 }
 0x3b2   : > { %v1819_v4 = vpop.f32.mrf.mxu3 }
 0x3b3   : > { %v6401_v5 = vmul.f32 0.17677669, %v1819_v4 }
 0x3b4   : > { %v1494_v61 = vpop.f32.mrf.mxu1 }
 0x3b5   : > { %v1198_v9 = vpop.xlane.xlu1 %1197  ;;  %v1849_v25 = vsel %vm1183_vm10, %v6401_v5, -inf  ;;  %v6415_v19 = vmul.f32 0.17677669, %v1494_v61 }
 0x3b6   : > { %v1212_v16 = vsub.f32 %v6342_v10, %v1198_v9  ;;  %1236 = vadd.xlane.f32.xlu1 %v1235_v11  ;;  %1520 = vmax.xlane.f32.xlu0 %v1519_v12  ;;  %v1522_v10 = vsel %vm1183_vm10, %v6411_v30, -inf }
 0x3b7   : > { %1850 = vmax.xlane.f32.xlu2 %v1849_v25  ;;  %v1525_v31 = vsel %vm1183_vm10, %v6415_v19, -inf }
 0x3b8   : > { %v1224_v20 = vmul.f32 1.442695, %v1212_v16 }
 0x3ba   : > { %v1822_v27 = vpop.f32.mrf.mxu3  ;;  %5171 = vpow2.f32 %v1224_v20 }
 0x3bb   : > { %5173 = vpow2.f32 %v1222_v22  ;;  %v6423_v32 = vmul.f32 0.17677669, %v1822_v27 }
 0x3bc   : > { %v1497_v41 = vpop.f32.mrf.mxu1 }
 0x3bd   : > { %v1852_v45 = vsel %vm1183_vm10, %v6423_v32, -inf  ;;  %v1201_v54 = vpop.xlane.xlu0 %1200  ;;  %v6451_v7 = vmul.f32 0.17677669, %v1497_v41 }
 0x3be   : > { %1239 = vadd.xlane.f32.xlu1 %v1238_v29  ;;  %1523 = vmax.xlane.f32.xlu0 %v1522_v10  ;;  %v1213_v46 = vsub.f32 %v6347_v15, %v1201_v54 }
 0x3bf   : > { %1526 = vmax.xlane.f32.xlu2 %v1525_v31  ;;  %v1528_v16 = vsel %vm1183_vm10, %v6451_v7, -inf }
 0x3c0   : > { %v6425_v35 = vpop.eup %5171  ;;  %v1226_v4 = vmul.f32 1.442695, %v1213_v46 }
 0x3c1   : > { %v6427_v39 = vpop.eup %5173  ;;  %v1244_v44 = vsel %vm1183_vm10, %v6425_v35, 0.0 }
 0x3c2   : > { %v1824_v37 = vpop.f32.mrf.mxu3  ;;  %v1241_v49 = vsel %vm1183_vm10, %v6427_v39, 0.0 }
 0x3c3   : > { %v6438_v55 = vmul.f32 0.17677669, %v1824_v37 }
 0x3c4   : > { %v1499_v40 = vpop.f32.mrf.mxu1 }
 0x3c5   : > { %v1204_v42 = vpop.xlane.xlu1 %1203  ;;  %v6436_v51 = vmul.f32 0.17677669, %v1499_v40  ;;  %v1855_v0 = vsel %vm1183_vm10, %v6438_v55, -inf }
 0x3c6   : > { %v1214_v48 = vsub.f32 %v6352_v17, %v1204_v42  ;;  %1245 = vadd.xlane.f32.xlu0 %v1244_v44  ;;  %1853 = vmax.xlane.f32.xlu1 %v1852_v45 }
 0x3c7   : > { %1242 = vadd.xlane.f32.xlu2 %v1241_v49  ;;  %v1531_v17 = vsel %vm1183_vm10, %v6436_v51, -inf }
 0x3c8   : > { %v1228_v50 = vmul.f32 1.442695, %v1214_v48 }
 0x3ca   : > { %v1827_v36 = vpop.f32.mrf.mxu3  ;;  %5175 = vpow2.f32 %v1228_v50 }
 0x3cb   : > { %v6440_v60 = vmul.f32 0.17677669, %v1827_v36  ;;  %5177 = vpow2.f32 %v1226_v4 }
 0x3cc   : > { %v2138_v8 = vpop.f32.mrf.mxu1 }
 0x3cd   : > { %v1858_v63 = vsel %vm1183_vm10, %v6440_v60, -inf  ;;  %v6461_v20 = vmul.f32 0.17677669, %v2138_v8  ;;  %v1207_v22 = vpop.xlane.xlu0 %1206 }
 0x3ce   : > { %1532 = vmax.xlane.f32.xlu1 %v1531_v17  ;;  %1859 = vmax.xlane.f32.xlu0 %v1858_v63  ;;  %v1215_v41 = vsub.f32 %v6358_v21, %v1207_v22 }
 0x3cf   : > { %1856 = vmax.xlane.f32.xlu2 %v1855_v0  ;;  %v2166_v31 = vsel %vm1183_vm10, %v6461_v20, -inf }
 0x3d0   : > { %v6449_v61 = vpop.eup %5175  ;;  %v1230_v42 = vmul.f32 1.442695, %v1215_v41 }
 0x3d1   : > { %v1250_v12 = vsel %vm1183_vm10, %v6449_v61, 0.0  ;;  %v6463_v27 = vpop.eup %5177 }
 0x3d2   : > { %v1829_v9 = vpop.f32.mrf.mxu3  ;;  %v1247_v37 = vsel %vm1183_vm10, %v6463_v27, 0.0  ;;  %5179 = vpow2.f32 %v1230_v42 }
 0x3d3   : > { %v6453_v11 = vmul.f32 0.17677669, %v1829_v9 }
 0x3d4   : > { %v2140_v15 = vpop.f32.mrf.mxu1 }
 0x3d5   : > { %v1861_v25 = vsel %vm1183_vm10, %v6453_v11, -inf  ;;  %v6474_v44 = vmul.f32 0.17677669, %v2140_v15 }
 0x3d6   : > { %1251 = vadd.xlane.f32.xlu0 %v1250_v12  ;;  %1862 = vmax.xlane.f32.xlu1 %v1861_v25 }
 0x3d7   : > { %1529 = vmax.xlane.f32.xlu2 %v1528_v16  ;;  %v2169_v48 = vsel %vm1183_vm10, %v6474_v44, -inf }
 0x3d8   : > { %v6482_v50 = vpop.eup %5179 }
 0x3d9   : > { %v1253_v8 = vsel %vm1183_vm10, %v6482_v50, 0.0 }
 0x3dc   : > { %v2143_v29 = vpop.f32.mrf.mxu1 }
 0x3dd   : > { %v6466_v10 = vmul.f32 0.17677669, %v2143_v29 }
 0x3de   : > { %2167 = vmax.xlane.f32.xlu1 %v2166_v31 }
 0x3df   : > { %1248 = vadd.xlane.f32.xlu2 %v1247_v37  ;;  %v2172_v40 = vsel %vm1183_vm10, %v6466_v10, -inf }
 0x3e0   : > { %2173 = vmax.xlane.f32.xlu0 %v2172_v40 }
 0x3e4   : > { %v2145_v21 = vpop.f32.mrf.mxu1 }
 0x3e5   : > { %v6476_v45 = vmul.f32 0.17677669, %v2145_v21 }
 0x3e6   : > { %2170 = vmax.xlane.f32.xlu1 %v2169_v48 }
 0x3e7   : > { %v2175_v49 = vsel %vm1183_vm10, %v6476_v45, -inf }
 0x3e8   : > { %2176 = vmax.xlane.f32.xlu2 %v2175_v49 }
 0x3ec   : > { %v2148_v54 = vpop.f32.mrf.mxu1 }
 0x3ed   : > { %v6484_v36 = vmul.f32 0.17677669, %v2148_v54 }
 0x3ee   : > { %1254 = vadd.xlane.f32.xlu1 %v1253_v8 }
 0x3ef   : > { %v2178_v46 = vsel %vm1183_vm10, %v6484_v36, -inf }
 0x3f0   : > { %2179 = vmax.xlane.f32.xlu0 %v2178_v46 }
 0x3f4   : > { %v2150_v17 = vpop.f32.mrf.mxu1 }
 0x3f5   : > { %v6490_v63 = vmul.f32 0.17677669, %v2150_v17 }
 0x3f7   : > { %v2181_v0 = vsel %vm1183_vm10, %v6490_v63, -inf }
 0x3f8   : > { %2182 = vmax.xlane.f32.xlu1 %v2181_v0 }
 0x3fc   : > { %v2153_v4 = vpop.f32.mrf.mxu1 }
 0x3fd   : > { %v6494_v9 = vmul.f32 0.17677669, %v2153_v4 }
 0x3ff   : > { %v2184_v15 = vsel %vm1183_vm10, %v6494_v9, -inf }
 0x400   : > { %2185 = vmax.xlane.f32.xlu2 %v2184_v15 }
 0x403   : > { %v1512_v12 = vpop.xlane.xlu2 %1511 }
 0x404   : > { %v1534_v25 = vsub.f32 %v6367_v26, %v1512_v12  ;;  %v2155_v16 = vpop.f32.mrf.mxu1 }
 0x405   : > { %v6499_v22 = vmul.f32 0.17677669, %v2155_v16 }
 0x406   : > { %v1542_v41 = vmul.f32 1.442695, %v1534_v25 }
 0x407   : > { %v2187_v29 = vsel %vm1183_vm10, %v6499_v22, -inf }
 0x408   : > { %5181 = vpow2.f32 %v1542_v41  ;;  %2188 = vmax.xlane.f32.xlu0 %v2187_v29 }
 0x40b   : > { %v1515_v40 = vpop.xlane.xlu1 %1514 }
 0x40c   : > { %v1535_v26 = vsub.f32 %v6371_v33, %v1515_v40 }
 0x40e   : > { %v6503_v31 = vpop.eup %5181  ;;  %v1544_v49 = vmul.f32 1.442695, %v1535_v26 }
 0x40f   : > { %v1558_v37 = vsel %vm1183_vm10, %v6503_v31, 0.0 }
 0x410   : > { %1559 = vadd.xlane.f32.xlu0 %v1558_v37 }
 0x411   : > { %v1842_v42 = vpop.xlane.xlu0 %1841 }
 0x412   : > { %v1864_v21 = vsub.f32 %v6375_v38, %v1842_v42 }
 0x414   : > { %v1872_v48 = vmul.f32 1.442695, %v1864_v21 }
 0x415   : > { %v6512_v0 = vpop.xlane.xlu2 %1233 }
 0x416   : > { %5183 = vpow2.f32 %v1872_v48  ;;  %vm1261_vm12 = vweird.f32 %v6512_v0 }
 0x417   : > { %5185 = vpow2.f32 %v1544_v49 }
 0x419   : > { %v1845_v54 = vpop.xlane.xlu1 %1844 }
 0x41a   : > { %v1865_v8 = vsub.f32 %v6383_v47, %v1845_v54 }
 0x41c   : > { %v6510_v46 = vpop.eup %5183  ;;  %v1874_v17 = vmul.f32 1.442695, %v1865_v8 }
 0x41d   : > { %v1888_v4 = vsel %vm1183_vm10, %v6510_v46, 0.0  ;;  %v6519_v15 = vpop.eup %5185 }
 0x41e   : > { %5187 = vpow2.f32 %v1874_v17  ;;  %1889 = vadd.xlane.f32.xlu2 %v1888_v4  ;;  %v1561_v41 = vsel %vm1183_vm10, %v6519_v15, 0.0 }
 0x41f   : > { %5189 = vrcp.f32 %v6512_v0 }
 0x421   : > { %v1518_v33 = vpop.xlane.xlu1 %1517  ;;  %v6517_v38 = vpop.xlane.xlu0 %1847 }
 0x422   : > { %v1536_v47 = vsub.f32 %v6388_v52, %v1518_v33 }
 0x424   : > { %v6522_v12 = vpop.eup %5187  ;;  %v1546_v25 = vmul.f32 1.442695, %v1536_v47 }
 0x425   : > { %v1891_v16 = vsel %vm1183_vm10, %v6522_v12, 0.0  ;;  %v5190_v29 = vpop.eup %5189 }
 0x426   : > { %5191 = vpow2.f32 %v1546_v25  ;;  %1892 = vadd.xlane.f32.xlu0 %v1891_v16  ;;  %1562 = vadd.xlane.f32.xlu2 %v1561_v41  ;;  %v1257_v37 = vmul.f32 %v5190_v29, %v6512_v0  ;;  %vm1262_vm11 = vweird.f32 %v5190_v29 }
 0x427   : > { %vm6549_vm14 = vmor %vm1261_vm12, %vm1262_vm11 }
 0x428   : > { %v1258_v48 = vsub.f32 1.0, %v1257_v37 }
 0x429   : > { %v1237_v40 = vpop.xlane.xlu1 %1236  ;;  %v1521_v42 = vpop.xlane.xlu0 %1520 }
 0x42a   : > { %5193 = vrcp.f32 %v1237_v40  ;;  %v6529_v21 = vpop.xlane.xlu2 %1850  ;;  %v1537_v52 = vsub.f32 %v6397_v1, %v1521_v42  ;;  %v1259_v17 = vmul.f32 %v5190_v29, %v1258_v48  ;;  %v1265_v48 = vand.u32 2147483647, %v6512_v0 }
 0x42b   : > { %vm1275_vm15 = vweird.f32 %v1237_v40 }
 0x42c   : > { %v6532_v26 = vpop.eup %5191  ;;  %v1548_v49 = vmul.f32 1.442695, %v1537_v52  ;;  %v1260_v37 = vadd.f32 %v5190_v29, %v1259_v17  ;;  %vm1266_vm1 = vcmp.eq.f32.partialorder %v1265_v48, 8.507059e+37 }
 0x42d   : > { %v1564_v54 = vsel %vm1183_vm10, %v6532_v26, 0.0 }
 0x42e   : > { %1565 = vadd.xlane.f32.xlu1 %v1564_v54  ;;  %5195 = vpow2.f32 %v1548_v49  ;;  %v1267_v49 = vand.u32 2147483648, %v6512_v0  ;;  %v1264_v0 = vsel %vm6549_vm14, %v5190_v29, %v1260_v37 }
 0x430   : > { %v5194_v8 = vpop.eup %5193 }
 0x431   : > { %v1271_v4 = vmul.f32 %v5194_v8, %v1237_v40  ;;  %v6536_v33 = vpop.xlane.xlu1 %1239  ;;  %v1524_v47 = vpop.xlane.xlu0 %1523  ;;  %vm1276_vm13 = vweird.f32 %v5194_v8 }
 0x432   : > { %5197 = vrcp.f32 %v6536_v33  ;;  %v1527_v25 = vpop.xlane.xlu2 %1526  ;;  %v1538_v41 = vsub.f32 %v6411_v30, %v1524_v47  ;;  %v1279_v47 = vand.u32 2147483647, %v1237_v40  ;;  %vm1277_vm0 = vmor %vm1275_vm15, %vm1276_vm13  ;;  %vm1289_vm4 = vweird.f32 %v6536_v33 }
 0x433   : > { %v1272_v16 = vsub.f32 1.0, %v1271_v4  ;;  %v1539_v1 = vsub.f32 %v6415_v19, %v1527_v25  ;;  %v1281_v4 = vand.u32 2147483648, %v1237_v40 }
 0x434   : > { %v1550_v54 = vmul.f32 1.442695, %v1538_v41  ;;  %v6541_v28 = vpop.eup %5195  ;;  %vm1280_vm2 = vcmp.eq.f32.partialorder %v1279_v47, 8.507059e+37 }
 0x435   : > { %v1273_v42 = vmul.f32 %v5194_v8, %v1272_v16  ;;  %v1552_v52 = vmul.f32 1.442695, %v1539_v1  ;;  %v1567_v30 = vsel %vm1183_vm10, %v6541_v28, 0.0  ;;  %v1268_v1 = vor.u32 1.1754944e-38, %v1267_v49 }
 0x436   : > { %1568 = vadd.xlane.f32.xlu2 %v1567_v30 }
 0x437   : > { %v1274_v13 = vadd.f32 %v5194_v8, %v1273_v42  ;;  %5199 = vpow2.f32 %v1552_v52  ;;  %v1282_v52 = vor.u32 1.1754944e-38, %v1281_v4  ;;  %v1269_v23 = vsel %vm1266_vm1, %v1268_v1, %v1264_v0 }
 0x438   : > { %v5198_v19 = vpop.eup %5197  ;;  %5201 = vpow2.f32 %v1550_v54 }
 0x439   : > { %v1285_v25 = vmul.f32 %v5198_v19, %v6536_v33  ;;  %v6556_v16 = vpop.xlane.xlu1 %1853  ;;  %v1278_v41 = vsel %vm1277_vm0, %v5194_v8, %v1274_v13  ;;  %v6560_v54 = vpop.xlane.xlu0 %1245  ;;  %v1368_v8 = vmul.f32 %v6379_v43, %v1269_v23  ;;  %vm1290_vm3 = vweird.f32 %v5198_v19 }
 0x43a   : > { %v1243_v42 = vpop.xlane.xlu2 %1242  ;;  %v1283_v30 = vsel %vm1280_vm2, %v1282_v52, %v1278_v41  ;;  %v1293_v23 = vand.u32 2147483647, %v6536_v33  ;;  %vm6578_vm5 = vmor %vm1289_vm4, %vm1290_vm3  ;;  %vm1317_vm14 = vweird.f32 %v6560_v54 }
 0x43b   : > { %v1286_v18 = vsub.f32 1.0, %v1285_v25  ;;  %5203 = vrcp.f32 %v1243_v42  ;;  %v1369_v48 = vmul.f32 %v6399_v2, %v1283_v30  ;;  %v1309_v52 = vand.u32 2147483648, %v1243_v42 }
 0x43c   : > { %5205 = vrcp.f32 %v6560_v54  ;;  %v1307_v30 = vand.u32 2147483647, %v1243_v42  ;;  %vm1294_vm7 = vcmp.eq.f32.partialorder %v1293_v23, 8.507059e+37  ;;  %vm1303_vm8 = vweird.f32 %v1243_v42 }
 0x43d   : > { %v6558_v40 = vpop.eup %5199  ;;  %v1287_v17 = vmul.f32 %v5198_v19, %v1286_v18  ;;  %v1376_v4 = vpack.c.bf16 %v1369_v48, %v1368_v8  ;;  %v1295_v18 = vand.u32 2147483648, %v6536_v33  ;;  %v1310_v48 = vor.u32 1.1754944e-38, %v1309_v52 }
 0x43e   : > { %v6562_v29 = vpop.eup %5201  ;;  %v1573_v37 = vsel %vm1183_vm10, %v6558_v40, 0.0  ;;  %vm1308_vm12 = vcmp.eq.f32.partialorder %v1307_v30, 8.507059e+37 }
 0x43f   : > { %v1570_v13 = vsel %vm1183_vm10, %v6562_v29, 0.0  ;;  %1574 = vadd.xlane.f32.xlu2 %v1573_v37  ;;  %v1288_v1 = vadd.f32 %v5198_v19, %v1287_v17  ;;  %4509 = vmatmul.msk.bf16.vlgmr.msrb.gmra.mxu0 %vm1183_vm10, %v1376_v4 }
 0x440   : > { %1571 = vadd.xlane.f32.xlu0 %v1570_v13  ;;  %v1296_v13 = vor.u32 1.1754944e-38, %v1295_v18 }
 0x441   : > { %v5204_v49 = vpop.eup %5203  ;;  %v6570_v47 = vpop.xlane.xlu1 %1532  ;;  %v1292_v17 = vsel %vm6578_vm5, %v5198_v19, %v1288_v1 }
 0x442   : > { %v1299_v0 = vmul.f32 %v5204_v49, %v1243_v42  ;;  %v6572_v25 = vpop.xlane.xlu2 %1856  ;;  %vm1304_vm6 = vweird.f32 %v5204_v49  ;;  %v6583_v37 = vpop.xlane.xlu0 %1859 }
 0x443   : > { %vm1305_vm11 = vmor %vm1303_vm8, %vm1304_vm6  ;;  %v5206_v34 = vpop.eup %5205 }
 0x444   : > { %v1300_v41 = vsub.f32 1.0, %v1299_v0  ;;  %v1297_v0 = vsel %vm1294_vm7, %v1296_v13, %v1292_v17  ;;  %v1313_v1 = vmul.f32 %v5206_v34, %v6560_v54  ;;  %vm1318_vm13 = vweird.f32 %v5206_v34 }
 0x445   : > { %v1370_v43 = vmul.f32 %v6413_v6, %v1297_v0  ;;  %v1323_v17 = vand.u32 2147483648, %v6560_v54  ;;  %vm6616_vm15 = vmor %vm1317_vm14, %vm1318_vm13 }
 0x446   : > { %v1301_v2 = vmul.f32 %v5204_v49, %v1300_v41  ;;  %v1314_v52 = vsub.f32 1.0, %v1313_v1 }
 0x447   : > { %2364 = vrot.lane.b32.xlu1 %v6266_v53, %s5815_s16  ;;  %v1324_v1 = vor.u32 1.1754944e-38, %v1323_v17 }
 0x448   : > { %v1302_v33 = vadd.f32 %v5204_v49, %v1301_v2 }
 0x449   : > { %v6589_v8 = vpop.xlane.xlu1 %1862 }
 0x44a   : > { %v1530_v4 = vpop.xlane.xlu2 %1529  ;;  %v1306_v24 = vsel %vm1305_vm11, %v5204_v49, %v1302_v33  ;;  %v6595_v18 = vpop.xlane.xlu0 %1251 }
 0x44b   : > { %v1540_v41 = vsub.f32 %v6451_v7, %v1530_v4  ;;  %v1311_v14 = vsel %vm1308_vm12, %v1310_v48, %v1306_v24  ;;  %v1351_v48 = vand.u32 2147483648, %v6595_v18  ;;  %vm1345_vm6 = vweird.f32 %v6595_v18 }
 0x44c   : > { %v1371_v19 = vmul.f32 %v6427_v39, %v1311_v14 }
 0x44d   : > { %v1554_v57 = vmul.f32 1.442695, %v1540_v41 }
 0x44e   : > { %v1377_v42 = vpack.c.bf16 %v1371_v19, %v1370_v43 }
 0x44f   : > { %5207 = vpow2.f32 %v1554_v57  ;;  %v1315_v57 = vmul.f32 %v5206_v34, %v1314_v52 }
 0x450   : > { %4510 = vmatmul.msk.bf16.gmra.mxu0 %vm1183_vm10, %v1377_v42 }
 0x451   : > { %v2168_v23 = vpop.xlane.xlu1 %2167  ;;  %v1316_v30 = vadd.f32 %v5206_v34, %v1315_v57 }
 0x452   : > { %v1249_v2 = vpop.xlane.xlu2 %1248  ;;  %v2190_v41 = vsub.f32 %v6461_v20, %v2168_v23 }
 0x453   : > { %5209 = vrcp.f32 %v1249_v2  ;;  %v1337_v0 = vand.u32 2147483648, %v1249_v2  ;;  %v1335_v43 = vand.u32 2147483647, %v1249_v2  ;;  %v1320_v19 = vsel %vm6616_vm15, %v5206_v34, %v1316_v30 }
 0x454   : > { %5211 = vrcp.f32 %v6595_v18  ;;  %2042 = vrot.lane.b32.xlu0 %v6251_v58, %s5814_s28  ;;  %v1321_v58 = vand.u32 2147483647, %v6560_v54  ;;  %vm1331_vm2 = vweird.f32 %v1249_v2 }
 0x455   : > { %v6601_v24 = vpop.eup %5207  ;;  %vm1336_vm4 = vcmp.eq.f32.partialorder %v1335_v43, 8.507059e+37 }
 0x456   : > { %v1576_v14 = vsel %vm1183_vm10, %v6601_v24, 0.0  ;;  %vm1322_vm1 = vcmp.eq.f32.partialorder %v1321_v58, 8.507059e+37 }
 0x457   : > { %1577 = vadd.xlane.f32.xlu2 %v1576_v14  ;;  %v1338_v14 = vor.u32 1.1754944e-38, %v1337_v0  ;;  %v1325_v57 = vsel %vm1322_vm1, %v1324_v1, %v1320_v19  ;;  %v1352_v1 = vor.u32 1.1754944e-38, %v1351_v48  ;;  %v1867_v48 = vsub.f32 %v6401_v5, %v6529_v21 }
 0x458   : > { %v1372_v23 = vmul.f32 %v6425_v35, %v1325_v57  ;;  %v1349_v35 = vand.u32 2147483647, %v6595_v18 }
 0x459   : > { %v5210_v6 = vpop.eup %5209  ;;  %v6605_v39 = vpop.xlane.xlu1 %2170 }
 0x45a   : > { %v6607_v7 = vpop.eup %5211  ;;  %v1327_v49 = vmul.f32 %v5210_v6, %v1249_v2  ;;  %vm1332_vm0 = vweird.f32 %v5210_v6  ;;  %vm1350_vm11 = vcmp.eq.f32.partialorder %v1349_v35, 8.507059e+37 }
 0x45b   : > { %v1341_v33 = vmul.f32 %v6607_v7, %v6595_v18  ;;  %vm1333_vm3 = vmor %vm1331_vm2, %vm1332_vm0  ;;  %v2177_v59 = vpop.xlane.xlu2 %2176  ;;  %vm1346_vm5 = vweird.f32 %v6607_v7 }
 0x45c   : > { %v1328_v13 = vsub.f32 1.0, %v1327_v49  ;;  %2040 = vrot.lane.b32.xlu0 %v6261_v62, %s5814_s28  ;;  %v2198_v49 = vmul.f32 1.442695, %v2190_v41  ;;  %v2193_v2 = vsub.f32 %v6476_v45, %v2177_v59  ;;  %vm6635_vm7 = vmor %vm1345_vm6, %vm1346_vm5 }
 0x45d   : > { %v1342_v54 = vsub.f32 1.0, %v1341_v33 }
 0x45e   : > { %v1329_v4 = vmul.f32 %v5210_v6, %v1328_v13 }
 0x45f   : > { %v1343_v34 = vmul.f32 %v6607_v7, %v1342_v54 }
 0x460   : > { %v1330_v42 = vadd.f32 %v5210_v6, %v1329_v4  ;;  %v2204_v4 = vmul.f32 1.442695, %v2193_v2 }
 0x461   : > { %v1255_v52 = vpop.xlane.xlu1 %1254  ;;  %v1344_v33 = vadd.f32 %v6607_v7, %v1343_v34 }
 0x462   : > { %5213 = vrcp.f32 %v1255_v52  ;;  %v1334_v13 = vsel %vm1333_vm3, %v5210_v6, %v1330_v42  ;;  %v1365_v59 = vand.u32 2147483648, %v1255_v52  ;;  %v1363_v43 = vand.u32 2147483647, %v1255_v52  ;;  %v2174_v42 = vpop.xlane.xlu0 %2173 }
 0x463   : > { %v1339_v20 = vsel %vm1336_vm4, %v1338_v14, %v1334_v13  ;;  %5215 = vpow2.f32 %v2198_v49  ;;  %v1348_v19 = vsel %vm6635_vm7, %v6607_v7, %v1344_v33  ;;  %vm1359_vm12 = vweird.f32 %v1255_v52 }
 0x464   : > { %2362 = vrot.lane.b32.xlu0 %v6217_v3, %s5815_s16  ;;  %v1373_v30 = vmul.f32 %v6463_v27, %v1339_v20  ;;  %5217 = vpow2.f32 %v2204_v4  ;;  %v1366_v54 = vor.u32 1.1754944e-38, %v1365_v59  ;;  %v1353_v57 = vsel %vm1350_vm11, %v1352_v1, %v1348_v19 }
 0x465   : > { %vm1364_vm14 = vcmp.eq.f32.partialorder %v1363_v43, 8.507059e+37  ;;  %v1374_v7 = vmul.f32 %v6449_v61, %v1353_v57  ;;  %v2191_v61 = vsub.f32 %v6474_v44, %v6605_v39  ;;  %v1878_v44 = vmul.f32 1.442695, %v1867_v48 }
 0x466   : > { %v1378_v17 = vpack.c.bf16 %v1373_v30, %v1372_v23  ;;  %v1541_v30 = vsub.f32 %v6436_v51, %v6570_v47  ;;  %v2192_v47 = vsub.f32 %v6466_v10, %v2174_v42 }
 0x468   : > { %v5214_v58 = vpop.eup %5213  ;;  %4511 = vmatmul.msk.bf16.gmra.mxu0 %vm1183_vm10, %v1378_v17  ;;  %v1556_v17 = vmul.f32 1.442695, %v1541_v30  ;;  %v2202_v4 = vmul.f32 1.442695, %v2192_v47 }
 0x469   : > { %v1355_v6 = vmul.f32 %v5214_v58, %v1255_v52  ;;  %v6639_v45 = vpop.eup %5215  ;;  %vm1360_vm8 = vweird.f32 %v5214_v58 }
 0x46a   : > { %vm1361_vm13 = vmor %vm1359_vm12, %vm1360_vm8  ;;  %v2214_v14 = vsel %vm1183_vm10, %v6639_v45, 0.0  ;;  %v6650_v34 = vpop.eup %5217  ;;  %v2180_v23 = vpop.xlane.xlu0 %2179  ;;  %5219 = vpow2.f32 %v1556_v17 }
 0x46b   : > { %v1356_v27 = vsub.f32 1.0, %v1355_v6  ;;  %v2200_v6 = vmul.f32 1.442695, %v2191_v61  ;;  %v2194_v0 = vsub.f32 %v6484_v36, %v2180_v23  ;;  %v2183_v59 = vpop.xlane.xlu1 %2182 }
 0x46c   : > { %v2195_v36 = vsub.f32 %v6490_v63, %v2183_v59 }
 0x46d   : > { %v1357_v41 = vmul.f32 %v5214_v58, %v1356_v27 }
 0x46e   : > { %v2208_v23 = vmul.f32 1.442695, %v2195_v36 }
 0x46f   : > { %v1358_v18 = vadd.f32 %v5214_v58, %v1357_v41  ;;  %2366 = vrot.lane.b32.xlu2 %v6261_v62, %s5815_s16  ;;  %v2223_v62 = vsel %vm1183_vm10, %v6650_v34, 0.0 }
 0x470   : > { %v6663_v33 = vpop.eup %5219 }
 0x471   : > { %2215 = vadd.xlane.f32.xlu1 %v2214_v14  ;;  %v1362_v49 = vsel %vm1361_vm13, %v5214_v58, %v1358_v18  ;;  %v1579_v51 = vsel %vm1183_vm10, %v6663_v33, 0.0 }
 0x472   : > { %v1367_v13 = vsel %vm1364_vm14, %v1366_v54, %v1362_v49  ;;  %v2206_v54 = vmul.f32 1.442695, %v2194_v0 }
 0x473   : > { %v1375_v20 = vmul.f32 %v6482_v50, %v1367_v13  ;;  %v6661_v58 = vpop.xlane.xlu2 %2185 }
 0x475   : > { %v1379_v52 = vpack.c.bf16 %v1375_v20, %v1374_v7 }
 0x478   : > { %4512 = vmatmul.msk.bf16.gmra.mxu0 %vm1183_vm10, %v1379_v52 }
 0x479   : > { %2224 = vadd.xlane.f32.xlu1 %v2223_v62 }
 0x47b   : > { %v6657_v2 = vpop.xlane.xlu0 %2188 }
 0x47c   : > { %v2197_v30 = vsub.f32 %v6499_v22, %v6657_v2  ;;  %v1869_v22 = vsub.f32 %v6438_v55, %v6572_v25 }
 0x47e   : > { %v2212_v2 = vmul.f32 1.442695, %v2197_v30 }
 0x483   : > { %v1560_v50 = vpop.xlane.xlu0 %1559 }
 0x484   : > { %5221 = vrcp.f32 %v1560_v50  ;;  %v1591_v57 = vand.u32 2147483647, %v1560_v50  ;;  %v1593_v13 = vand.u32 2147483648, %v1560_v50  ;;  %vm1587_vm0 = vweird.f32 %v1560_v50 }
 0x485   : > { %5223 = vpow2.f32 %v2200_v6 }
 0x486   : > { %vm6703_vm1 = vcmp.eq.f32.partialorder %v1591_v57, 8.507059e+37  ;;  %v1594_v47 = vor.u32 1.1754944e-38, %v1593_v13 }
 0x48a   : > { %v6670_v35 = vpop.eup %5221 }
 0x48b   : > { %v6677_v27 = vpop.eup %5223  ;;  %v1583_v5 = vmul.f32 %v6670_v35, %v1560_v50  ;;  %vm1588_vm15 = vweird.f32 %v6670_v35 }
 0x48c   : > { %v2217_v10 = vsel %vm1183_vm10, %v6677_v27, 0.0  ;;  %vm6716_vm3 = vmor %vm1587_vm0, %vm1588_vm15 }
 0x48d   : > { %v1584_v41 = vsub.f32 1.0, %v1583_v5 }
 0x48e   : > { %1580 = vadd.xlane.f32.xlu0 %v1579_v51 }
 0x48f   : > { %v1585_v14 = vmul.f32 %v6670_v35, %v1584_v41 }
 0x491   : > { %v6672_v39 = vpop.xlane.xlu2 %1889  ;;  %v1586_v62 = vadd.f32 %v6670_v35, %v1585_v14 }
 0x492   : > { %5225 = vrcp.f32 %v6672_v39  ;;  %2036 = vrot.lane.b32.xlu1 %v6217_v3, %s5814_s28  ;;  %v1921_v17 = vand.u32 2147483647, %v6672_v39  ;;  %vm1917_vm4 = vweird.f32 %v6672_v39 }
 0x493   : > { %5227 = vpow2.f32 %v1878_v44  ;;  %v1923_v44 = vand.u32 2147483648, %v6672_v39  ;;  %v1590_v5 = vsel %vm6716_vm3, %v6670_v35, %v1586_v62 }
 0x494   : > { %5229 = vpow2.f32 %v2202_v4  ;;  %vm6729_vm6 = vcmp.eq.f32.partialorder %v1921_v17, 8.507059e+37 }
 0x495   : > { %v1924_v14 = vor.u32 1.1754944e-38, %v1923_v44 }
 0x498   : > { %v6682_v21 = vpop.eup %5225  ;;  %2218 = vadd.xlane.f32.xlu2 %v2217_v10 }
 0x499   : > { %v1913_v43 = vmul.f32 %v6682_v21, %v6672_v39  ;;  %v1563_v3 = vpop.xlane.xlu2 %1562  ;;  %v6687_v19 = vpop.xlane.xlu0 %1892  ;;  %vm1918_vm2 = vweird.f32 %v6682_v21 }
 0x49a   : > { %5231 = vrcp.f32 %v1563_v3  ;;  %v6689_v1 = vpop.eup %5227  ;;  %v1605_v10 = vand.u32 2147483647, %v1563_v3  ;;  %v1607_v0 = vand.u32 2147483648, %v1563_v3  ;;  %vm6725_vm5 = vmor %vm1917_vm4, %vm1918_vm2  ;;  %v1937_v39 = vand.u32 2147483648, %v6687_v19 }
 0x49b   : > { %v1914_v42 = vsub.f32 1.0, %v1913_v43  ;;  %5233 = vrcp.f32 %v6687_v19  ;;  %v6692_v18 = vpop.eup %5229  ;;  %v1897_v7 = vsel %vm1183_vm10, %v6689_v1, 0.0  ;;  %v1935_v36 = vand.u32 2147483647, %v6687_v19 }
 0x49c   : > { %v2220_v20 = vsel %vm1183_vm10, %v6692_v18, 0.0  ;;  %5235 = vpow2.f32 %v2206_v54  ;;  %vm1601_vm11 = vweird.f32 %v1563_v3  ;;  %vm1606_vm13 = vcmp.eq.f32.partialorder %v1605_v10, 8.507059e+37 }
 0x49d   : > { %v1915_v49 = vmul.f32 %v6682_v21, %v1914_v42  ;;  %vm1931_vm14 = vweird.f32 %v6687_v19  ;;  %vm1936_vm0 = vcmp.eq.f32.partialorder %v1935_v36, 8.507059e+37 }
 0x49f   : > { %v1916_v48 = vadd.f32 %v6682_v21, %v1915_v49  ;;  %v1595_v49 = vsel %vm6703_vm1, %v1594_v47, %v1590_v5 }
 0x4a0   : > { %v5232_v52 = vpop.eup %5231  ;;  %1898 = vadd.xlane.f32.xlu2 %v1897_v7  ;;  %v1608_v7 = vor.u32 1.1754944e-38, %v1607_v0 }
 0x4a1   : > { %v5234_v63 = vpop.eup %5233  ;;  %v1597_v61 = vmul.f32 %v5232_v52, %v1563_v3  ;;  %v6708_v6 = vpop.xlane.xlu1 %1565  ;;  %vm1602_vm7 = vweird.f32 %v5232_v52  ;;  %v1920_v35 = vsel %vm6725_vm5, %v6682_v21, %v1916_v48 }
 0x4a2   : > { %v1927_v51 = vmul.f32 %v5234_v63, %v6687_v19  ;;  %2038 = vrot.lane.b32.xlu0 %v6266_v53, %s5814_s28  ;;  %5237 = vrcp.f32 %v6708_v6  ;;  %v6734_v42 = vpop.eup %5235  ;;  %vm1932_vm8 = vweird.f32 %v5234_v63  ;;  %vm1603_vm12 = vmor %vm1601_vm11, %vm1602_vm7  ;;  %v1925_v21 = vsel %vm6729_vm6, %v1924_v14, %v1920_v35 }
 0x4a3   : > { %v1598_v4 = vsub.f32 1.0, %v1597_v61  ;;  %vm1933_vm15 = vmor %vm1931_vm14, %vm1932_vm8  ;;  %v1938_v61 = vor.u32 1.1754944e-38, %v1937_v39  ;;  %vm1615_vm2 = vweird.f32 %v6708_v6  ;;  %v1619_v53 = vand.u32 2147483647, %v6708_v6 }
 0x4a4   : > { %v1928_v59 = vsub.f32 1.0, %v1927_v51 }
 0x4a5   : > { %v1599_v43 = vmul.f32 %v5232_v52, %v1598_v4  ;;  %vm1620_vm5 = vcmp.eq.f32.partialorder %v1619_v53, 8.507059e+37 }
 0x4a6   : > { %v1929_v54 = vmul.f32 %v5234_v63, %v1928_v59  ;;  %v1621_v59 = vand.u32 2147483648, %v6708_v6 }
 0x4a7   : > { %v1600_v57 = vadd.f32 %v5232_v52, %v1599_v43  ;;  %v1870_v43 = vsub.f32 %v6440_v60, %v6583_v37  ;;  %v1866_v60 = vsub.f32 %v6390_v56, %v6517_v38 }
 0x4a8   : > { %v6742_v13 = vpop.eup %5237  ;;  %v1930_v62 = vadd.f32 %v5234_v63, %v1929_v54  ;;  %2221 = vadd.xlane.f32.xlu2 %v2220_v20  ;;  %v1694_v20 = vmul.f32 %v6503_v31, %v1595_v49  ;;  %v1622_v49 = vor.u32 1.1754944e-38, %v1621_v59 }
 0x4a9   : > { %v1604_v17 = vsel %vm1603_vm12, %v5232_v52, %v1600_v57  ;;  %v1611_v3 = vmul.f32 %v6742_v13, %v6708_v6  ;;  %v1569_v19 = vpop.xlane.xlu2 %1568  ;;  %v6755_v52 = vmul.f32 %v6510_v46, %v1925_v21  ;;  %vm1616_vm1 = vweird.f32 %v6742_v13 }
 0x4aa   : > { %v1934_v48 = vsel %vm1933_vm15, %v5234_v63, %v1930_v62  ;;  %v1609_v51 = vsel %vm1606_vm13, %v1608_v7, %v1604_v17  ;;  %5239 = vrcp.f32 %v1569_v19  ;;  %vm6783_vm3 = vmor %vm1615_vm2, %vm1616_vm1  ;;  %v1635_v35 = vand.u32 2147483648, %v1569_v19 }
 0x4ab   : > { %v1939_v50 = vsel %vm1936_vm0, %v1938_v61, %v1934_v48  ;;  %v1612_v47 = vsub.f32 1.0, %v1611_v3  ;;  %v1695_v44 = vmul.f32 %v6519_v15, %v1609_v51  ;;  %5241 = vpow2.f32 %v2208_v23 }
 0x4ac   : > { %v6758_v4 = vmul.f32 %v6522_v12, %v1939_v50  ;;  %v2226_v15 = vsel %vm1183_vm10, %v6734_v42, 0.0  ;;  %v1882_v12 = vmul.f32 1.442695, %v1869_v22  ;;  %5243 = vpow2.f32 %v2212_v2 }
 0x4ad   : > { %v1702_v5 = vpack.c.bf16 %v1695_v44, %v1694_v20  ;;  %v1613_v31 = vmul.f32 %v6742_v13, %v1612_v47  ;;  %v1633_v14 = vand.u32 2147483647, %v1569_v19  ;;  %vm1629_vm6 = vweird.f32 %v1569_v19 }
 0x4ae   : > { %v2032_v63 = vpack.c.bf16 %v6758_v4, %v6755_v52  ;;  %v1884_v62 = vmul.f32 1.442695, %v1870_v43  ;;  %v1636_v21 = vor.u32 1.1754944e-38, %v1635_v35  ;;  %v1876_v51 = vmul.f32 1.442695, %v1866_v60 }
 0x4af   : > { %4517 = vmatmul.msk.bf16.vlgmr.msrb.gmra.mxu2 %vm1183_vm10, %v1702_v5  ;;  %v1614_v10 = vadd.f32 %v6742_v13, %v1613_v31  ;;  %vm1634_vm8 = vcmp.eq.f32.partialorder %v1633_v14, 8.507059e+37  ;;  %v1868_v31 = vsub.f32 %v6423_v32, %v6556_v16 }
 0x4b0   : > { %2227 = vadd.xlane.f32.xlu2 %v2226_v15  ;;  %v5240_v46 = vpop.eup %5239 }
 0x4b1   : > { %v6768_v23 = vpop.eup %5241  ;;  %v1625_v55 = vmul.f32 %v5240_v46, %v1569_v19  ;;  %vm1630_vm4 = vweird.f32 %v5240_v46  ;;  %v1618_v6 = vsel %vm6783_vm3, %v6742_v13, %v1614_v10  ;;  %v1880_v53 = vmul.f32 1.442695, %v1868_v31 }
 0x4b2   : > { %v6772_v25 = vpop.xlane.xlu2 %1574  ;;  %v2229_v54 = vsel %vm1183_vm10, %v6768_v23, 0.0  ;;  %v6792_v57 = vpop.eup %5243  ;;  %vm1631_vm7 = vmor %vm1629_vm6, %vm1630_vm4  ;;  %v1623_v17 = vsel %vm1620_vm5, %v1622_v49, %v1618_v6 }
 0x4b3   : > { %v6774_v0 = vpop.xlane.xlu0 %1571  ;;  %5245 = vrcp.f32 %v6772_v25  ;;  %v1626_v41 = vsub.f32 1.0, %v1625_v55  ;;  %v2235_v13 = vsel %vm1183_vm10, %v6792_v57, 0.0  ;;  %v1696_v47 = vmul.f32 %v6532_v26, %v1623_v17 }
 0x4b4   : > { %5247 = vrcp.f32 %v6774_v0  ;;  %vm1657_vm13 = vweird.f32 %v6772_v25  ;;  %v1661_v10 = vand.u32 2147483647, %v6772_v25  ;;  %vm1643_vm15 = vweird.f32 %v6774_v0 }
 0x4b5   : > { %5249 = vpow2.f32 %v1882_v12  ;;  %v1627_v36 = vmul.f32 %v5240_v46, %v1626_v41  ;;  %v1647_v32 = vand.u32 2147483647, %v6774_v0 }
 0x4b6   : > { %5251 = vpow2.f32 %v1884_v62  ;;  %vm1662_vm1 = vcmp.eq.f32.partialorder %v1661_v10, 8.507059e+37 }
 0x4b7   : > { %v1628_v37 = vadd.f32 %v5240_v46, %v1627_v36  ;;  %5253 = vpow2.f32 %v1876_v51  ;;  %vm1648_vm2 = vcmp.eq.f32.partialorder %v1647_v32, 8.507059e+37  ;;  %v2196_v36 = vsub.f32 %v6494_v9, %v6661_v58 }
 0x4b8   : > { %2230 = vadd.xlane.f32.xlu2 %v2229_v54  ;;  %5255 = vpow2.f32 %v1880_v53  ;;  %v1871_v9 = vsub.f32 %v6453_v11, %v6589_v8 }
 0x4b9   : > { %v5246_v7 = vpop.eup %5245  ;;  %v1632_v30 = vsel %vm1631_vm7, %v5240_v46, %v1628_v37  ;;  %v1649_v46 = vand.u32 2147483648, %v6774_v0  ;;  %v2210_v37 = vmul.f32 1.442695, %v2196_v36  ;;  %v2365_v17 = vpop.permute.xlu1 %2364 }
 0x4ba   : > { %v5248_v61 = vpop.eup %5247  ;;  %v1653_v3 = vmul.f32 %v5246_v7, %v6772_v25  ;;  %v1637_v38 = vsel %vm1634_vm8, %v1636_v21, %v1632_v30  ;;  %vm1658_vm11 = vweird.f32 %v5246_v7 }
 0x4bb   : > { %v6799_v48 = vpop.eup %5249  ;;  %v1639_v56 = vmul.f32 %v5248_v61, %v6774_v0  ;;  %v1697_v19 = vmul.f32 %v6541_v28, %v1637_v38  ;;  %vm1644_vm12 = vweird.f32 %v5248_v61  ;;  %v1663_v28 = vand.u32 2147483648, %v6772_v25  ;;  %vm6812_vm14 = vmor %vm1657_vm13, %vm1658_vm11 }
 0x4bc   : > { %2236 = vadd.xlane.f32.xlu1 %v2235_v13  ;;  %v1654_v50 = vsub.f32 1.0, %v1653_v3  ;;  %v1903_v5 = vsel %vm1183_vm10, %v6799_v48, 0.0  ;;  %v6819_v16 = vpop.eup %5251  ;;  %vm1645_vm0 = vmor %vm1643_vm15, %vm1644_vm12  ;;  %v1650_v43 = vor.u32 1.1754944e-38, %v1649_v46  ;;  %5257 = vpow2.f32 %v2210_v37 }
 0x4bd   : > { %v1640_v20 = vsub.f32 1.0, %v1639_v56  ;;  %v1703_v22 = vpack.c.bf16 %v1697_v19, %v1696_v47  ;;  %v1664_v41 = vor.u32 1.1754944e-38, %v1663_v28  ;;  %v6823_v35 = vpop.eup %5253  ;;  %v1906_v25 = vsel %vm1183_vm10, %v6819_v16, 0.0 }
 0x4be   : > { %v1655_v44 = vmul.f32 %v5246_v7, %v1654_v50  ;;  %v1894_v6 = vsel %vm1183_vm10, %v6823_v35, 0.0  ;;  %v6833_v21 = vpop.eup %5255 }
 0x4bf   : > { %v1641_v2 = vmul.f32 %v5248_v61, %v1640_v20  ;;  %4518 = vmatmul.msk.bf16.gmra.mxu2 %vm1183_vm10, %v1703_v22 }
 0x4c0   : > { %1904 = vadd.xlane.f32.xlu2 %v1903_v5  ;;  %v1656_v15 = vadd.f32 %v5246_v7, %v1655_v44 }
 0x4c1   : > { %v1642_v26 = vadd.f32 %v5248_v61, %v1641_v2 }
 0x4c2   : > { %v1660_v59 = vsel %vm6812_vm14, %v5246_v7, %v1656_v15 }
 0x4c3   : > { %v1646_v55 = vsel %vm1645_vm0, %v5248_v61, %v1642_v26  ;;  %v1665_v54 = vsel %vm1662_vm1, %v1664_v41, %v1660_v59  ;;  %v6840_v61 = vpop.eup %5257 }
 0x4c4   : > { %v1651_v0 = vsel %vm1648_vm2, %v1650_v43, %v1646_v55  ;;  %v1699_v60 = vmul.f32 %v6558_v40, %v1665_v54  ;;  %v1886_v40 = vmul.f32 1.442695, %v1871_v9  ;;  %v2232_v13 = vsel %vm1183_vm10, %v6840_v61, 0.0 }
 0x4c5   : > { %v1698_v49 = vmul.f32 %v6562_v29, %v1651_v0  ;;  %v1900_v29 = vsel %vm1183_vm10, %v6833_v21, 0.0 }
 0x4c6   : > { %v2043_v39 = vpop.permute.xlu0 %2042  ;;  %5259 = vpow2.f32 %v1886_v40 }
 0x4c7   : > { %2064 = vmatpush.bf16.msra.mxu0 %v2043_v39  ;;  %v1704_v62 = vpack.c.bf16 %v1699_v60, %v1698_v49 }
 0x4c8   : > { %1907 = vadd.xlane.f32.xlu2 %v1906_v25 }
 0x4ca   : > { %v1578_v14 = vpop.xlane.xlu2 %1577 }
 0x4cb   : > { %5261 = vrcp.f32 %v1578_v14  ;;  %vm1671_vm4 = vweird.f32 %v1578_v14  ;;  %v1677_v22 = vand.u32 2147483648, %v1578_v14  ;;  %v1675_v31 = vand.u32 2147483647, %v1578_v14 }
 0x4cc   : > { %1895 = vadd.xlane.f32.xlu0 %v1894_v6  ;;  %v6844_v11 = vpop.eup %5259 }
 0x4cd   : > { %v1909_v8 = vsel %vm1183_vm10, %v6844_v11, 0.0  ;;  %v1678_v55 = vor.u32 1.1754944e-38, %v1677_v22  ;;  %vm1676_vm7 = vcmp.eq.f32.partialorder %v1675_v31, 8.507059e+37 }
 0x4ce   : > { %v2041_v7 = vpop.permute.xlu0 %2040 }
 0x4cf   : > { %2065 = vmatpush.bf16.msra.mxu0 %v2041_v7  ;;  %4519 = vmatmul.msk.bf16.gmra.mxu2 %vm1183_vm10, %v1704_v62 }
 0x4d1   : > { %v5262_v30 = vpop.eup %5261 }
 0x4d2   : > { %v2367_v58 = vpop.permute.xlu2 %2366  ;;  %v1667_v56 = vmul.f32 %v5262_v30, %v1578_v14  ;;  %vm1672_vm3 = vweird.f32 %v5262_v30 }
 0x4d3   : > { %2391 = vmatpush.bf16.msra.mxu2 %v2367_v58  ;;  %vm6853_vm5 = vmor %vm1671_vm4, %vm1672_vm3 }
 0x4d4   : > { %1901 = vadd.xlane.f32.xlu0 %v1900_v29  ;;  %v1668_v38 = vsub.f32 1.0, %v1667_v56 }
 0x4d6   : > { %v2363_v3 = vpop.permute.xlu0 %2362  ;;  %v1669_v47 = vmul.f32 %v5262_v30, %v1668_v38 }
 0x4d7   : > { %2392 = vmatpush.bf16.msra.mxu2 %v2365_v17 }
 0x4d8   : > { %v1670_v20 = vadd.f32 %v5262_v30, %v1669_v47 }
 0x4da   : > { %v1674_v46 = vsel %vm6853_vm5, %v5262_v30, %v1670_v20 }
 0x4db   : > { %2393 = vmatpush.bf16.msra.mxu2 %v2363_v3  ;;  %v1679_v43 = vsel %vm1676_vm7, %v1678_v55, %v1674_v46 }
 0x4dc   : > { %2233 = vadd.xlane.f32.xlu0 %v2232_v13  ;;  %v1700_v6 = vmul.f32 %v6601_v24, %v1679_v43 }
 0x4e4   : > { %1910 = vadd.xlane.f32.xlu0 %v1909_v8  ;;  %v6848_v51 = vpop.xlane.xlu1 %2215 }
 0x4e5   : > { %v2249_v3 = vand.u32 2147483648, %v6848_v51  ;;  %vm2243_vm1 = vweird.f32 %v6848_v51  ;;  %v2247_v13 = vand.u32 2147483647, %v6848_v51 }
 0x4e7   : > { %v2250_v47 = vor.u32 1.1754944e-38, %v2249_v3  ;;  %vm2248_vm4 = vcmp.eq.f32.partialorder %v2247_v13, 8.507059e+37 }
 0x4ec   : > { %v6861_v53 = vpop.xlane.xlu1 %2224 }
 0x501   : > { %v1581_v50 = vpop.xlane.xlu0 %1580 }
 0x502   : > { %5263 = vrcp.f32 %v1581_v50  ;;  %v1691_v26 = vand.u32 2147483648, %v1581_v50  ;;  %v1689_v32 = vand.u32 2147483647, %v1581_v50  ;;  %vm1685_vm8 = vweird.f32 %v1581_v50 }
 0x503   : > { %5265 = vrcp.f32 %v6848_v51 }
 0x504   : > { %v1692_v41 = vor.u32 1.1754944e-38, %v1691_v26  ;;  %vm1690_vm12 = vcmp.eq.f32.partialorder %v1689_v32, 8.507059e+37  ;;  %v2037_v58 = vpop.permute.xlu1 %2036 }
 0x508   : > { %v5264_v19 = vpop.eup %5263 }
 0x509   : > { %v1681_v44 = vmul.f32 %v5264_v19, %v1581_v50  ;;  %v6851_v5 = vpop.eup %5265  ;;  %vm1686_vm6 = vweird.f32 %v5264_v19 }
 0x50a   : > { %v2239_v12 = vmul.f32 %v6851_v5, %v6848_v51  ;;  %vm1687_vm11 = vmor %vm1685_vm8, %vm1686_vm6  ;;  %vm2244_vm14 = vweird.f32 %v6851_v5 }
 0x50b   : > { %v1682_v15 = vsub.f32 1.0, %v1681_v44  ;;  %v2219_v28 = vpop.xlane.xlu2 %2218  ;;  %vm2245_vm2 = vmor %vm2243_vm1, %vm2244_vm14 }
 0x50c   : > { %5267 = vrcp.f32 %v2219_v28  ;;  %v2240_v39 = vsub.f32 1.0, %v2239_v12  ;;  %v2263_v29 = vand.u32 2147483648, %v2219_v28  ;;  %vm2257_vm15 = vweird.f32 %v2219_v28 }
 0x50d   : > { %v1683_v10 = vmul.f32 %v5264_v19, %v1682_v15  ;;  %5269 = vrcp.f32 %v6861_v53 }
 0x50e   : > { %v2241_v37 = vmul.f32 %v6851_v5, %v2240_v39  ;;  %v2264_v56 = vor.u32 1.1754944e-38, %v2263_v29 }
 0x50f   : > { %v1684_v59 = vadd.f32 %v5264_v19, %v1683_v10  ;;  %v2289_v10 = vand.u32 2147483647, %v6861_v53 }
 0x510   : > { %v2242_v24 = vadd.f32 %v6851_v5, %v2241_v37 }
 0x511   : > { %v1688_v25 = vsel %vm1687_vm11, %v5264_v19, %v1684_v59  ;;  %vm2285_vm11 = vweird.f32 %v6861_v53  ;;  %vm2290_vm14 = vcmp.eq.f32.partialorder %v2289_v10, 8.507059e+37 }
 0x512   : > { %v5268_v0 = vpop.eup %5267  ;;  %v1693_v54 = vsel %vm1690_vm12, %v1692_v41, %v1688_v25  ;;  %v2246_v38 = vsel %vm2245_vm2, %v6851_v5, %v2242_v24 }
 0x513   : > { %v2253_v36 = vmul.f32 %v5268_v0, %v2219_v28  ;;  %v6863_v14 = vpop.xlane.xlu2 %1898  ;;  %v1701_v49 = vmul.f32 %v6663_v33, %v1693_v54  ;;  %vm2258_vm13 = vweird.f32 %v5268_v0  ;;  %v2261_v33 = vand.u32 2147483647, %v2219_v28  ;;  %v5270_v17 = vpop.eup %5269 }
 0x514   : > { %v2039_v60 = vpop.permute.xlu0 %2038  ;;  %vm2259_vm0 = vmor %vm2257_vm15, %vm2258_vm13  ;;  %v2281_v50 = vmul.f32 %v5270_v17, %v6861_v53  ;;  %v2251_v51 = vsel %vm2248_vm4, %v2250_v47, %v2246_v38  ;;  %vm2286_vm6 = vweird.f32 %v5270_v17 }
 0x515   : > { %v2254_v7 = vsub.f32 1.0, %v2253_v36  ;;  %2066 = vmatpush.bf16.msra.mxu0 %v2039_v60  ;;  %v1705_v62 = vpack.c.bf16 %v1701_v49, %v1700_v6  ;;  %vm2262_vm3 = vcmp.eq.f32.partialorder %v2261_v33, 8.507059e+37  ;;  %v2350_v2 = vmul.f32 %v6639_v45, %v2251_v51  ;;  %vm2287_vm12 = vmor %vm2285_vm11, %vm2286_vm6 }
 0x516   : > { %v2282_v20 = vsub.f32 1.0, %v2281_v50  ;;  %v2291_v45 = vand.u32 2147483648, %v6861_v53 }
 0x517   : > { %v2255_v9 = vmul.f32 %v5268_v0, %v2254_v7  ;;  %4520 = vmatmul.msk.bf16.gmra.mxu2 %vm1183_vm10, %v1705_v62 }
 0x518   : > { %v2283_v52 = vmul.f32 %v5270_v17, %v2282_v20  ;;  %v2292_v39 = vor.u32 1.1754944e-38, %v2291_v45 }
 0x519   : > { %v2256_v40 = vadd.f32 %v5268_v0, %v2255_v9  ;;  %2067 = vmatpush.bf16.msra.mxu0 %v2037_v58 }
 0x51a   : > { %v2284_v26 = vadd.f32 %v5270_v17, %v2283_v52 }
 0x51b   : > { %v2260_v8 = vsel %vm2259_vm0, %v5268_v0, %v2256_v40  ;;  %v2222_v30 = vpop.xlane.xlu2 %2221 }
 0x51c   : > { %5271 = vrcp.f32 %v2222_v30  ;;  %4525 = vmatmul.msk.bf16.vlgmr.msra.gmra.mxu0 %vm1183_vm10, %v2032_v63  ;;  %v2265_v19 = vsel %vm2262_vm3, %v2264_v56, %v2260_v8  ;;  %v2277_v28 = vand.u32 2147483648, %v2222_v30  ;;  %vm2271_vm7 = vweird.f32 %v2222_v30 }
 0x51d   : > { %v2351_v44 = vmul.f32 %v6677_v27, %v2265_v19  ;;  %v2275_v27 = vand.u32 2147483647, %v2222_v30  ;;  %v2288_v43 = vsel %vm2287_vm12, %v5270_v17, %v2284_v26 }
 0x51e   : > { %v2278_v59 = vor.u32 1.1754944e-38, %v2277_v28  ;;  %v2293_v0 = vsel %vm2290_vm14, %v2292_v39, %v2288_v43  ;;  %v6944_v43 = vpop.f32.mrf.mxu0 }
 0x51f   : > { %v2358_v63 = vpack.c.bf16 %v2351_v44, %v2350_v2  ;;  %vm2276_vm13 = vcmp.eq.f32.partialorder %v2275_v27, 8.507059e+37  ;;  %v2353_v60 = vmul.f32 %v6650_v34, %v2293_v0  ;;  %v1963_v27 = vand.u32 2147483647, %v6863_v14 }
 0x521   : > { %vm1964_vm14 = vcmp.eq.f32.partialorder %v1963_v27, 8.507059e+37 }
 0x522   : > { %v5272_v22 = vpop.eup %5271 }
 0x523   : > { %v2267_v31 = vmul.f32 %v5272_v22, %v2222_v30  ;;  %v6885_v15 = vpop.xlane.xlu2 %2227  ;;  %vm2272_vm5 = vweird.f32 %v5272_v22 }
 0x524   : > { %5273 = vrcp.f32 %v6885_v15  ;;  %vm2273_vm8 = vmor %vm2271_vm7, %vm2272_vm5  ;;  %vm2299_vm1 = vweird.f32 %v6885_v15  ;;  %v2305_v33 = vand.u32 2147483648, %v6885_v15  ;;  %v2303_v3 = vand.u32 2147483647, %v6885_v15 }
 0x525   : > { %v2268_v4 = vsub.f32 1.0, %v2267_v31 }
 0x526   : > { %v2306_v50 = vor.u32 1.1754944e-38, %v2305_v33  ;;  %vm2304_vm6 = vcmp.eq.f32.partialorder %v2303_v3, 8.507059e+37 }
 0x527   : > { %v2269_v5 = vmul.f32 %v5272_v22, %v2268_v4  ;;  %4533 = vmatmul.msk.bf16.vlgmr.msra.gmra.mxu2 %vm1183_vm10, %v2358_v63 }
 0x529   : > { %v2270_v46 = vadd.f32 %v5272_v22, %v2269_v5 }
 0x52a   : > { %v5274_v12 = vpop.eup %5273 }
 0x52b   : > { %v2231_v32 = vpop.xlane.xlu2 %2230  ;;  %v2274_v55 = vsel %vm2273_vm8, %v5272_v22, %v2270_v46  ;;  %v2295_v41 = vmul.f32 %v5274_v12, %v6885_v15  ;;  %vm2300_vm15 = vweird.f32 %v5274_v12  ;;  %vm1959_vm8 = vweird.f32 %v6863_v14 }
 0x52c   : > { %5275 = vrcp.f32 %v2231_v32  ;;  %v2279_v25 = vsel %vm2276_vm13, %v2278_v59, %v2274_v55  ;;  %v2319_v58 = vand.u32 2147483648, %v2231_v32  ;;  %vm6901_vm2 = vmor %vm2299_vm1, %vm2300_vm15  ;;  %vm2313_vm3 = vweird.f32 %v2231_v32 }
 0x52d   : > { %v2296_v54 = vsub.f32 1.0, %v2295_v41  ;;  %v2352_v36 = vmul.f32 %v6692_v18, %v2279_v25  ;;  %5277 = vrcp.f32 %v6863_v14  ;;  %v2317_v18 = vand.u32 2147483647, %v2231_v32 }
 0x52e   : > { %v2320_v30 = vor.u32 1.1754944e-38, %v2319_v58 }
 0x52f   : > { %v2297_v37 = vmul.f32 %v5274_v12, %v2296_v54  ;;  %v2359_v62 = vpack.c.bf16 %v2353_v60, %v2352_v36  ;;  %vm2318_vm5 = vcmp.eq.f32.partialorder %v2317_v18, 8.507059e+37  ;;  %v6911_v47 = vpop.xlane.xlu1 %2236 }
 0x530   : > { %v2345_v33 = vand.u32 2147483647, %v6911_v47  ;;  %v2347_v3 = vand.u32 2147483648, %v6911_v47 }
 0x531   : > { %v2298_v24 = vadd.f32 %v5274_v12, %v2297_v37 }
 0x532   : > { %v5276_v6 = vpop.eup %5275  ;;  %v1743_v49 = vpop.f32.mrf.mxu2 }
 0x533   : > { %v2309_v53 = vmul.f32 %v5276_v6, %v2231_v32  ;;  %v6897_v29 = vpop.eup %5277  ;;  %vm2314_vm0 = vweird.f32 %v5276_v6  ;;  %v2302_v56 = vsel %vm6901_vm2, %v5274_v12, %v2298_v24  ;;  %v6913_v44 = vpop.xlane.xlu2 %1904  ;;  %vm2341_vm2 = vweird.f32 %v6911_v47 }
 0x534   : > { %v1955_v8 = vmul.f32 %v6897_v29, %v6863_v14  ;;  %vm2315_vm4 = vmor %vm2313_vm3, %vm2314_vm0  ;;  %v2307_v22 = vsel %vm2304_vm6, %v2306_v50, %v2302_v56  ;;  %vm1960_vm7 = vweird.f32 %v6897_v29 }
 0x535   : > { %v2310_v7 = vsub.f32 1.0, %v2309_v53  ;;  %v2354_v31 = vmul.f32 %v6734_v42, %v2307_v22  ;;  %v1965_v42 = vand.u32 2147483648, %v6863_v14  ;;  %vm6935_vm11 = vmor %vm1959_vm8, %vm1960_vm7  ;;  %vm6986_vm7 = vcmp.eq.f32.partialorder %v2345_v33, 8.507059e+37 }
 0x536   : > { %v1956_v20 = vsub.f32 1.0, %v1955_v8  ;;  %vm1987_vm8 = vweird.f32 %v6913_v44 }
 0x537   : > { %v2311_v9 = vmul.f32 %v5276_v6, %v2310_v7  ;;  %4534 = vmatmul.msk.bf16.gmra.mxu2 %vm1183_vm10, %v2359_v62  ;;  %v1966_v14 = vor.u32 1.1754944e-38, %v1965_v42 }
 0x538   : > { %v1957_v15 = vmul.f32 %v6897_v29, %v1956_v20 }
 0x539   : > { %v2312_v40 = vadd.f32 %v5276_v6, %v2311_v9 }
 0x53a   : > { %v1745_v17 = vpop.f32.mrf.mxu2  ;;  %v1958_v26 = vadd.f32 %v6897_v29, %v1957_v15 }
 0x53b   : > { %v5079_v13 = vpack.i.bf16 %v1745_v17, %v1743_v49  ;;  %v2316_v38 = vsel %vm2315_vm4, %v5276_v6, %v2312_v40  ;;  %v6952_v37 = vpop.xlane.xlu2 %1907 }
 0x53c   : > { %v2321_v19 = vsel %vm2318_vm5, %v2320_v30, %v2316_v38  ;;  %v1962_v41 = vsel %vm6935_vm11, %v6897_v29, %v1958_v26  ;;  %v2348_v26 = vor.u32 1.1754944e-38, %v2347_v3 }
 0x53d   : > { %5080 = vrot.lane.b32.xlu2 %v5079_v13, %s5815_s16  ;;  %v2355_v2 = vmul.f32 %v6768_v23, %v2321_v19  ;;  %v1967_v53 = vsel %vm1964_vm14, %v1966_v14, %v1962_v41 }
 0x53e   : > { %v2027_v29 = vmul.f32 %v6689_v1, %v1967_v53  ;;  %v6968_v1 = vpop.f32.mrf.mxu0 }
 0x53f   : > { %v1896_v51 = vpop.xlane.xlu0 %1895  ;;  %v2360_v52 = vpack.c.bf16 %v2355_v2, %v2354_v31  ;;  %v1991_v2 = vand.u32 2147483647, %v6913_v44 }
 0x540   : > { %5279 = vrcp.f32 %v1896_v51  ;;  %v1951_v32 = vand.u32 2147483648, %v1896_v51  ;;  %v1949_v59 = vand.u32 2147483647, %v1896_v51  ;;  %vm1945_vm13 = vweird.f32 %v1896_v51 }
 0x541   : > { %5281 = vrcp.f32 %v6911_v47 }
 0x542   : > { %5283 = vrcp.f32 %v6913_v44  ;;  %v1952_v54 = vor.u32 1.1754944e-38, %v1951_v32  ;;  %vm1950_vm0 = vcmp.eq.f32.partialorder %v1949_v59, 8.507059e+37 }
 0x546   : > { %v5280_v4 = vpop.eup %5279 }
 0x547   : > { %v6920_v63 = vpop.eup %5281  ;;  %v1941_v5 = vmul.f32 %v5280_v4, %v1896_v51  ;;  %4535 = vmatmul.msk.bf16.gmra.mxu2 %vm1183_vm10, %v2360_v52  ;;  %v6923_v28 = vpop.xlane.xlu0 %1901  ;;  %vm1946_vm12 = vweird.f32 %v5280_v4  ;;  %v1993_v51 = vand.u32 2147483648, %v6913_v44 }
 0x548   : > { %5285 = vrcp.f32 %v6923_v28  ;;  %v6928_v23 = vpop.eup %5283  ;;  %v2337_v12 = vmul.f32 %v6920_v63, %v6911_v47  ;;  %vm1947_vm15 = vmor %vm1945_vm13, %vm1946_vm12  ;;  %vm2342_vm1 = vweird.f32 %v6920_v63  ;;  %v1979_v13 = vand.u32 2147483648, %v6923_v28 }
 0x549   : > { %v1942_v46 = vsub.f32 1.0, %v1941_v5  ;;  %v1983_v55 = vmul.f32 %v6928_v23, %v6913_v44  ;;  %vm1988_vm4 = vweird.f32 %v6928_v23  ;;  %vm6976_vm5 = vmor %vm2341_vm2, %vm2342_vm1  ;;  %vm1973_vm6 = vweird.f32 %v6923_v28 }
 0x54a   : > { %v2338_v0 = vsub.f32 1.0, %v2337_v12  ;;  %v1977_v50 = vand.u32 2147483647, %v6923_v28  ;;  %vm7008_vm12 = vmor %vm1987_vm8, %vm1988_vm4  ;;  %v1980_v5 = vor.u32 1.1754944e-38, %v1979_v13  ;;  %v1748_v13 = vpop.f32.mrf.mxu2 }
 0x54b   : > { %v1943_v10 = vmul.f32 %v5280_v4, %v1942_v46  ;;  %v1984_v60 = vsub.f32 1.0, %v1983_v55  ;;  %v1994_v46 = vor.u32 1.1754944e-38, %v1993_v51 }
 0x54c   : > { %v2339_v9 = vmul.f32 %v6920_v63, %v2338_v0  ;;  %vm1978_vm14 = vcmp.eq.f32.partialorder %v1977_v50, 8.507059e+37 }
 0x54d   : > { %v1944_v39 = vadd.f32 %v5280_v4, %v1943_v10  ;;  %v1985_v40 = vmul.f32 %v6928_v23, %v1984_v60 }
 0x54e   : > { %v6946_v25 = vpop.eup %5285  ;;  %v2340_v34 = vadd.f32 %v6920_v63, %v2339_v9 }
 0x54f   : > { %v1969_v36 = vmul.f32 %v6946_v25, %v6923_v28  ;;  %v6950_v6 = vpop.xlane.xlu0 %2233  ;;  %v1948_v49 = vsel %vm1947_vm15, %v5280_v4, %v1944_v39  ;;  %vm1974_vm3 = vweird.f32 %v6946_v25  ;;  %v1986_v38 = vadd.f32 %v6928_v23, %v1985_v40 }
 0x550   : > { %5287 = vrcp.f32 %v6950_v6  ;;  %v1953_v62 = vsel %vm1950_vm0, %v1952_v54, %v1948_v49  ;;  %vm6994_vm11 = vmor %vm1973_vm6, %vm1974_vm3  ;;  %v2333_v31 = vand.u32 2147483648, %v6950_v6  ;;  %v2344_v52 = vsel %vm6976_vm5, %v6920_v63, %v2340_v34 }
 0x551   : > { %v1970_v7 = vsub.f32 1.0, %v1969_v36  ;;  %v2026_v58 = vmul.f32 %v6823_v35, %v1953_v62  ;;  %5289 = vrcp.f32 %v6952_v37  ;;  %v2331_v44 = vand.u32 2147483647, %v6950_v6 }
 0x552   : > { %v1990_v63 = vsel %vm7008_vm12, %v6928_v23, %v1986_v38  ;;  %vm2327_vm15 = vweird.f32 %v6950_v6  ;;  %vm1992_vm0 = vcmp.eq.f32.partialorder %v1991_v2, 8.507059e+37  ;;  %v2334_v10 = vor.u32 1.1754944e-38, %v2333_v31 }
 0x553   : > { %v1971_v24 = vmul.f32 %v6946_v25, %v1970_v7  ;;  %v2033_v18 = vpack.c.bf16 %v2027_v29, %v2026_v58  ;;  %v2349_v32 = vsel %vm6986_vm7, %v2348_v26, %v2344_v52  ;;  %vm2332_vm2 = vcmp.eq.f32.partialorder %v2331_v44, 8.507059e+37 }
 0x554   : > { %v1995_v59 = vsel %vm1992_vm0, %v1994_v46, %v1990_v63  ;;  %v2357_v36 = vmul.f32 %v6792_v57, %v2349_v32  ;;  %vm2001_vm7 = vweird.f32 %v6952_v37  ;;  %v4862_v46 = vld [vmem:[#allocation10 + $0x38] sm:$0xff] }
 0x555   : > { %v1972_v35 = vadd.f32 %v6946_v25, %v1971_v24  ;;  %4526 = vmatmul.msk.bf16.gmra.mxu0 %vm1183_vm10, %v2033_v18  ;;  %2608 = vmatpush.bf16.msra.mxu3 %v4862_v46 }
 0x556   : > { %v5288_v17 = vpop.eup %5287 }
 0x557   : > { %v2323_v8 = vmul.f32 %v5288_v17, %v6950_v6  ;;  %v6974_v30 = vpop.xlane.xlu0 %1910  ;;  %v6984_v47 = vpop.eup %5289  ;;  %v1976_v15 = vsel %vm6994_vm11, %v6946_v25, %v1972_v35  ;;  %vm2328_vm13 = vweird.f32 %v5288_v17  ;;  %v2029_v6 = vmul.f32 %v6799_v48, %v1995_v59  ;;  %v4858_v59 = vld [vmem:[#allocation10 + $0x18] sm:$0xff] }
 0x558   : > { %5291 = vrcp.f32 %v6974_v30  ;;  %v1997_v42 = vmul.f32 %v6984_v47, %v6952_v37  ;;  %v1981_v12 = vsel %vm1978_vm14, %v1980_v5, %v1976_v15  ;;  %vm2329_vm1 = vmor %vm2327_vm15, %vm2328_vm13  ;;  %v7023_v25 = vpop.f32.mrf.mxu0  ;;  %vm2002_vm4 = vweird.f32 %v6984_v47 }
 0x559   : > { %v2324_v22 = vsub.f32 1.0, %v2323_v8  ;;  %v2028_v23 = vmul.f32 %v6833_v21, %v1981_v12  ;;  %v2021_v21 = vand.u32 2147483648, %v6974_v30  ;;  %vm2015_vm5 = vweird.f32 %v6974_v30  ;;  %vm2003_vm8 = vmor %vm2001_vm7, %vm2002_vm4 }
 0x55a   : > { %v1998_v14 = vsub.f32 1.0, %v1997_v42  ;;  %v2019_v57 = vand.u32 2147483647, %v6974_v30  ;;  %v2007_v48 = vand.u32 2147483648, %v6952_v37  ;;  %vm2527_vm13 = vcmask 785408  }
 0x55b   : > { %v2325_v28 = vmul.f32 %v5288_v17, %v2324_v22  ;;  %v2034_v7 = vpack.c.bf16 %v2029_v6, %v2028_v23  ;;  %v2022_v24 = vor.u32 1.1754944e-38, %v2021_v21 }
 0x55c   : > { %v1999_v60 = vmul.f32 %v6984_v47, %v1998_v14  ;;  %vm2020_vm11 = vcmp.eq.f32.partialorder %v2019_v57, 8.507059e+37  ;;  %v2008_v18 = vor.u32 1.1754944e-38, %v2007_v48 }
 0x55d   : > { %v2326_v27 = vadd.f32 %v5288_v17, %v2325_v28 }
 0x55e   : > { %v5292_v45 = vpop.eup %5291  ;;  %v2000_v9 = vadd.f32 %v6984_v47, %v1999_v60 }
 0x55f   : > { %v2011_v55 = vmul.f32 %v5292_v45, %v6974_v30  ;;  %v2330_v41 = vsel %vm2329_vm1, %v5288_v17, %v2326_v27  ;;  %vm2016_vm3 = vweird.f32 %v5292_v45  ;;  %v1750_v30 = vpop.f32.mrf.mxu2 }
 0x560   : > { %v2335_v39 = vsel %vm2332_vm2, %v2334_v10, %v2330_v41  ;;  %vm2017_vm6 = vmor %vm2015_vm5, %vm2016_vm3  ;;  %v7039_v29 = vpop.f32.mrf.mxu0  ;;  %v2004_v40 = vsel %vm2003_vm8, %v6984_v47, %v2000_v9  ;;  %v5094_v22 = vpack.i.bf16 %v1750_v30, %v1748_v13  ;;  %v4860_v10 = vld [vmem:[#allocation10 + $0x28] sm:$0xff] }
 0x561   : > { %v2012_v0 = vsub.f32 1.0, %v2011_v55  ;;  %v2356_v54 = vmul.f32 %v6840_v61, %v2335_v39  ;;  %v2005_v61 = vand.u32 2147483647, %v6952_v37  ;;  %v4859_v55 = vld [vmem:[#allocation10 + $0x20] sm:$0xff]  ;;  %v4857_v39 = vld [vmem:[#allocation10 + $0x10] sm:$0xff] }
 0x563   : > { %v2013_v49 = vmul.f32 %v5292_v45, %v2012_v0  ;;  %v2361_v53 = vpack.c.bf16 %v2357_v36, %v2356_v54  ;;  %vm2006_vm12 = vcmp.eq.f32.partialorder %v2005_v61, 8.507059e+37  ;;  %v4856_v0 = vld [vmem:[#allocation10 + $0x8] sm:$0xff] }
 0x564   : > { %v2009_v17 = vsel %vm2006_vm12, %v2008_v18, %v2004_v40 }
 0x565   : > { %4536 = vmatmul.msk.bf16.gmra.mxu2 %vm1183_vm10, %v2361_v53  ;;  %v2014_v62 = vadd.f32 %v5292_v45, %v2013_v49  ;;  %4527 = vmatmul.msk.bf16.gmra.mxu0 %vm1183_vm10, %v2034_v7  ;;  %v2030_v35 = vmul.f32 %v6819_v16, %v2009_v17  ;;  %v4855_v49 = vld [vmem:[#allocation10] sm:$0xff] }
 0x567   : > { %v2018_v58 = vsel %vm2017_vm6, %v5292_v45, %v2014_v62  ;;  %v1753_v38 = vpop.f32.mrf.mxu2  ;;  %v4861_v45 = vld [vmem:[#allocation10 + $0x30] sm:$0xff] }
 0x568   : > { %v2023_v33 = vsel %vm2020_vm11, %v2022_v24, %v2018_v58  ;;  %v7044_v3 = vpop.f32.mrf.mxu0  ;;  %2609 = vmatpush.bf16.msra.mxu3 %v4861_v45 }
 0x569   : > { %v2031_v34 = vmul.f32 %v6844_v11, %v2023_v33 }
 0x56b   : > { %v2035_v37 = vpack.c.bf16 %v2031_v34, %v2030_v35 }
 0x56c   : > { %2610 = vmatpush.bf16.msra.mxu3 %v4860_v10 }
 0x56f   : > { %v1755_v47 = vpop.f32.mrf.mxu2 }
 0x570   : > { %v7047_v8 = vpop.f32.mrf.mxu0  ;;  %v5109_v31 = vpack.i.bf16 %v1755_v47, %v1753_v38  ;;  %2611 = vmatpush.bf16.msra.mxu3 %v4859_v55 }
 0x574   : > { %2612 = vmatpush.bf16.msra.mxu3 %v4858_v59 }
 0x575   : > { %4528 = vmatmul.msk.bf16.gmra.mxu0 %vm1183_vm10, %v2035_v37 }
 0x578   : > { %v7049_v56 = vpop.f32.mrf.mxu0  ;;  %2613 = vmatpush.bf16.msra.mxu3 %v4857_v39 }
 0x57c   : > { %2614 = vmatpush.bf16.msra.mxu3 %v4856_v0 }
 0x580   : > { %v7051_v50 = vpop.f32.mrf.mxu0  ;;  %2615 = vmatpush.bf16.msra.mxu3 %v4855_v49 }
 0x597   : > { %v5081_v62 = vpop.permute.xlu2 %5080 }
 0x598   : > { %v5083_v21 = vunpack.i.h.bf16 %v5081_v62  ;;  %v5082_v9 = vunpack.i.l.bf16 %v5081_v62 }
 0x599   : > { %v2069_v19 = vpop.f32.mrf.mxu0 }
 0x59a   : > { %v1758_v51 = vpop.f32.mrf.mxu2  ;;  %v2512_v24 = vsel %vm1121_vm9, %v6968_v1, %v5083_v21  ;;  %v2511_v40 = vsel %vm1121_vm9, %v6944_v43, %v5082_v9  ;;  %v5141_v9 = vld [vmem:[#allocation11] ss:$0 sm:$0xff] }
 0x5a1   : > { %v2071_v11 = vpop.f32.mrf.mxu0 }
 0x5a2   : > { %v5084_v20 = vpack.i.bf16 %v2071_v11, %v2069_v19  ;;  %v1760_v16 = vpop.f32.mrf.mxu2 }
 0x5a3   : > { %v5124_v36 = vpack.i.bf16 %v1760_v16, %v1758_v51 }
 0x5a4   : > { %5085 = vrot.lane.b32.xlu0 %v5084_v20, %s5814_s28 }
 0x5aa   : > { %v2395_v2 = vpop.f32.mrf.mxu2 }
 0x5ac   : > { %5095 = vrot.lane.b32.xlu0 %v5094_v22, %s5815_s16 }
 0x5b2   : > { %v2397_v15 = vpop.f32.mrf.mxu2 }
 0x5b3   : > { %v5089_v52 = vpack.i.bf16 %v2397_v15, %v2395_v2 }
 0x5b4   : > { %5110 = vrot.lane.b32.xlu0 %v5109_v31, %s5815_s16 }
 0x5b5   : > { %5090 = vrot.lane.b32.xlu2 %v5089_v52, %s5813_s17 }
 0x5ba   : > { %v2400_v4 = vpop.f32.mrf.mxu2 }
 0x5c2   : > { %v2402_v5 = vpop.f32.mrf.mxu2 }
 0x5c3   : > { %v5104_v28 = vpack.i.bf16 %v2402_v5, %v2400_v4 }
 0x5c5   : > { %5105 = vrot.lane.b32.xlu1 %v5104_v28, %s5813_s17 }
 0x5ca   : > { %v2405_v44 = vpop.f32.mrf.mxu2 }
 0x5d2   : > { %v2407_v26 = vpop.f32.mrf.mxu2  ;;  %v2074_v42 = vpop.f32.mrf.mxu0 }
 0x5d3   : > { %v5119_v63 = vpack.i.bf16 %v2407_v26, %v2405_v44 }
 0x5d5   : > { %5120 = vrot.lane.b32.xlu0 %v5119_v63, %s5813_s17 }
 0x5da   : > { %v2076_v27 = vpop.f32.mrf.mxu0 }
 0x5db   : > { %v5099_v12 = vpack.i.bf16 %v2076_v27, %v2074_v42 }
 0x5dd   : > { %5100 = vrot.lane.b32.xlu2 %v5099_v12, %s5814_s28 }
 0x5e2   : > { %v2079_v32 = vpop.f32.mrf.mxu0 }
 0x5e8   : > { %v2410_v23 = vpop.f32.mrf.mxu2 }
 0x5ea   : > { %v2081_v41 = vpop.f32.mrf.mxu0 }
 0x5eb   : > { %v5114_v14 = vpack.i.bf16 %v2081_v41, %v2079_v32 }
 0x5ed   : > { %5115 = vrot.lane.b32.xlu2 %v5114_v14, %s5814_s28 }
 0x5f0   : > { %v2412_v6 = vpop.f32.mrf.mxu2 }
 0x5f1   : > { %v5134_v60 = vpack.i.bf16 %v2412_v6, %v2410_v23 }
 0x5f2   : > { %v2084_v54 = vpop.f32.mrf.mxu0 }
 0x5f5   : > { %5125 = vrot.lane.b32.xlu2 %v5124_v36, %s5815_s16 }
 0x5fa   : > { %v2086_v53 = vpop.f32.mrf.mxu0 }
 0x5fb   : > { %v5129_v7 = vpack.i.bf16 %v2086_v53, %v2084_v54 }
 0x5fd   : > { %5135 = vrot.lane.b32.xlu2 %v5134_v60, %s5813_s17  ;;  %5130 = vrot.lane.b32.xlu0 %v5129_v7, %s5814_s28  ;;  %s7745_s17 = sld [smem:[#allocation44_spill]]  ;;  %s7568_s28 = scalar_lea.vmem [#allocation19], %s4398_s5 }
 0x5fe   : > { %s4927_s5 = sshll.u32 %s5922_s25, 6  ;;  %s4220_s22 = sshll.u32 %s7568_s28, 4  ;;  %s4221_s22 = int_to_ptr.vmem [resolvable:$true] %s4220_s22 }
 0x60f   : > { %v5091_v57 = vpop.permute.xlu2 %5090 }
 0x610   : > { %v5093_v18 = vunpack.i.h.bf16 %v5091_v57  ;;  %v5092_v33 = vunpack.i.l.bf16 %v5091_v57 }
 0x616   : > { %v5086_v48 = vpop.permute.xlu0 %5085 }
 0x617   : > { %v5088_v61 = vunpack.i.h.bf16 %v5086_v48  ;;  %v5087_v58 = vunpack.i.l.bf16 %v5086_v48 }
 0x619   : > { %v2520_v17 = vsel %vm1183_vm10, %v2512_v24, %v5088_v61  ;;  %v2519_v34 = vsel %vm1183_vm10, %v2511_v40, %v5087_v58  ;;  %v7733_v61 = vld [vmem:[#allocation29_spill] sm:$0xff]  ;;  %v7734_v24 = vld [vmem:[#allocation28_spill] sm:$0xff] }
 0x61a   : > { %v2528_v35 = vsel %vm2527_vm13, %v2519_v34, %v5092_v33  ;;  %v2529_v13 = vsel %vm2527_vm13, %v2520_v17, %v5093_v18  ;;  %v7735_v17 = vld [vmem:[#allocation30_spill] sm:$0xff] }
 0x61b   : > { %v2552_v37 = vpack.c.bf16 %v2529_v13, %v2528_v35 }
 0x61d   : > { %2616 = vmatmul.bf16.vlgmr.msra.gmra.mxu3 %v2552_v37  ;;  %v7736_v37 = vld [vmem:[#allocation31_spill] sm:$0xff] }
 0x61e   : > { %v5096_v30 = vpop.permute.xlu0 %5095 }
 0x61f   : > { %v5098_v38 = vunpack.i.h.bf16 %v5096_v30  ;;  %v5097_v47 = vunpack.i.l.bf16 %v5096_v30 }
 0x621   : > { %v2514_v16 = vsel %vm1121_vm9, %v7039_v29, %v5098_v38  ;;  %v2513_v22 = vsel %vm1121_vm9, %v7023_v25, %v5097_v47 }
 0x626   : > { %v5111_v5 = vpop.permute.xlu0 %5110 }
 0x627   : > { %v5113_v28 = vunpack.i.h.bf16 %v5111_v5  ;;  %v5112_v44 = vunpack.i.l.bf16 %v5111_v5 }
 0x629   : > { %v2516_v25 = vsel %vm1121_vm9, %v7047_v8, %v5113_v28  ;;  %v2515_v12 = vsel %vm1121_vm9, %v7044_v3, %v5112_v44 }
 0x637   : > { %v5106_v19 = vpop.permute.xlu1 %5105  ;;  %v5101_v11 = vpop.permute.xlu2 %5100 }
 0x638   : > { %v5108_v1 = vunpack.i.h.bf16 %v5106_v19  ;;  %v5107_v51 = vunpack.i.l.bf16 %v5106_v19  ;;  %v5103_v43 = vunpack.i.h.bf16 %v5101_v11  ;;  %v5102_v20 = vunpack.i.l.bf16 %v5101_v11  ;;  %v7737_v19 = vld [vmem:[#allocation33_spill] sm:$0xff] }
 0x63a   : > { %v2521_v2 = vsel %vm1183_vm10, %v2513_v22, %v5102_v20  ;;  %v2522_v31 = vsel %vm1183_vm10, %v2514_v16, %v5103_v43  ;;  %v7738_v43 = vld [vmem:[#allocation32_spill] sm:$0xff] }
 0x63b   : > { %v2530_v15 = vsel %vm2527_vm13, %v2521_v2, %v5107_v51  ;;  %v2531_v52 = vsel %vm2527_vm13, %v2522_v31, %v5108_v1  ;;  %v7739_v2 = vld [vmem:[#allocation34_spill] sm:$0xff] }
 0x63c   : > { %v2553_v4 = vpack.c.bf16 %v2531_v52, %v2530_v15  ;;  %v7740_v52 = vld [vmem:[#allocation27_spill] sm:$0xff] }
 0x63e   : > { %2621 = vmatmul.bf16.gmra.mxu3 %v2553_v4 }
 0x647   : > { %v5121_v26 = vpop.permute.xlu0 %5120  ;;  %v5116_v42 = vpop.permute.xlu2 %5115 }
 0x648   : > { %v5123_v63 = vunpack.i.h.bf16 %v5121_v26  ;;  %v5122_v29 = vunpack.i.l.bf16 %v5121_v26  ;;  %v5118_v46 = vunpack.i.h.bf16 %v5116_v42  ;;  %v5117_v27 = vunpack.i.l.bf16 %v5116_v42 }
 0x64a   : > { %v2523_v45 = vsel %vm1183_vm10, %v2515_v12, %v5117_v27  ;;  %v2524_v10 = vsel %vm1183_vm10, %v2516_v25, %v5118_v46  ;;  %v7741_v27 = vld [vmem:[#allocation35_spill] sm:$0xff] }
 0x64b   : > { %v2532_v32 = vsel %vm2527_vm13, %v2523_v45, %v5122_v29  ;;  %v2533_v55 = vsel %vm2527_vm13, %v2524_v10, %v5123_v63 }
 0x64c   : > { %v2554_v59 = vpack.c.bf16 %v2533_v55, %v2532_v32 }
 0x64e   : > { %2626 = vmatmul.bf16.gmra.mxu3 %v2554_v59 }
 0x64f   : > { %v5126_v41 = vpop.permute.xlu2 %5125 }
 0x650   : > { %v5128_v14 = vunpack.i.h.bf16 %v5126_v41  ;;  %v5127_v23 = vunpack.i.l.bf16 %v5126_v41 }
 0x652   : > { %v2518_v3 = vsel %vm1121_vm9, %v7051_v50, %v5128_v14  ;;  %v2517_v36 = vsel %vm1121_vm9, %v7049_v56, %v5127_v23 }
 0x657   : > { %v5136_v39 = vpop.permute.xlu2 %5135 }
 0x658   : > { %v5138_v6 = vunpack.i.h.bf16 %v5136_v39  ;;  %v5137_v49 = vunpack.i.l.bf16 %v5136_v39 }
 0x66f   : > { %v5131_v0 = vpop.permute.xlu0 %5130 }
 0x670   : > { %v5133_v54 = vunpack.i.h.bf16 %v5131_v0  ;;  %v5132_v8 = vunpack.i.l.bf16 %v5131_v0 }
 0x672   : > { %v2525_v53 = vsel %vm1183_vm10, %v2517_v36, %v5132_v8  ;;  %v2526_v60 = vsel %vm1183_vm10, %v2518_v3, %v5133_v54 }
 0x673   : > { %v2534_v7 = vsel %vm2527_vm13, %v2525_v53, %v5137_v49  ;;  %v2535_v62 = vsel %vm2527_vm13, %v2526_v60, %v5138_v6 }
 0x674   : > { %v2555_v21 = vpack.c.bf16 %v2535_v62, %v2534_v7 }
 0x676   : > { %2631 = vmatmul.bf16.gmra.mxu3 %v2555_v21 }
 0x6a0   : > { %v2617_v57 = vpop.f32.mrf.mxu3 }
 0x6a1   : > { %v2618_v48 = vadd.f32 %v5141_v9, %v2617_v57 }
 0x6a3   : > { %v2637_v50 = vadd.f32 %v2618_v48, %v7733_v61 }
 0x6a5   : > { %2647 = vadd.xlane.f32.xlu1 %v2637_v50 }
 0x6a8   : > { %v2619_v58 = vpop.f32.mrf.mxu3 }
 0x6a9   : > { %v2620_v56 = vadd.f32 %v5141_v9, %v2619_v58 }
 0x6ab   : > { %v2638_v40 = vadd.f32 %v2620_v56, %v7734_v24 }
 0x6ad   : > { %2649 = vadd.xlane.f32.xlu0 %v2638_v40 }
 0x6c1   : > { %v2622_v18 = vpop.f32.mrf.mxu3 }
 0x6c2   : > { %v2623_v33 = vadd.f32 %v5141_v9, %v2622_v18 }
 0x6c4   : > { %v2639_v34 = vadd.f32 %v2623_v33, %v7735_v17 }
 0x6c6   : > { %2651 = vadd.xlane.f32.xlu2 %v2639_v34 }
 0x6c9   : > { %v2624_v35 = vpop.f32.mrf.mxu3 }
 0x6ca   : > { %v2625_v13 = vadd.f32 %v5141_v9, %v2624_v35 }
 0x6cc   : > { %v2640_v30 = vadd.f32 %v2625_v13, %v7736_v37 }
 0x6ce   : > { %2653 = vadd.xlane.f32.xlu1 %v2640_v30 }
 0x6d1   : > { %v2627_v38 = vpop.f32.mrf.mxu3 }
 0x6d2   : > { %v2628_v47 = vadd.f32 %v5141_v9, %v2627_v38 }
 0x6d4   : > { %v2641_v1 = vadd.f32 %v2628_v47, %v7737_v19 }
 0x6d6   : > { %2655 = vadd.xlane.f32.xlu0 %v2641_v1 }
 0x6d9   : > { %v2629_v51 = vpop.f32.mrf.mxu3 }
 0x6da   : > { %v2630_v11 = vadd.f32 %v5141_v9, %v2629_v51 }
 0x6dc   : > { %v2642_v20 = vadd.f32 %v2630_v11, %v7738_v43 }
 0x6de   : > { %2657 = vadd.xlane.f32.xlu2 %v2642_v20 }
 0x6f9   : > { %v2632_v16 = vpop.f32.mrf.mxu3 }
 0x6fa   : > { %v2633_v22 = vadd.f32 %v5141_v9, %v2632_v16 }
 0x6fc   : > { %v2643_v31 = vadd.f32 %v2633_v22, %v7739_v2 }
 0x6fe   : > { %2659 = vadd.xlane.f32.xlu2 %v2643_v31 }
 0x701   : > { %v2634_v44 = vpop.f32.mrf.mxu3 }
 0x702   : > { %v2635_v42 = vadd.f32 %v5141_v9, %v2634_v44 }
 0x704   : > { %v2644_v25 = vadd.f32 %v2635_v42, %v7741_v27 }
 0x718   : > { %v2648_v15 = vpop.xlane.xlu1 %2647 }
 0x719   : > { %v2663_v4 = vmul.f32 %v2648_v15, %v7740_v52 }
 0x71b   : > { %v7104_v5 = vsub.f32 %v2637_v50, %v2663_v4 }
 0x71d   : > { %v2679_v28 = vmul.f32 %v7104_v5, %v7104_v5 }
 0x71f   : > { %2687 = vadd.xlane.f32.xlu1 %v2679_v28 }
 0x720   : > { %v2650_v26 = vpop.xlane.xlu0 %2649 }
 0x721   : > { %v2664_v63 = vmul.f32 %v2650_v26, %v7740_v52 }
 0x723   : > { %v7109_v29 = vsub.f32 %v2638_v40, %v2664_v63 }
 0x725   : > { %v2680_v46 = vmul.f32 %v7109_v29, %v7109_v29 }
 0x727   : > { %2689 = vadd.xlane.f32.xlu0 %v2680_v46  ;;  %2661 = vadd.xlane.f32.xlu1 %v2644_v25 }
 0x739   : > { %v2652_v12 = vpop.xlane.xlu2 %2651 }
 0x73a   : > { %v2665_v45 = vmul.f32 %v2652_v12, %v7740_v52 }
 0x73c   : > { %v7115_v10 = vsub.f32 %v2639_v34, %v2665_v45 }
 0x73e   : > { %v2681_v32 = vmul.f32 %v7115_v10, %v7115_v10 }
 0x740   : > { %2691 = vadd.xlane.f32.xlu0 %v2681_v32 }
 0x741   : > { %v2654_v55 = vpop.xlane.xlu1 %2653 }
 0x742   : > { %v2666_v59 = vmul.f32 %v2654_v55, %v7740_v52 }
 0x744   : > { %v7120_v41 = vsub.f32 %v2640_v30, %v2666_v59  ;;  %v7146_v30 = vld [vmem:[#allocation13] ss:$0 sm:$0xff] }
 0x746   : > { %v2682_v14 = vmul.f32 %v7120_v41, %v7120_v41 }
 0x748   : > { %2693 = vadd.xlane.f32.xlu2 %v2682_v14 }
 0x749   : > { %v2656_v23 = vpop.xlane.xlu0 %2655 }
 0x74a   : > { %v2667_v39 = vmul.f32 %v2656_v23, %v7740_v52 }
 0x74c   : > { %v7125_v0 = vsub.f32 %v2641_v1, %v2667_v39  ;;  %v7149_v1 = vld [vmem:[#allocation14] ss:$0 sm:$0xff] }
 0x74e   : > { %v2683_v54 = vmul.f32 %v7125_v0, %v7125_v0 }
 0x750   : > { %2695 = vadd.xlane.f32.xlu1 %v2683_v54 }
 0x751   : > { %v2658_v8 = vpop.xlane.xlu2 %2657 }
 0x752   : > { %v2668_v3 = vmul.f32 %v2658_v8, %v7740_v52 }
 0x754   : > { %v7130_v36 = vsub.f32 %v2642_v20, %v2668_v3 }
 0x756   : > { %v2684_v6 = vmul.f32 %v7130_v36, %v7130_v36 }
 0x758   : > { %2697 = vadd.xlane.f32.xlu0 %v2684_v6 }
 0x771   : > { %v2660_v49 = vpop.xlane.xlu2 %2659 }
 0x772   : > { %v2669_v53 = vmul.f32 %v2660_v49, %v7740_v52 }
 0x774   : > { %v7135_v60 = vsub.f32 %v2643_v31, %v2669_v53 }
 0x776   : > { %v2685_v7 = vmul.f32 %v7135_v60, %v7135_v60 }
 0x778   : > { %2699 = vadd.xlane.f32.xlu2 %v2685_v7 }
 0x792   : > { %v2688_v62 = vpop.xlane.xlu1 %2687 }
 0x793   : > { %v2703_v21 = vmul.f32 %v2688_v62, %v7740_v52 }
 0x795   : > { %v2711_v9 = vadd.f32 1e-12, %v2703_v21 }
 0x797   : > { %5293 = vrsqrt.f32 %v2711_v9  ;;  %vm2725_vm10 = vweird.f32 %v2711_v9 }
 0x79a   : > { %v2690_v57 = vpop.xlane.xlu0 %2689  ;;  %v2662_v48 = vpop.xlane.xlu1 %2661 }
 0x79b   : > { %v2704_v61 = vmul.f32 %v2690_v57, %v7740_v52  ;;  %v2670_v50 = vmul.f32 %v2662_v48, %v7740_v52 }
 0x79d   : > { %v5294_v58 = vpop.eup %5293  ;;  %v2712_v56 = vadd.f32 1e-12, %v2704_v61  ;;  %v7142_v24 = vsub.f32 %v2644_v25, %v2670_v50 }
 0x79e   : > { %v2720_v40 = vmul.f32 %v5294_v58, %v2711_v9  ;;  %vm2726_vm9 = vweird.f32 %v5294_v58 }
 0x79f   : > { %5295 = vrsqrt.f32 %v2712_v56  ;;  %v2686_v18 = vmul.f32 %v7142_v24, %v7142_v24  ;;  %vm2727_vm14 = vmor %vm2725_vm10, %vm2726_vm9  ;;  %vm2735_vm0 = vweird.f32 %v2712_v56 }
 0x7a0   : > { %v2721_v33 = vmul.f32 %v5294_v58, %v2720_v40 }
 0x7a1   : > { %2701 = vadd.xlane.f32.xlu1 %v2686_v18 }
 0x7a2   : > { %v2722_v17 = vmul.f32 0.5, %v2721_v33 }
 0x7a4   : > { %v2723_v34 = vsub.f32 1.5, %v2722_v17 }
 0x7a5   : > { %v5296_v35 = vpop.eup %5295 }
 0x7a6   : > { %v2724_v13 = vmul.f32 %v5294_v58, %v2723_v34  ;;  %v2730_v37 = vmul.f32 %v5296_v35, %v2712_v56  ;;  %vm2736_vm15 = vweird.f32 %v5296_v35 }
 0x7a7   : > { %vm2737_vm1 = vmor %vm2735_vm0, %vm2736_vm15 }
 0x7a8   : > { %v2728_v38 = vsel %vm2727_vm14, %v5294_v58, %v2724_v13  ;;  %v2731_v47 = vmul.f32 %v5296_v35, %v2730_v37 }
 0x7a9   : > { %v2799_v19 = vmul.f32 %v2728_v38, %v7104_v5 }
 0x7aa   : > { %v2732_v51 = vmul.f32 0.5, %v2731_v47 }
 0x7ab   : > { %v2810_v11 = vmul.f32 %v7146_v30, %v2799_v19 }
 0x7ac   : > { %v2733_v43 = vsub.f32 1.5, %v2732_v51 }
 0x7ad   : > { %v7153_v20 = vadd.f32 %v7149_v1, %v2810_v11 }
 0x7ae   : > { %v2734_v16 = vmul.f32 %v5296_v35, %v2733_v43 }
 0x7af   : > { %2829 = vadd.xlane.f32.xlu0 %v7153_v20 }
 0x7b0   : > { %v2738_v22 = vsel %vm2737_vm1, %v5296_v35, %v2734_v16 }
 0x7b1   : > { %v2800_v2 = vmul.f32 %v2738_v22, %v7109_v29 }
 0x7b3   : > { %v2811_v31 = vmul.f32 %v7146_v30, %v2800_v2  ;;  %v2692_v15 = vpop.xlane.xlu0 %2691 }
 0x7b4   : > { %v2705_v4 = vmul.f32 %v2692_v15, %v7740_v52 }
 0x7b5   : > { %v7160_v5 = vadd.f32 %v7149_v1, %v2811_v31 }
 0x7b6   : > { %v2713_v28 = vadd.f32 1e-12, %v2705_v4 }
 0x7b7   : > { %2831 = vadd.xlane.f32.xlu2 %v7160_v5 }
 0x7b8   : > { %5297 = vrsqrt.f32 %v2713_v28  ;;  %vm2745_vm3 = vweird.f32 %v2713_v28 }
 0x7bb   : > { %v2694_v44 = vpop.xlane.xlu2 %2693 }
 0x7bc   : > { %v2706_v26 = vmul.f32 %v2694_v44, %v7740_v52 }
 0x7be   : > { %v5298_v42 = vpop.eup %5297  ;;  %v2714_v63 = vadd.f32 1e-12, %v2706_v26 }
 0x7bf   : > { %v2740_v46 = vmul.f32 %v5298_v42, %v2713_v28  ;;  %vm2746_vm2 = vweird.f32 %v5298_v42 }
 0x7c0   : > { %5299 = vrsqrt.f32 %v2714_v63  ;;  %vm2747_vm4 = vmor %vm2745_vm3, %vm2746_vm2  ;;  %vm2755_vm6 = vweird.f32 %v2714_v63 }
 0x7c1   : > { %v2741_v29 = vmul.f32 %v5298_v42, %v2740_v46 }
 0x7c3   : > { %v2742_v27 = vmul.f32 0.5, %v2741_v29  ;;  %v2696_v25 = vpop.xlane.xlu1 %2695 }
 0x7c4   : > { %v2707_v12 = vmul.f32 %v2696_v25, %v7740_v52 }
 0x7c5   : > { %v2743_v45 = vsub.f32 1.5, %v2742_v27 }
 0x7c6   : > { %v5300_v32 = vpop.eup %5299  ;;  %v2715_v55 = vadd.f32 1e-12, %v2707_v12 }
 0x7c7   : > { %v2744_v59 = vmul.f32 %v5298_v42, %v2743_v45  ;;  %v2750_v14 = vmul.f32 %v5300_v32, %v2714_v63  ;;  %vm2756_vm5 = vweird.f32 %v5300_v32 }
 0x7c8   : > { %5301 = vrsqrt.f32 %v2715_v55  ;;  %vm2757_vm7 = vmor %vm2755_vm6, %vm2756_vm5  ;;  %vm2765_vm11 = vweird.f32 %v2715_v55 }
 0x7c9   : > { %v2751_v23 = vmul.f32 %v5300_v32, %v2750_v14  ;;  %v2748_v39 = vsel %vm2747_vm4, %v5298_v42, %v2744_v59 }
 0x7ca   : > { %v2801_v54 = vmul.f32 %v2748_v39, %v7115_v10 }
 0x7cb   : > { %v2752_v8 = vmul.f32 0.5, %v2751_v23  ;;  %v2698_v3 = vpop.xlane.xlu0 %2697 }
 0x7cc   : > { %v2708_v6 = vmul.f32 %v2698_v3, %v7740_v52  ;;  %v2812_v49 = vmul.f32 %v7146_v30, %v2801_v54 }
 0x7cd   : > { %v2753_v53 = vsub.f32 1.5, %v2752_v8 }
 0x7ce   : > { %v5302_v7 = vpop.eup %5301  ;;  %v2716_v62 = vadd.f32 1e-12, %v2708_v6  ;;  %v7169_v21 = vadd.f32 %v7149_v1, %v2812_v49 }
 0x7cf   : > { %v2754_v9 = vmul.f32 %v5300_v32, %v2753_v53  ;;  %v2760_v57 = vmul.f32 %v5302_v7, %v2715_v55  ;;  %vm2766_vm8 = vweird.f32 %v5302_v7 }
 0x7d0   : > { %5303 = vrsqrt.f32 %v2716_v62  ;;  %2833 = vadd.xlane.f32.xlu1 %v7169_v21  ;;  %vm2767_vm12 = vmor %vm2765_vm11, %vm2766_vm8  ;;  %vm2775_vm9 = vweird.f32 %v2716_v62 }
 0x7d1   : > { %v2758_v10 = vsel %vm2757_vm7, %v5300_v32, %v2754_v9  ;;  %v2761_v48 = vmul.f32 %v5302_v7, %v2760_v57 }
 0x7d2   : > { %v2802_v61 = vmul.f32 %v2758_v10, %v7120_v41 }
 0x7d3   : > { %v2762_v50 = vmul.f32 0.5, %v2761_v48 }
 0x7d4   : > { %v2813_v58 = vmul.f32 %v7146_v30, %v2802_v61 }
 0x7d5   : > { %v2763_v56 = vsub.f32 1.5, %v2762_v50 }
 0x7d6   : > { %v5304_v40 = vpop.eup %5303  ;;  %v7175_v18 = vadd.f32 %v7149_v1, %v2813_v58 }
 0x7d7   : > { %v2764_v33 = vmul.f32 %v5302_v7, %v2763_v56  ;;  %v2770_v17 = vmul.f32 %v5304_v40, %v2716_v62  ;;  %vm2776_vm13 = vweird.f32 %v5304_v40 }
 0x7d8   : > { %2835 = vadd.xlane.f32.xlu0 %v7175_v18  ;;  %vm2777_vm10 = vmor %vm2775_vm9, %vm2776_vm13 }
 0x7d9   : > { %v2768_v34 = vsel %vm2767_vm12, %v5302_v7, %v2764_v33  ;;  %v2771_v35 = vmul.f32 %v5304_v40, %v2770_v17 }
 0x7da   : > { %v2803_v13 = vmul.f32 %v2768_v34, %v7125_v0 }
 0x7db   : > { %v2772_v41 = vmul.f32 0.5, %v2771_v35 }
 0x7dc   : > { %v2814_v37 = vmul.f32 %v7146_v30, %v2803_v13 }
 0x7dd   : > { %v2773_v38 = vsub.f32 1.5, %v2772_v41  ;;  %v4683_v41 = vld [vmem:[#allocation16 + $0xe0] sm:$0xf] }
 0x7de   : > { %v7181_v47 = vadd.f32 %v7149_v1, %v2814_v37  ;;  %v4893_v37 = vld [vmem:[#allocation16 + $0xec] sm:$0xf0] }
 0x7df   : > { %v2774_v19 = vmul.f32 %v5304_v40, %v2773_v38  ;;  %v4891_v38 = vld [vmem:[#allocation16 + $0xe4] sm:$0xf] }
 0x7e0   : > { %2837 = vadd.xlane.f32.xlu2 %v7181_v47 }
 0x7e1   : > { %v2778_v51 = vsel %vm2777_vm10, %v5304_v40, %v2774_v19  ;;  %v4685_v19 = vld [vmem:[#allocation16 + $0xf0] sm:$0xf0] }
 0x7e2   : > { %v2804_v11 = vmul.f32 %v2778_v51, %v7130_v36  ;;  %v4691_v51 = vld [vmem:[#allocation16 + $0xe8] sm:$0xf] }
 0x7e4   : > { %v2815_v43 = vmul.f32 %v7146_v30, %v2804_v11  ;;  %v4894_v11 = vld [vmem:[#allocation16 + $0xf4] sm:$0xf0] }
 0x7e6   : > { %v7187_v0 = vadd.f32 %v7149_v1, %v2815_v43  ;;  %v4688_v43 = vor.u32 %v4891_v38, %v4685_v19  ;;  %v4876_v38 = vld [vmem:[#allocation16 + $0x6c] sm:$0xf] }
 0x7e8   : > { %2839 = vadd.xlane.f32.xlu1 %v7187_v0  ;;  %3240 = vmatpush.bf16.msrb.mxu1 %v4688_v43  ;;  %v4871_v43 = vld [vmem:[#allocation16 + $0x44] sm:$0xf] }
 0x7eb   : > { %v2700_v16 = vpop.xlane.xlu2 %2699 }
 0x7ec   : > { %v2709_v22 = vmul.f32 %v2700_v16, %v7740_v52  ;;  %v4892_v16 = vld [vmem:[#allocation16 + $0xec] sm:$0xf] }
 0x7ee   : > { %v2717_v2 = vadd.f32 1e-12, %v2709_v22  ;;  %v4693_v22 = vld [vmem:[#allocation16 + $0xf8] sm:$0xf0] }
 0x7f0   : > { %5305 = vrsqrt.f32 %v2717_v2  ;;  %vm2785_vm15 = vweird.f32 %v2717_v2 }
 0x7f6   : > { %v5306_v31 = vpop.eup %5305 }
 0x7f7   : > { %v2780_v15 = vmul.f32 %v5306_v31, %v2717_v2  ;;  %vm2786_vm14 = vweird.f32 %v5306_v31  ;;  %v4696_v2 = vor.u32 %v4892_v16, %v4693_v22  ;;  %v4605_v16 = vld [vmem:[#allocation16 + $0x50] sm:$0xf0]  ;;  %v4611_v22 = vld [vmem:[#allocation16 + $0x48] sm:$0xf] }
 0x7f8   : > { %vm2787_vm0 = vmor %vm2785_vm15, %vm2786_vm14 }
 0x7f9   : > { %v2781_v4 = vmul.f32 %v5306_v31, %v2780_v15  ;;  %v4889_v15 = vld [vmem:[#allocation16 + $0xcc] sm:$0xf0]  ;;  %3298 = vmatpush.bf16.msrb.mxu3 %v4696_v2  ;;  %v4874_v2 = vld [vmem:[#allocation16 + $0x54] sm:$0xf0] }
 0x7fb   : > { %v2782_v28 = vmul.f32 0.5, %v2781_v4  ;;  %v4887_v4 = vld [vmem:[#allocation16 + $0xc4] sm:$0xf] }
 0x7fd   : > { %v2783_v44 = vsub.f32 1.5, %v2782_v28 }
 0x7ff   : > { %v2784_v26 = vmul.f32 %v5306_v31, %v2783_v44  ;;  %v4669_v44 = vld [vmem:[#allocation16 + $0xd0] sm:$0xf0] }
 0x801   : > { %v2788_v36 = vsel %vm2787_vm0, %v5306_v31, %v2784_v26  ;;  %v4667_v31 = vld [vmem:[#allocation16 + $0xc0] sm:$0xf]  ;;  %v4675_v26 = vld [vmem:[#allocation16 + $0xc8] sm:$0xf] }
 0x802   : > { %v2805_v42 = vmul.f32 %v2788_v36, %v7135_v60  ;;  %v4668_v28 = vor.u32 %v4889_v15, %v4667_v31  ;;  %v4890_v36 = vld [vmem:[#allocation16 + $0xd4] sm:$0xf0]  ;;  %v4608_v31 = vor.u32 %v4871_v43, %v4605_v16  ;;  %v4612_v15 = vor.u32 %v4874_v2, %v4611_v22  ;;  %v7251_v22 = vld [vmem:[#allocation5] ss:$0 sm:$0xff] }
 0x804   : > { %v2816_v63 = vmul.f32 %v7146_v30, %v2805_v42  ;;  %v4672_v42 = vor.u32 %v4887_v4, %v4669_v44  ;;  %v4872_v4 = vld [vmem:[#allocation16 + $0x4c] sm:$0xf] }
 0x806   : > { %v2827_v46 = vadd.f32 %v7149_v1, %v2816_v63  ;;  %v4676_v63 = vor.u32 %v4890_v36, %v4675_v26  ;;  %3241 = vmatpush.bf16.msrb.mxu1 %v4672_v42  ;;  %v4587_v26 = vld [vmem:[#allocation16 + $0x20] sm:$0xf]  ;;  %v4869_v36 = vld [vmem:[#allocation16 + $0x2c] sm:$0xf0]  ;;  %v4867_v42 = vld [vmem:[#allocation16 + $0x24] sm:$0xf] }
 0x808   : > { %2841 = vadd.xlane.f32.xlu1 %v2827_v46 }
 0x814   : > { %v2702_v29 = vpop.xlane.xlu1 %2701 }
 0x815   : > { %v2710_v27 = vmul.f32 %v2702_v29, %v7740_v52  ;;  %v4677_v29 = vld [vmem:[#allocation16 + $0xd8] sm:$0xf0] }
 0x817   : > { %v2718_v25 = vadd.f32 1e-12, %v2710_v27 }
 0x819   : > { %5307 = vrsqrt.f32 %v2718_v25  ;;  %vm2795_vm2 = vweird.f32 %v2718_v25 }
 0x81f   : > { %v5308_v12 = vpop.eup %5307 }
 0x820   : > { %v2790_v45 = vmul.f32 %v5308_v12, %v2718_v25  ;;  %vm2796_vm1 = vweird.f32 %v5308_v12  ;;  %v4651_v25 = vld [vmem:[#allocation16 + $0xa0] sm:$0xf] }
 0x821   : > { %vm2797_vm3 = vmor %vm2795_vm2, %vm2796_vm1 }
 0x822   : > { %v2791_v32 = vmul.f32 %v5308_v12, %v2790_v45  ;;  %v2830_v55 = vpop.xlane.xlu0 %2829  ;;  %v4883_v45 = vld [vmem:[#allocation16 + $0xa4] sm:$0xf] }
 0x823   : > { %v2845_v59 = vmul.f32 %v2830_v55, %v7740_v52  ;;  %v4653_v55 = vld [vmem:[#allocation16 + $0xb0] sm:$0xf0] }
 0x824   : > { %v2792_v14 = vmul.f32 0.5, %v2791_v32 }
 0x825   : > { %v7197_v23 = vsub.f32 %v7153_v20, %v2845_v59  ;;  %v4659_v59 = vld [vmem:[#allocation16 + $0xa8] sm:$0xf] }
 0x826   : > { %v2793_v60 = vsub.f32 1.5, %v2792_v14  ;;  %v4886_v14 = vld [vmem:[#allocation16 + $0xb4] sm:$0xf0] }
 0x827   : > { %v2861_v39 = vmul.f32 %v7197_v23, %v7197_v23 }
 0x828   : > { %v2794_v54 = vmul.f32 %v5308_v12, %v2793_v60  ;;  %v4656_v60 = vor.u32 %v4883_v45, %v4653_v55  ;;  %v4868_v55 = vld [vmem:[#allocation16 + $0x2c] sm:$0xf] }
 0x829   : > { %2869 = vadd.xlane.f32.xlu0 %v2861_v39  ;;  %v4660_v39 = vor.u32 %v4886_v14, %v4659_v59  ;;  %v4597_v59 = vld [vmem:[#allocation16 + $0x38] sm:$0xf0] }
 0x82a   : > { %v2798_v8 = vsel %vm2797_vm3, %v5308_v12, %v2794_v54  ;;  %v2832_v3 = vpop.xlane.xlu2 %2831  ;;  %v4885_v12 = vld [vmem:[#allocation16 + $0xac] sm:$0xf0]  ;;  %v4884_v54 = vld [vmem:[#allocation16 + $0xac] sm:$0xf]  ;;  %3242 = vmatpush.bf16.msrb.mxu1 %v4656_v60  ;;  %v4600_v14 = vor.u32 %v4868_v55, %v4597_v59 }
 0x82b   : > { %v2846_v6 = vmul.f32 %v2832_v3, %v7740_v52  ;;  %v2806_v49 = vmul.f32 %v2798_v8, %v7142_v24  ;;  %v4652_v32 = vor.u32 %v4885_v12, %v4651_v25  ;;  %v4661_v8 = vld [vmem:[#allocation16 + $0xb8] sm:$0xf0]  ;;  %v4870_v25 = vld [vmem:[#allocation16 + $0x34] sm:$0xf0] }
 0x82c   : > { %v4664_v3 = vor.u32 %v4884_v54, %v4661_v8  ;;  %v4865_v54 = vld [vmem:[#allocation16 + $0xc] sm:$0xf0] }
 0x82d   : > { %v7204_v53 = vsub.f32 %v7160_v5, %v2846_v6  ;;  %v2817_v20 = vmul.f32 %v7146_v30, %v2806_v49  ;;  %v4635_v6 = vld [vmem:[#allocation16 + $0x80] sm:$0xf]  ;;  %v4881_v49 = vld [vmem:[#allocation16 + $0x8c] sm:$0xf0] }
 0x82f   : > { %v2862_v7 = vmul.f32 %v7204_v53, %v7204_v53  ;;  %v7210_v62 = vadd.f32 %v7149_v1, %v2817_v20  ;;  %v4879_v20 = vld [vmem:[#allocation16 + $0x84] sm:$0xf] }
 0x831   : > { %2871 = vadd.xlane.f32.xlu2 %v2862_v7  ;;  %2843 = vadd.xlane.f32.xlu0 %v7210_v62  ;;  %v4636_v7 = vor.u32 %v4881_v49, %v4635_v6  ;;  %v4573_v6 = vld [vmem:[#allocation16 + $0x10] sm:$0xf0]  ;;  %v4579_v49 = vld [vmem:[#allocation16 + $0x8] sm:$0xf] }
 0x843   : > { %v2834_v9 = vpop.xlane.xlu1 %2833 }
 0x844   : > { %v2847_v57 = vmul.f32 %v2834_v9, %v7740_v52  ;;  %v4637_v9 = vld [vmem:[#allocation16 + $0x90] sm:$0xf0] }
 0x846   : > { %v7215_v10 = vsub.f32 %v7169_v21, %v2847_v57  ;;  %v4643_v57 = vld [vmem:[#allocation16 + $0x88] sm:$0xf] }
 0x848   : > { %v2863_v24 = vmul.f32 %v7215_v10, %v7215_v10 }
 0x84a   : > { %2873 = vadd.xlane.f32.xlu2 %v2863_v24  ;;  %v4882_v24 = vld [vmem:[#allocation16 + $0x94] sm:$0xf0] }
 0x84b   : > { %v2836_v30 = vpop.xlane.xlu0 %2835 }
 0x84c   : > { %v2848_v5 = vmul.f32 %v2836_v30, %v7740_v52  ;;  %v4640_v30 = vor.u32 %v4879_v20, %v4637_v9  ;;  %v4864_v9 = vld [vmem:[#allocation16 + $0xc] sm:$0xf] }
 0x84e   : > { %v7221_v48 = vsub.f32 %v7175_v18, %v2848_v5  ;;  %v4644_v5 = vor.u32 %v4882_v24, %v4643_v57  ;;  %3243 = vmatpush.bf16.msrb.mxu1 %v4640_v30  ;;  %v4581_v57 = vld [vmem:[#allocation16 + $0x18] sm:$0xf0] }
 0x84f   : > { %v4584_v30 = vor.u32 %v4864_v9, %v4581_v57 }
 0x850   : > { %v2864_v1 = vmul.f32 %v7221_v48, %v7221_v48 }
 0x852   : > { %2875 = vadd.xlane.f32.xlu1 %v2864_v1  ;;  %v4880_v1 = vld [vmem:[#allocation16 + $0x8c] sm:$0xf] }
 0x853   : > { %v2838_v61 = vpop.xlane.xlu2 %2837 }
 0x854   : > { %v2849_v50 = vmul.f32 %v2838_v61, %v7740_v52  ;;  %v4645_v61 = vld [vmem:[#allocation16 + $0x98] sm:$0xf0] }
 0x856   : > { %v7227_v21 = vsub.f32 %v7181_v47, %v2849_v50  ;;  %v4684_v47 = vor.u32 %v4893_v37, %v4683_v41  ;;  %v4648_v50 = vor.u32 %v4880_v1, %v4645_v61 }
 0x858   : > { %v2865_v58 = vmul.f32 %v7227_v21, %v7227_v21  ;;  %3211 = vmatpush.bf16.msrb.mxu0 %v4684_v47  ;;  %v4629_v47 = vld [vmem:[#allocation16 + $0x78] sm:$0xf0] }
 0x859   : > { %v4632_v19 = vor.u32 %v4876_v38, %v4629_v47 }
 0x85a   : > { %2877 = vadd.xlane.f32.xlu0 %v2865_v58  ;;  %v4619_v58 = vld [vmem:[#allocation16 + $0x60] sm:$0xf] }
 0x85b   : > { %v2840_v56 = vpop.xlane.xlu1 %2839 }
 0x85c   : > { %v2850_v40 = vmul.f32 %v2840_v56, %v7740_v52  ;;  %3212 = vmatpush.bf16.msrb.mxu0 %v4668_v28  ;;  %v4877_v56 = vld [vmem:[#allocation16 + $0x6c] sm:$0xf0]  ;;  %v4613_v28 = vld [vmem:[#allocation16 + $0x58] sm:$0xf0] }
 0x85d   : > { %v4616_v44 = vor.u32 %v4872_v4, %v4613_v28  ;;  %v7256_v28 = vld [vmem:[#allocation7] ss:$0 sm:$0xff] }
 0x85e   : > { %v7233_v18 = vsub.f32 %v7187_v0, %v2850_v40  ;;  %v4692_v0 = vor.u32 %v4894_v11, %v4691_v51  ;;  %v4875_v40 = vld [vmem:[#allocation16 + $0x64] sm:$0xf]  ;;  %v4603_v51 = vld [vmem:[#allocation16 + $0x40] sm:$0xf]  ;;  %v4873_v11 = vld [vmem:[#allocation16 + $0x4c] sm:$0xf0] }
 0x860   : > { %v2866_v33 = vmul.f32 %v7233_v18, %v7233_v18  ;;  %3269 = vmatpush.bf16.msrb.mxu2 %v4692_v0  ;;  %3213 = vmatpush.bf16.msrb.mxu0 %v4652_v32  ;;  %v4604_v0 = vor.u32 %v4873_v11, %v4603_v51 }
 0x862   : > { %2879 = vadd.xlane.f32.xlu2 %v2866_v33  ;;  %v4620_v33 = vor.u32 %v4877_v56, %v4619_v58 }
 0x864   : > { %3270 = vmatpush.bf16.msrb.mxu2 %v4676_v63  ;;  %3214 = vmatpush.bf16.msrb.mxu0 %v4636_v7  ;;  %v4866_v7 = vld [vmem:[#allocation16 + $0x14] sm:$0xf0] }
 0x865   : > { %v4580_v24 = vor.u32 %v4866_v7, %v4579_v49 }
 0x868   : > { %3271 = vmatpush.bf16.msrb.mxu2 %v4660_v39  ;;  %3215 = vmatpush.bf16.msrb.mxu0 %v4620_v33  ;;  %v4571_v39 = vld [vmem:[#allocation16] sm:$0xf] }
 0x869   : > { %v4572_v8 = vor.u32 %v4865_v54, %v4571_v39 }
 0x86c   : > { %3272 = vmatpush.bf16.msrb.mxu2 %v4644_v5  ;;  %3216 = vmatpush.bf16.msrb.mxu0 %v4604_v0 }
 0x87b   : > { %v2842_v17 = vpop.xlane.xlu1 %2841 }
 0x87c   : > { %v2851_v34 = vmul.f32 %v2842_v17, %v7740_v52  ;;  %v4621_v17 = vld [vmem:[#allocation16 + $0x70] sm:$0xf0] }
 0x87d   : > { %v4624_v41 = vor.u32 %v4875_v40, %v4621_v17 }
 0x87e   : > { %v7238_v35 = vsub.f32 %v2827_v46, %v2851_v34  ;;  %v4888_v46 = vld [vmem:[#allocation16 + $0xcc] sm:$0xf]  ;;  %v4627_v34 = vld [vmem:[#allocation16 + $0x68] sm:$0xf] }
 0x87f   : > { %v4680_v27 = vor.u32 %v4888_v46, %v4677_v29  ;;  %3244 = vmatpush.bf16.msrb.mxu1 %v4624_v41  ;;  %v4588_v46 = vor.u32 %v4869_v36, %v4587_v26  ;;  %v4589_v29 = vld [vmem:[#allocation16 + $0x30] sm:$0xf0] }
 0x880   : > { %v2867_v13 = vmul.f32 %v7238_v35, %v7238_v35  ;;  %v4592_v45 = vor.u32 %v4867_v42, %v4589_v29 }
 0x881   : > { %3299 = vmatpush.bf16.msrb.mxu3 %v4680_v27  ;;  %v4595_v27 = vld [vmem:[#allocation16 + $0x28] sm:$0xf]  ;;  %3217 = vmatpush.bf16.msrb.mxu0 %v4588_v46 }
 0x882   : > { %2881 = vadd.xlane.f32.xlu1 %v2867_v13  ;;  %v4878_v13 = vld [vmem:[#allocation16 + $0x74] sm:$0xf0]  ;;  %v4596_v32 = vor.u32 %v4870_v25, %v4595_v27 }
 0x883   : > { %v4628_v37 = vor.u32 %v4878_v13, %v4627_v34  ;;  %3245 = vmatpush.bf16.msrb.mxu1 %v4608_v31 }
 0x885   : > { %3300 = vmatpush.bf16.msrb.mxu3 %v4664_v3  ;;  %3273 = vmatpush.bf16.msrb.mxu2 %v4628_v37  ;;  %v4863_v3 = vld [vmem:[#allocation16 + $0x4] sm:$0xf] }
 0x886   : > { %v4576_v20 = vor.u32 %v4863_v3, %v4573_v6  ;;  %3218 = vmatpush.bf16.msrb.mxu0 %v4572_v8 }
 0x887   : > { %3246 = vmatpush.bf16.msrb.mxu1 %v4592_v45 }
 0x889   : > { %3301 = vmatpush.bf16.msrb.mxu3 %v4648_v50  ;;  %3274 = vmatpush.bf16.msrb.mxu2 %v4612_v15 }
 0x88b   : > { %3247 = vmatpush.bf16.msrb.mxu1 %v4576_v20 }
 0x88d   : > { %3302 = vmatpush.bf16.msrb.mxu3 %v4632_v19  ;;  %3275 = vmatpush.bf16.msrb.mxu2 %v4596_v32 }
 0x891   : > { %3303 = vmatpush.bf16.msrb.mxu3 %v4616_v44  ;;  %3276 = vmatpush.bf16.msrb.mxu2 %v4580_v24 }
 0x895   : > { %3304 = vmatpush.bf16.msrb.mxu3 %v4600_v14 }
 0x899   : > { %3305 = vmatpush.bf16.msrb.mxu3 %v4584_v30 }
 0x89c   : > { %v2870_v63 = vpop.xlane.xlu0 %2869 }
 0x89d   : > { %v2885_v12 = vmul.f32 %v2870_v63, %v7740_v52 }
 0x89f   : > { %v2893_v60 = vadd.f32 1e-12, %v2885_v12 }
 0x8a1   : > { %5309 = vrsqrt.f32 %v2893_v60  ;;  %vm2907_vm5 = vweird.f32 %v2893_v60 }
 0x8a4   : > { %v2872_v5 = vpop.xlane.xlu2 %2871  ;;  %v2844_v1 = vpop.xlane.xlu0 %2843 }
 0x8a5   : > { %v2886_v61 = vmul.f32 %v2872_v5, %v7740_v52  ;;  %v2852_v50 = vmul.f32 %v2844_v1, %v7740_v52 }
 0x8a7   : > { %v5310_v58 = vpop.eup %5309  ;;  %v2894_v56 = vadd.f32 1e-12, %v2886_v61  ;;  %v7246_v40 = vsub.f32 %v7210_v62, %v2852_v50 }
 0x8a8   : > { %v2902_v33 = vmul.f32 %v5310_v58, %v2893_v60  ;;  %vm2908_vm4 = vweird.f32 %v5310_v58 }
 0x8a9   : > { %5311 = vrsqrt.f32 %v2894_v56  ;;  %v2868_v17 = vmul.f32 %v7246_v40, %v7246_v40  ;;  %vm2909_vm6 = vmor %vm2907_vm5, %vm2908_vm4  ;;  %vm2917_vm8 = vweird.f32 %v2894_v56 }
 0x8aa   : > { %v2903_v34 = vmul.f32 %v5310_v58, %v2902_v33 }
 0x8ab   : > { %2883 = vadd.xlane.f32.xlu0 %v2868_v17 }
 0x8ac   : > { %v2904_v13 = vmul.f32 0.5, %v2903_v34 }
 0x8ae   : > { %v2905_v41 = vsub.f32 1.5, %v2904_v13 }
 0x8af   : > { %v5312_v37 = vpop.eup %5311 }
 0x8b0   : > { %v2906_v38 = vmul.f32 %v5310_v58, %v2905_v41  ;;  %v2912_v47 = vmul.f32 %v5312_v37, %v2894_v56  ;;  %vm2918_vm7 = vweird.f32 %v5312_v37 }
 0x8b1   : > { %vm2919_vm11 = vmor %vm2917_vm8, %vm2918_vm7 }
 0x8b2   : > { %v2913_v19 = vmul.f32 %v5312_v37, %v2912_v47  ;;  %v2910_v51 = vsel %vm2909_vm6, %v5310_v58, %v2906_v38 }
 0x8b3   : > { %v2981_v43 = vmul.f32 %v2910_v51, %v7197_v23 }
 0x8b4   : > { %v2914_v11 = vmul.f32 0.5, %v2913_v19 }
 0x8b5   : > { %v2989_v2 = vmul.f32 %v7251_v22, %v2981_v43 }
 0x8b6   : > { %v2915_v62 = vsub.f32 1.5, %v2914_v11 }
 0x8b7   : > { %v7259_v44 = vadd.f32 %v7256_v28, %v2989_v2 }
 0x8b8   : > { %v2916_v0 = vmul.f32 %v5312_v37, %v2915_v62 }
 0x8ba   : > { %v2920_v16 = vsel %vm2919_vm11, %v5312_v37, %v2916_v0 }
 0x8bb   : > { %v2982_v31 = vmul.f32 %v2920_v16, %v7204_v53 }
 0x8bd   : > { %v2990_v15 = vmul.f32 %v7251_v22, %v2982_v31  ;;  %v2874_v4 = vpop.xlane.xlu2 %2873 }
 0x8be   : > { %v2887_v26 = vmul.f32 %v2874_v4, %v7740_v52 }
 0x8bf   : > { %v7262_v23 = vadd.f32 %v7256_v28, %v2990_v15 }
 0x8c0   : > { %v2895_v36 = vadd.f32 1e-12, %v2887_v26 }
 0x8c1   : > { %v3037_v42 = vpack.c.bf16 %v7262_v23, %v7259_v44 }
 0x8c2   : > { %5313 = vrsqrt.f32 %v2895_v36  ;;  %vm2927_vm13 = vweird.f32 %v2895_v36 }
 0x8c3   : > { %3219 = vmatmul.bf16.vlgmr.msrb.gmra.mxu0 %v3037_v42  ;;  %3248 = vmatmul.bf16.vlgmr.msrb.gmra.mxu1 %v3037_v42 }
 0x8c4   : > { %3277 = vmatmul.bf16.vlgmr.msrb.gmra.mxu2 %v3037_v42  ;;  %3306 = vmatmul.bf16.vlgmr.msrb.gmra.mxu3 %v3037_v42 }
 0x8c5   : > { %v2876_v53 = vpop.xlane.xlu1 %2875 }
 0x8c6   : > { %v2888_v63 = vmul.f32 %v2876_v53, %v7740_v52 }
 0x8c8   : > { %v5314_v46 = vpop.eup %5313  ;;  %v2896_v29 = vadd.f32 1e-12, %v2888_v63 }
 0x8c9   : > { %v2922_v27 = vmul.f32 %v5314_v46, %v2895_v36  ;;  %vm2928_vm12 = vweird.f32 %v5314_v46 }
 0x8ca   : > { %5315 = vrsqrt.f32 %v2896_v29  ;;  %vm2929_vm9 = vmor %vm2927_vm13, %vm2928_vm12  ;;  %vm2937_vm14 = vweird.f32 %v2896_v29 }
 0x8cb   : > { %v2923_v25 = vmul.f32 %v5314_v46, %v2922_v27  ;;  %v4902_v27 = vld [vmem:[#allocation17 + $0x38] sm:$0xff] }
 0x8cc   : > { %3891 = vmatpush.bf16.msra.mxu0 %v4902_v27 }
 0x8cd   : > { %v2924_v12 = vmul.f32 0.5, %v2923_v25  ;;  %v2878_v45 = vpop.xlane.xlu0 %2877  ;;  %v4910_v25 = vld [vmem:[#allocation17 + $0x78] sm:$0xff] }
 0x8ce   : > { %v2889_v32 = vmul.f32 %v2878_v45, %v7740_v52  ;;  %3920 = vmatpush.bf16.msra.mxu1 %v4910_v25  ;;  %v4901_v45 = vld [vmem:[#allocation17 + $0x30] sm:$0xff] }
 0x8cf   : > { %v2925_v55 = vsub.f32 1.5, %v2924_v12 }
 0x8d0   : > { %v5316_v59 = vpop.eup %5315  ;;  %v2897_v14 = vadd.f32 1e-12, %v2889_v32  ;;  %v4909_v32 = vld [vmem:[#allocation17 + $0x70] sm:$0xff]  ;;  %3892 = vmatpush.bf16.msra.mxu0 %v4901_v45  ;;  %v4911_v45 = vld [vmem:[#allocation17 + $0x80] sm:$0xff] }
 0x8d1   : > { %v2926_v60 = vmul.f32 %v5314_v46, %v2925_v55  ;;  %v2932_v39 = vmul.f32 %v5316_v59, %v2896_v29  ;;  %vm2938_vm10 = vweird.f32 %v5316_v59 }
 0x8d2   : > { %5317 = vrsqrt.f32 %v2897_v14  ;;  %vm2939_vm15 = vmor %vm2937_vm14, %vm2938_vm10  ;;  %vm2947_vm1 = vweird.f32 %v2897_v14  ;;  %3921 = vmatpush.bf16.msra.mxu1 %v4909_v32  ;;  %v4919_v32 = vld [vmem:[#allocation17 + $0xc0] sm:$0xff] }
 0x8d3   : > { %v2933_v54 = vmul.f32 %v5316_v59, %v2932_v39  ;;  %v2930_v8 = vsel %vm2929_vm9, %v5314_v46, %v2926_v60 }
 0x8d4   : > { %v2983_v9 = vmul.f32 %v2930_v8, %v7215_v10  ;;  %v4908_v8 = vld [vmem:[#allocation17 + $0x68] sm:$0xff] }
 0x8d5   : > { %v2934_v3 = vmul.f32 0.5, %v2933_v54  ;;  %v2880_v6 = vpop.xlane.xlu2 %2879  ;;  %v4900_v54 = vld [vmem:[#allocation17 + $0x28] sm:$0xff] }
 0x8d6   : > { %v2890_v49 = vmul.f32 %v2880_v6, %v7740_v52  ;;  %v2991_v50 = vmul.f32 %v7251_v22, %v2983_v9  ;;  %3893 = vmatpush.bf16.msra.mxu0 %v4900_v54  ;;  %3922 = vmatpush.bf16.msra.mxu1 %v4908_v8  ;;  %v4917_v6 = vld [vmem:[#allocation17 + $0xb0] sm:$0xff] }
 0x8d7   : > { %v2935_v20 = vsub.f32 1.5, %v2934_v3 }
 0x8d8   : > { %v5318_v7 = vpop.eup %5317  ;;  %v2898_v57 = vadd.f32 1e-12, %v2890_v49  ;;  %v7275_v34 = vadd.f32 %v7256_v28, %v2991_v50  ;;  %v4925_v49 = vld [vmem:[#allocation17 + $0xf0] sm:$0xff] }
 0x8d9   : > { %v2936_v24 = vmul.f32 %v5316_v59, %v2935_v20  ;;  %v2942_v30 = vmul.f32 %v5318_v7, %v2897_v14  ;;  %vm2948_vm0 = vweird.f32 %v5318_v7  ;;  %v4926_v14 = vld [vmem:[#allocation17 + $0xf8] sm:$0xff] }
 0x8da   : > { %5319 = vrsqrt.f32 %v2898_v57  ;;  %vm2949_vm2 = vmor %vm2947_vm1, %vm2948_vm0  ;;  %vm2957_vm4 = vweird.f32 %v2898_v57  ;;  %3978 = vmatpush.bf16.msra.mxu3 %v4926_v14 }
 0x8db   : > { %v2940_v5 = vsel %vm2939_vm15, %v5316_v59, %v2936_v24  ;;  %v2943_v1 = vmul.f32 %v5318_v7, %v2942_v30  ;;  %v4918_v59 = vld [vmem:[#allocation17 + $0xb8] sm:$0xff]  ;;  %v4907_v24 = vld [vmem:[#allocation17 + $0x60] sm:$0xff] }
 0x8dc   : > { %v2984_v61 = vmul.f32 %v2940_v5, %v7221_v48  ;;  %3949 = vmatpush.bf16.msra.mxu2 %v4918_v59  ;;  %3923 = vmatpush.bf16.msra.mxu1 %v4907_v24 }
 0x8dd   : > { %v2944_v58 = vmul.f32 0.5, %v2943_v1  ;;  %v4916_v1 = vld [vmem:[#allocation17 + $0xa8] sm:$0xff] }
 0x8de   : > { %v2992_v56 = vmul.f32 %v7251_v22, %v2984_v61  ;;  %3979 = vmatpush.bf16.msra.mxu3 %v4925_v49  ;;  %v4924_v61 = vld [vmem:[#allocation17 + $0xe8] sm:$0xff] }
 0x8df   : > { %v2945_v33 = vsub.f32 1.5, %v2944_v58  ;;  %v4898_v58 = vld [vmem:[#allocation17 + $0x18] sm:$0xff] }
 0x8e0   : > { %v5320_v17 = vpop.eup %5319  ;;  %v7278_v10 = vadd.f32 %v7256_v28, %v2992_v56  ;;  %3950 = vmatpush.bf16.msra.mxu2 %v4917_v6  ;;  %v4906_v56 = vld [vmem:[#allocation17 + $0x58] sm:$0xff] }
 0x8e1   : > { %v2946_v13 = vmul.f32 %v5318_v7, %v2945_v33  ;;  %v2952_v41 = vmul.f32 %v5320_v17, %v2898_v57  ;;  %vm2958_vm3 = vweird.f32 %v5320_v17  ;;  %v4899_v57 = vld [vmem:[#allocation17 + $0x20] sm:$0xff]  ;;  %3924 = vmatpush.bf16.msra.mxu1 %v4906_v56 }
 0x8e2   : > { %v3038_v37 = vpack.c.bf16 %v7278_v10, %v7275_v34  ;;  %vm2959_vm5 = vmor %vm2957_vm4, %vm2958_vm3  ;;  %3894 = vmatpush.bf16.msra.mxu0 %v4899_v57  ;;  %3980 = vmatpush.bf16.msra.mxu3 %v4924_v61 }
 0x8e3   : > { %v2953_v48 = vmul.f32 %v5320_v17, %v2952_v41  ;;  %v2950_v38 = vsel %vm2949_vm2, %v5318_v7, %v2946_v13  ;;  %v4915_v13 = vld [vmem:[#allocation17 + $0xa0] sm:$0xff] }
 0x8e4   : > { %3224 = vmatmul.bf16.gmra.mxu0 %v3038_v37  ;;  %3253 = vmatmul.bf16.gmra.mxu1 %v3038_v37  ;;  %v2985_v51 = vmul.f32 %v2950_v38, %v7227_v21 }
 0x8e5   : > { %v2954_v47 = vmul.f32 0.5, %v2953_v48  ;;  %3282 = vmatmul.bf16.gmra.mxu2 %v3038_v37  ;;  %3311 = vmatmul.bf16.gmra.mxu3 %v3038_v37  ;;  %v4897_v37 = vld [vmem:[#allocation17 + $0x10] sm:$0xff] }
 0x8e6   : > { %v2993_v0 = vmul.f32 %v7251_v22, %v2985_v51  ;;  %3951 = vmatpush.bf16.msra.mxu2 %v4916_v1  ;;  %3895 = vmatpush.bf16.msra.mxu0 %v4898_v58  ;;  %v4905_v48 = vld [vmem:[#allocation17 + $0x50] sm:$0xff]  ;;  %v4922_v51 = vld [vmem:[#allocation17 + $0xd8] sm:$0xff] }
 0x8e7   : > { %v2955_v19 = vsub.f32 1.5, %v2954_v47  ;;  %3925 = vmatpush.bf16.msra.mxu1 %v4905_v48 }
 0x8e8   : > { %v7287_v2 = vadd.f32 %v7256_v28, %v2993_v0  ;;  %v4913_v0 = vld [vmem:[#allocation17 + $0x90] sm:$0xff] }
 0x8e9   : > { %v2956_v11 = vmul.f32 %v5320_v17, %v2955_v19  ;;  %v4914_v19 = vld [vmem:[#allocation17 + $0x98] sm:$0xff] }
 0x8ea   : > { %3952 = vmatpush.bf16.msra.mxu2 %v4915_v13  ;;  %3896 = vmatpush.bf16.msra.mxu0 %v4897_v37 }
 0x8eb   : > { %v2960_v62 = vsel %vm2959_vm5, %v5320_v17, %v2956_v11  ;;  %v4896_v11 = vld [vmem:[#allocation17 + $0x8] sm:$0xff] }
 0x8ec   : > { %v2986_v43 = vmul.f32 %v2960_v62, %v7233_v18  ;;  %v4904_v62 = vld [vmem:[#allocation17 + $0x48] sm:$0xff] }
 0x8ed   : > { %3926 = vmatpush.bf16.msra.mxu1 %v4904_v62 }
 0x8ee   : > { %v2994_v16 = vmul.f32 %v7251_v22, %v2986_v43  ;;  %3953 = vmatpush.bf16.msra.mxu2 %v4914_v19  ;;  %3897 = vmatpush.bf16.msra.mxu0 %v4896_v11 }
 0x8f0   : > { %v7290_v31 = vadd.f32 %v7256_v28, %v2994_v16  ;;  %v4921_v16 = vld [vmem:[#allocation17 + $0xd0] sm:$0xff] }
 0x8f2   : > { %v3039_v15 = vpack.c.bf16 %v7290_v31, %v7287_v2  ;;  %3954 = vmatpush.bf16.msra.mxu2 %v4913_v0 }
 0x8f4   : > { %3229 = vmatmul.bf16.gmra.mxu0 %v3039_v15  ;;  %3258 = vmatmul.bf16.gmra.mxu1 %v3039_v15 }
 0x8f5   : > { %3287 = vmatmul.bf16.gmra.mxu2 %v3039_v15  ;;  %3316 = vmatmul.bf16.gmra.mxu3 %v3039_v15  ;;  %v2882_v21 = vpop.xlane.xlu1 %2881 }
 0x8f6   : > { %v2891_v18 = vmul.f32 %v2882_v21, %v7740_v52 }
 0x8f8   : > { %v2899_v4 = vadd.f32 1e-12, %v2891_v18  ;;  %v4895_v18 = vld [vmem:[#allocation17] sm:$0xff] }
 0x8f9   : > { %3898 = vmatpush.bf16.msra.mxu0 %v4895_v18 }
 0x8fa   : > { %5321 = vrsqrt.f32 %v2899_v4  ;;  %vm2967_vm7 = vweird.f32 %v2899_v4 }
 0x900   : > { %v5322_v26 = vpop.eup %5321 }
 0x901   : > { %v2962_v36 = vmul.f32 %v5322_v26, %v2899_v4  ;;  %vm2968_vm6 = vweird.f32 %v5322_v26  ;;  %v4903_v4 = vld [vmem:[#allocation17 + $0x40] sm:$0xff] }
 0x902   : > { %vm2969_vm8 = vmor %vm2967_vm7, %vm2968_vm6  ;;  %3927 = vmatpush.bf16.msra.mxu1 %v4903_v4 }
 0x903   : > { %v2963_v42 = vmul.f32 %v5322_v26, %v2962_v36 }
 0x905   : > { %v2964_v29 = vmul.f32 0.5, %v2963_v42  ;;  %v4912_v42 = vld [vmem:[#allocation17 + $0x88] sm:$0xff] }
 0x906   : > { %3955 = vmatpush.bf16.msra.mxu2 %v4912_v42 }
 0x907   : > { %v2965_v12 = vsub.f32 1.5, %v2964_v29 }
 0x909   : > { %v2966_v60 = vmul.f32 %v5322_v26, %v2965_v12 }
 0x90a   : > { %3956 = vmatpush.bf16.msra.mxu2 %v4911_v45 }
 0x90b   : > { %v2970_v20 = vsel %vm2969_vm8, %v5322_v26, %v2966_v60 }
 0x90c   : > { %v2987_v30 = vmul.f32 %v2970_v20, %v7238_v35  ;;  %v4923_v35 = vld [vmem:[#allocation17 + $0xe0] sm:$0xff] }
 0x90d   : > { %3981 = vmatpush.bf16.msra.mxu3 %v4923_v35 }
 0x90e   : > { %v2995_v17 = vmul.f32 %v7251_v22, %v2987_v30 }
 0x910   : > { %v7301_v38 = vadd.f32 %v7256_v28, %v2995_v17 }
 0x911   : > { %3982 = vmatpush.bf16.msra.mxu3 %v4922_v51 }
 0x915   : > { %3983 = vmatpush.bf16.msra.mxu3 %v4921_v16 }
 0x91e   : > { %v2884_v53 = vpop.xlane.xlu0 %2883 }
 0x91f   : > { %v2892_v63 = vmul.f32 %v2884_v53, %v7740_v52  ;;  %v4920_v53 = vld [vmem:[#allocation17 + $0xc8] sm:$0xff] }
 0x920   : > { %3984 = vmatpush.bf16.msra.mxu3 %v4920_v53 }
 0x921   : > { %v2900_v46 = vadd.f32 1e-12, %v2892_v63 }
 0x923   : > { %5323 = vrsqrt.f32 %v2900_v46  ;;  %vm2977_vm12 = vweird.f32 %v2900_v46 }
 0x924   : > { %3985 = vmatpush.bf16.msra.mxu3 %v4919_v32 }
 0x929   : > { %v5324_v55 = vpop.eup %5323 }
 0x92a   : > { %v2972_v39 = vmul.f32 %v5324_v55, %v2900_v46  ;;  %vm2978_vm11 = vweird.f32 %v5324_v55 }
 0x92b   : > { %vm2979_vm13 = vmor %vm2977_vm12, %vm2978_vm11 }
 0x92c   : > { %v2973_v3 = vmul.f32 %v5324_v55, %v2972_v39 }
 0x92e   : > { %v2974_v7 = vmul.f32 0.5, %v2973_v3 }
 0x930   : > { %v2975_v9 = vsub.f32 1.5, %v2974_v7 }
 0x932   : > { %v2976_v5 = vmul.f32 %v5324_v55, %v2975_v9 }
 0x934   : > { %v2980_v50 = vsel %vm2979_vm13, %v5324_v55, %v2976_v5 }
 0x935   : > { %v2988_v33 = vmul.f32 %v2980_v50, %v7246_v40  ;;  %v3041_v40 = vld [vmem:[%s7742_s30] sm:$0xf]  ;;  %s4219_s30 = scalar_lea.hbm %s7746_s3, %s4927_s5 }
 0x936   : > { %v7311_v43 = vperm.slane %v3041_v40, 0  ;;  %v7323_v29 = vperm.slane %v3041_v40, 2  ;;  %v7325_v27 = vperm.slane %v3041_v40, 3  ;;  %s4222_s25 = sshll.u32 %s4219_s30, 4  ;;  %s4223_s25 = int_to_ptr.hbm [resolvable:$true] %s4222_s25 }
 0x937   : > { %v2996_v41 = vmul.f32 %v7251_v22, %v2988_v33 }
 0x939   : > { %v7304_v47 = vadd.f32 %v7256_v28, %v2996_v41  ;;  %v7313_v28 = vperm.slane %v3041_v40, 1 }
 0x93b   : > { %v3040_v22 = vpack.c.bf16 %v7304_v47, %v7301_v38 }
 0x93d   : > { %3234 = vmatmul.bf16.gmra.mxu0 %v3040_v22  ;;  %3263 = vmatmul.bf16.gmra.mxu1 %v3040_v22 }
 0x93e   : > { %3292 = vmatmul.bf16.gmra.mxu2 %v3040_v22  ;;  %3321 = vmatmul.bf16.gmra.mxu3 %v3040_v22 }
 0x940   : > { %v3220_v15 = vpop.f32.mrf.mxu0  ;;  %v3249_v21 = vpop.f32.mrf.mxu1 }
 0x941   : > { %v7316_v26 = vadd.f32 %v3220_v15, %v7311_v43  ;;  %v7319_v36 = vadd.f32 %v3249_v21, %v7313_v28 }
 0x943   : > { %v3359_v63 = vmul.f32 0.044715, %v7316_v26  ;;  %v3360_v46 = vmul.f32 0.044715, %v7319_v36 }
 0x945   : > { %v3391_v25 = vmul.f32 %v3359_v63, %v7316_v26  ;;  %v3392_v12 = vmul.f32 %v3360_v46, %v7319_v36 }
 0x947   : > { %v3423_v55 = vmul.f32 %v3391_v25, %v7316_v26  ;;  %v3424_v59 = vmul.f32 %v3392_v12, %v7319_v36  ;;  %v3278_v14 = vpop.f32.mrf.mxu2  ;;  %v3307_v60 = vpop.f32.mrf.mxu3 }
 0x948   : > { %v7332_v39 = vadd.f32 %v3278_v14, %v7323_v29  ;;  %v7335_v54 = vadd.f32 %v3307_v60, %v7325_v27  ;;  %v3222_v8 = vpop.f32.mrf.mxu0  ;;  %v3251_v3 = vpop.f32.mrf.mxu1 }
 0x949   : > { %v3223_v6 = vadd.f32 %v3222_v8, %v7311_v43  ;;  %v3252_v49 = vadd.f32 %v3251_v3, %v7313_v28  ;;  %v3455_v20 = vadd.f32 %v3423_v55, %v7316_v26  ;;  %v3456_v57 = vadd.f32 %v3424_v59, %v7319_v36 }
 0x94a   : > { %v3361_v7 = vmul.f32 0.044715, %v7332_v39  ;;  %v3362_v9 = vmul.f32 0.044715, %v7335_v54  ;;  %v3327_v3 = vmul.f32 0.5, %v7316_v26 }
 0x94b   : > { %v3363_v5 = vmul.f32 0.044715, %v3223_v6  ;;  %v3364_v1 = vmul.f32 0.044715, %v3252_v49  ;;  %v3487_v61 = vmul.f32 0.7978846, %v3455_v20 }
 0x94c   : > { %v3393_v24 = vmul.f32 %v3361_v7, %v7332_v39  ;;  %v3394_v30 = vmul.f32 %v3362_v9, %v7335_v54  ;;  %v3488_v33 = vmul.f32 0.7978846, %v3456_v57  ;;  %v3331_v20 = vmul.f32 0.5, %v3223_v6 }
 0x94d   : > { %v3395_v56 = vmul.f32 %v3363_v5, %v3223_v6  ;;  %v3396_v17 = vmul.f32 %v3364_v1, %v3252_v49  ;;  %5325 = vtanh.f32 %v3487_v61  ;;  %v3328_v9 = vmul.f32 0.5, %v7319_v36 }
 0x94e   : > { %v3425_v50 = vmul.f32 %v3393_v24, %v7332_v39  ;;  %v3426_v58 = vmul.f32 %v3394_v30, %v7335_v54  ;;  %5327 = vtanh.f32 %v3488_v33  ;;  %v3332_v57 = vmul.f32 0.5, %v3252_v49 }
 0x94f   : > { %v3280_v13 = vpop.f32.mrf.mxu2  ;;  %v3309_v35 = vpop.f32.mrf.mxu3  ;;  %v3427_v41 = vmul.f32 %v3395_v56, %v3223_v6  ;;  %v3428_v40 = vmul.f32 %v3396_v17, %v3252_v49 }
 0x950   : > { %v3281_v37 = vadd.f32 %v3280_v13, %v7323_v29  ;;  %v3457_v48 = vadd.f32 %v3425_v50, %v7332_v39  ;;  %v3310_v19 = vadd.f32 %v3309_v35, %v7325_v27  ;;  %v3458_v51 = vadd.f32 %v3426_v58, %v7335_v54 }
 0x951   : > { %v3459_v22 = vadd.f32 %v3427_v41, %v3223_v6  ;;  %v3460_v11 = vadd.f32 %v3428_v40, %v3252_v49  ;;  %v3330_v40 = vmul.f32 0.5, %v7335_v54 }
 0x952   : > { %v3365_v62 = vmul.f32 0.044715, %v3281_v37  ;;  %v3366_v0 = vmul.f32 0.044715, %v3310_v19  ;;  %v3489_v15 = vmul.f32 0.7978846, %v3457_v48 }
 0x953   : > { %v3491_v16 = vmul.f32 0.7978846, %v3459_v22  ;;  %v3492_v21 = vmul.f32 0.7978846, %v3460_v11  ;;  %v3490_v4 = vmul.f32 0.7978846, %v3458_v51  ;;  %v5326_v63 = vpop.eup %5325 }
 0x954   : > { %v3397_v18 = vmul.f32 %v3365_v62, %v3281_v37  ;;  %v3398_v42 = vmul.f32 %v3366_v0, %v3310_v19  ;;  %v5328_v25 = vpop.eup %5327  ;;  %v3551_v32 = vadd.f32 1.0, %v5326_v63  ;;  %v3329_v48 = vmul.f32 0.5, %v7332_v39 }
 0x955   : > { %5329 = vtanh.f32 %v3491_v16  ;;  %v3552_v14 = vadd.f32 1.0, %v5328_v25  ;;  %v3333_v51 = vmul.f32 0.5, %v3281_v37  ;;  %v3334_v11 = vmul.f32 0.5, %v3310_v19 }
 0x956   : > { %5331 = vtanh.f32 %v3492_v21  ;;  %v3429_v53 = vmul.f32 %v3397_v18, %v3281_v37  ;;  %v3430_v46 = vmul.f32 %v3398_v42, %v3310_v19  ;;  %v3583_v5 = vmul.f32 %v3551_v32, %v3327_v3 }
 0x957   : > { %5333 = vtanh.f32 %v3489_v15  ;;  %v3584_v50 = vmul.f32 %v3552_v14, %v3328_v9 }
 0x958   : > { %v3461_v12 = vadd.f32 %v3429_v53, %v3281_v37  ;;  %5335 = vtanh.f32 %v3490_v4  ;;  %v3462_v45 = vadd.f32 %v3430_v46, %v3310_v19 }
 0x95a   : > { %v3493_v55 = vmul.f32 0.7978846, %v3461_v12  ;;  %v3494_v60 = vmul.f32 0.7978846, %v3462_v45 }
 0x95b   : > { %v5330_v59 = vpop.eup %5329 }
 0x95c   : > { %v5332_v8 = vpop.eup %5331  ;;  %v3555_v7 = vadd.f32 1.0, %v5330_v59  ;;  %5337 = vtanh.f32 %v3493_v55 }
 0x95d   : > { %v3556_v24 = vadd.f32 1.0, %v5332_v8  ;;  %5339 = vtanh.f32 %v3494_v60  ;;  %v5334_v30 = vpop.eup %5333 }
 0x95e   : > { %v3587_v1 = vmul.f32 %v3555_v7, %v3331_v20  ;;  %v5336_v61 = vpop.eup %5335  ;;  %v3553_v33 = vadd.f32 1.0, %v5334_v30 }
 0x95f   : > { %v3588_v58 = vmul.f32 %v3556_v24, %v3332_v57  ;;  %v3554_v6 = vadd.f32 1.0, %v5336_v61 }
 0x960   : > { %v3679_v56 = vpack.c.bf16 %v3587_v1, %v3583_v5  ;;  %v3585_v15 = vmul.f32 %v3553_v33, %v3329_v48 }
 0x961   : > { %v3225_v17 = vpop.f32.mrf.mxu0  ;;  %v3254_v13 = vpop.f32.mrf.mxu1  ;;  %v3680_v35 = vpack.c.bf16 %v3588_v58, %v3584_v50  ;;  %v3586_v42 = vmul.f32 %v3554_v6, %v3330_v40 }
 0x962   : > { %v5338_v26 = vpop.eup %5337  ;;  %v7354_v41 = vadd.f32 %v3225_v17, %v7311_v43  ;;  %v7357_v36 = vadd.f32 %v3254_v13, %v7313_v28  ;;  %3899 = vmatmul.bf16.vlgmr.msra.gmra.mxu0 %v3679_v56 }
 0x963   : > { %v5340_v49 = vpop.eup %5339  ;;  %v3557_v22 = vadd.f32 1.0, %v5338_v26  ;;  %3928 = vmatmul.bf16.vlgmr.msra.gmra.mxu1 %v3680_v35 }
 0x964   : > { %v3558_v62 = vadd.f32 1.0, %v5340_v49  ;;  %v3367_v0 = vmul.f32 0.044715, %v7354_v41  ;;  %v3368_v16 = vmul.f32 0.044715, %v7357_v36 }
 0x965   : > { %v3589_v21 = vmul.f32 %v3557_v22, %v3333_v51 }
 0x966   : > { %v3399_v18 = vmul.f32 %v3367_v0, %v7354_v41  ;;  %v3400_v4 = vmul.f32 %v3368_v16, %v7357_v36  ;;  %v3590_v53 = vmul.f32 %v3558_v62, %v3334_v11  ;;  %v3335_v0 = vmul.f32 0.5, %v7354_v41 }
 0x967   : > { %v3681_v39 = vpack.c.bf16 %v3589_v21, %v3585_v15  ;;  %v3336_v16 = vmul.f32 0.5, %v7357_v36 }
 0x968   : > { %v3283_v63 = vpop.f32.mrf.mxu2  ;;  %v3312_v54 = vpop.f32.mrf.mxu3  ;;  %v3682_v37 = vpack.c.bf16 %v3590_v53, %v3586_v42  ;;  %v3431_v46 = vmul.f32 %v3399_v18, %v7354_v41  ;;  %v3432_v19 = vmul.f32 %v3400_v4, %v7357_v36 }
 0x969   : > { %v3284_v25 = vadd.f32 %v3283_v63, %v7323_v29  ;;  %v3313_v12 = vadd.f32 %v3312_v54, %v7325_v27  ;;  %3957 = vmatmul.bf16.vlgmr.msra.gmra.mxu2 %v3681_v39  ;;  %v3227_v45 = vpop.f32.mrf.mxu0  ;;  %v3256_v32 = vpop.f32.mrf.mxu1 }
 0x96a   : > { %3986 = vmatmul.bf16.vlgmr.msra.gmra.mxu3 %v3682_v37  ;;  %v3228_v55 = vadd.f32 %v3227_v45, %v7311_v43  ;;  %v3257_v59 = vadd.f32 %v3256_v32, %v7313_v28  ;;  %v3463_v14 = vadd.f32 %v3431_v46, %v7354_v41  ;;  %v3464_v60 = vadd.f32 %v3432_v19, %v7357_v36 }
 0x96b   : > { %v3369_v8 = vmul.f32 0.044715, %v3284_v25  ;;  %v3370_v3 = vmul.f32 0.044715, %v3313_v12  ;;  %v7384_v18 = vmul.f32 0.5, %v3284_v25  ;;  %v7387_v45 = vmul.f32 0.5, %v3313_v12 }
 0x96c   : > { %v3371_v20 = vmul.f32 0.044715, %v3228_v55  ;;  %v3372_v7 = vmul.f32 0.044715, %v3257_v59  ;;  %v3495_v24 = vmul.f32 0.7978846, %v3463_v14 }
 0x96d   : > { %v3401_v9 = vmul.f32 %v3369_v8, %v3284_v25  ;;  %v3402_v57 = vmul.f32 %v3370_v3, %v3313_v12  ;;  %v3496_v30 = vmul.f32 0.7978846, %v3464_v60  ;;  %v3339_v19 = vmul.f32 0.5, %v3228_v55 }
 0x96e   : > { %v3403_v5 = vmul.f32 %v3371_v20, %v3228_v55  ;;  %v3404_v1 = vmul.f32 %v3372_v7, %v3257_v59  ;;  %5341 = vtanh.f32 %v3495_v24  ;;  %v3340_v60 = vmul.f32 0.5, %v3257_v59 }
 0x96f   : > { %v3433_v61 = vmul.f32 %v3401_v9, %v3284_v25  ;;  %5343 = vtanh.f32 %v3496_v30  ;;  %v3434_v17 = vmul.f32 %v3402_v57, %v3313_v12 }
 0x970   : > { %v3285_v50 = vpop.f32.mrf.mxu2  ;;  %v3314_v58 = vpop.f32.mrf.mxu3  ;;  %v3435_v56 = vmul.f32 %v3403_v5, %v3228_v55  ;;  %v3436_v33 = vmul.f32 %v3404_v1, %v3257_v59 }
 0x971   : > { %v3286_v13 = vadd.f32 %v3285_v50, %v7323_v29  ;;  %v3315_v35 = vadd.f32 %v3314_v58, %v7325_v27  ;;  %v3230_v26 = vpop.f32.mrf.mxu0  ;;  %v3259_v6 = vpop.f32.mrf.mxu1  ;;  %v3465_v49 = vadd.f32 %v3433_v61, %v3284_v25  ;;  %v3466_v4 = vadd.f32 %v3434_v17, %v3313_v12 }
 0x972   : > { %v7376_v48 = vadd.f32 %v3230_v26, %v7311_v43  ;;  %v7379_v40 = vadd.f32 %v3259_v6, %v7313_v28  ;;  %v3467_v51 = vadd.f32 %v3435_v56, %v3228_v55  ;;  %v3468_v22 = vadd.f32 %v3436_v33, %v3257_v59 }
 0x973   : > { %v3373_v11 = vmul.f32 0.044715, %v3286_v13  ;;  %v3374_v62 = vmul.f32 0.044715, %v3315_v35  ;;  %v3497_v54 = vmul.f32 0.7978846, %v3465_v49 }
 0x974   : > { %v3375_v15 = vmul.f32 0.044715, %v7376_v48  ;;  %v3499_v21 = vmul.f32 0.7978846, %v3467_v51  ;;  %v5342_v42 = vpop.eup %5341  ;;  %v3500_v63 = vmul.f32 0.7978846, %v3468_v22 }
 0x975   : > { %v3405_v53 = vmul.f32 %v3373_v11, %v3286_v13  ;;  %v3406_v39 = vmul.f32 %v3374_v62, %v3315_v35  ;;  %v5344_v37 = vpop.eup %5343  ;;  %v3376_v46 = vmul.f32 0.044715, %v7379_v40  ;;  %v7390_v8 = vmul.f32 0.5, %v3286_v13 }
 0x976   : > { %5345 = vtanh.f32 %v3499_v21  ;;  %v3407_v41 = vmul.f32 %v3375_v15, %v7376_v48  ;;  %v3498_v3 = vmul.f32 0.7978846, %v3466_v4  ;;  %v3559_v9 = vadd.f32 1.0, %v5342_v42 }
 0x977   : > { %5347 = vtanh.f32 %v3500_v63  ;;  %v3437_v36 = vmul.f32 %v3405_v53, %v3286_v13  ;;  %v3438_v32 = vmul.f32 %v3406_v39, %v3315_v35  ;;  %v3560_v12 = vadd.f32 1.0, %v5344_v37 }
 0x978   : > { %v3288_v25 = vpop.f32.mrf.mxu2  ;;  %v3317_v14 = vpop.f32.mrf.mxu3  ;;  %5349 = vtanh.f32 %v3497_v54  ;;  %v3408_v59 = vmul.f32 %v3376_v46, %v7379_v40  ;;  %v3439_v50 = vmul.f32 %v3407_v41, %v7376_v48  ;;  %v3591_v49 = vmul.f32 %v3559_v9, %v3335_v0 }
 0x979   : > { %v7393_v20 = vadd.f32 %v3288_v25, %v7323_v29  ;;  %v3232_v7 = vpop.f32.mrf.mxu0  ;;  %v3261_v55 = vpop.f32.mrf.mxu1  ;;  %v3469_v57 = vadd.f32 %v3437_v36, %v3286_v13  ;;  %v3470_v5 = vadd.f32 %v3438_v32, %v3315_v35  ;;  %5351 = vtanh.f32 %v3498_v3 }
 0x97a   : > { %v7396_v24 = vadd.f32 %v3232_v7, %v7311_v43  ;;  %v7399_v30 = vadd.f32 %v3261_v55, %v7313_v28  ;;  %v7405_v56 = vadd.f32 %v3317_v14, %v7325_v27  ;;  %v3342_v51 = vmul.f32 0.5, %v3315_v35 }
 0x97b   : > { %v3377_v1 = vmul.f32 0.044715, %v7393_v20  ;;  %v3501_v61 = vmul.f32 0.7978846, %v3469_v57  ;;  %v3502_v13 = vmul.f32 0.7978846, %v3470_v5  ;;  %v3592_v15 = vmul.f32 %v3560_v12, %v3336_v16 }
 0x97c   : > { %v5346_v58 = vpop.eup %5345  ;;  %v3379_v33 = vmul.f32 0.044715, %v7396_v24  ;;  %v3380_v17 = vmul.f32 0.044715, %v7399_v30  ;;  %v3471_v42 = vadd.f32 %v3439_v50, %v7376_v48  ;;  %v3440_v53 = vmul.f32 %v3408_v59, %v7379_v40 }
 0x97d   : > { %v5348_v26 = vpop.eup %5347  ;;  %v3563_v6 = vadd.f32 1.0, %v5346_v58  ;;  %5353 = vtanh.f32 %v3501_v61  ;;  %v3409_v63 = vmul.f32 %v3377_v1, %v7393_v20  ;;  %v3378_v0 = vmul.f32 0.044715, %v7405_v56 }
 0x97e   : > { %v5350_v22 = vpop.eup %5349  ;;  %v3411_v11 = vmul.f32 %v3379_v33, %v7396_v24  ;;  %v3564_v62 = vadd.f32 1.0, %v5348_v26  ;;  %5355 = vtanh.f32 %v3502_v13  ;;  %v3412_v21 = vmul.f32 %v3380_v17, %v7399_v30 }
 0x97f   : > { %v3595_v4 = vmul.f32 %v3563_v6, %v3339_v19  ;;  %v5352_v39 = vpop.eup %5351  ;;  %v3561_v36 = vadd.f32 1.0, %v5350_v22  ;;  %v3503_v3 = vmul.f32 0.7978846, %v3471_v42  ;;  %v3472_v12 = vadd.f32 %v3440_v53, %v7379_v40 }
 0x980   : > { %v3290_v54 = vpop.f32.mrf.mxu2  ;;  %v3319_v35 = vpop.f32.mrf.mxu3  ;;  %v3596_v37 = vmul.f32 %v3564_v62, %v3340_v60  ;;  %v3443_v46 = vmul.f32 %v3411_v11, %v7396_v24  ;;  %v3562_v25 = vadd.f32 1.0, %v5352_v39  ;;  %v3444_v9 = vmul.f32 %v3412_v21, %v7399_v30 }
 0x981   : > { %v7417_v16 = vadd.f32 %v3290_v54, %v7323_v29  ;;  %v7420_v41 = vadd.f32 %v3319_v35, %v7325_v27  ;;  %v3683_v19 = vpack.c.bf16 %v3595_v4, %v3591_v49  ;;  %v3410_v5 = vmul.f32 %v3378_v0, %v7405_v56 }
 0x982   : > { %v3684_v32 = vpack.c.bf16 %v3596_v37, %v3592_v15  ;;  %v3475_v14 = vadd.f32 %v3443_v46, %v7396_v24  ;;  %5357 = vtanh.f32 %v3503_v3  ;;  %v3593_v50 = vmul.f32 %v3561_v36, %v7384_v18 }
 0x983   : > { %v5354_v7 = vpop.eup %5353  ;;  %v3381_v55 = vmul.f32 0.044715, %v7417_v16  ;;  %v3382_v60 = vmul.f32 0.044715, %v7420_v41  ;;  %3904 = vmatmul.bf16.gmra.mxu0 %v3683_v19  ;;  %v3476_v33 = vadd.f32 %v3444_v9, %v7399_v30  ;;  %v3504_v26 = vmul.f32 0.7978846, %v3472_v12 }
 0x984   : > { %v5356_v57 = vpop.eup %5355  ;;  %3933 = vmatmul.bf16.gmra.mxu1 %v3684_v32  ;;  %v3565_v59 = vadd.f32 1.0, %v5354_v7  ;;  %v3507_v1 = vmul.f32 0.7978846, %v3475_v14  ;;  %v3594_v6 = vmul.f32 %v3562_v25, %v7387_v45  ;;  %v3441_v11 = vmul.f32 %v3409_v63, %v7393_v20 }
 0x985   : > { %v3413_v61 = vmul.f32 %v3381_v55, %v7417_v16  ;;  %v3566_v58 = vadd.f32 1.0, %v5356_v57  ;;  %v3414_v17 = vmul.f32 %v3382_v60, %v7420_v41  ;;  %v3508_v22 = vmul.f32 0.7978846, %v3476_v33 }
 0x986   : > { %v3597_v13 = vmul.f32 %v3565_v59, %v7390_v8  ;;  %5359 = vtanh.f32 %v3507_v1  ;;  %v3473_v21 = vadd.f32 %v3441_v11, %v7393_v20  ;;  %v3442_v42 = vmul.f32 %v3410_v5, %v7405_v56 }
 0x987   : > { %v3598_v49 = vmul.f32 %v3566_v58, %v3342_v51  ;;  %5361 = vtanh.f32 %v3504_v26  ;;  %v3445_v15 = vmul.f32 %v3413_v61, %v7417_v16  ;;  %v3446_v45 = vmul.f32 %v3414_v17, %v7420_v41 }
 0x988   : > { %v3685_v62 = vpack.c.bf16 %v3597_v13, %v3593_v50  ;;  %5363 = vtanh.f32 %v3508_v22  ;;  %v5358_v4 = vpop.eup %5357  ;;  %v3505_v53 = vmul.f32 0.7978846, %v3473_v21  ;;  %v3474_v0 = vadd.f32 %v3442_v42, %v7405_v56 }
 0x989   : > { %v3686_v18 = vpack.c.bf16 %v3598_v49, %v3594_v6  ;;  %v3477_v8 = vadd.f32 %v3445_v15, %v7417_v16  ;;  %v3567_v51 = vadd.f32 1.0, %v5358_v4  ;;  %v3478_v54 = vadd.f32 %v3446_v45, %v7420_v41 }
 0x98a   : > { %3962 = vmatmul.bf16.gmra.mxu2 %v3685_v62  ;;  %v3343_v35 = vmul.f32 0.5, %v7376_v48  ;;  %v3347_v37 = vmul.f32 0.5, %v7396_v24  ;;  %5365 = vtanh.f32 %v3505_v53  ;;  %v3506_v36 = vmul.f32 0.7978846, %v3474_v0 }
 0x98b   : > { %3991 = vmatmul.bf16.gmra.mxu3 %v3686_v18  ;;  %v3509_v63 = vmul.f32 0.7978846, %v3477_v8  ;;  %v3510_v32 = vmul.f32 0.7978846, %v3478_v54  ;;  %v3344_v55 = vmul.f32 0.5, %v7379_v40  ;;  %v3348_v60 = vmul.f32 0.5, %v7399_v30 }
 0x98c   : > { %v5360_v39 = vpop.eup %5359  ;;  %v3599_v14 = vmul.f32 %v3567_v51, %v3343_v35  ;;  %v3345_v61 = vmul.f32 0.5, %v7393_v20  ;;  %v3349_v50 = vmul.f32 0.5, %v7417_v16  ;;  %v3346_v26 = vmul.f32 0.5, %v7405_v56 }
 0x98d   : > { %v3571_v46 = vadd.f32 1.0, %v5360_v39  ;;  %v5362_v19 = vpop.eup %5361  ;;  %5367 = vtanh.f32 %v3509_v63  ;;  %v3350_v6 = vmul.f32 0.5, %v7420_v41 }
 0x98e   : > { %v5364_v25 = vpop.eup %5363  ;;  %v3568_v7 = vadd.f32 1.0, %v5362_v19  ;;  %5369 = vtanh.f32 %v3506_v36 }
 0x98f   : > { %v3603_v3 = vmul.f32 %v3571_v46, %v3347_v37  ;;  %v3572_v9 = vadd.f32 1.0, %v5364_v25  ;;  %5371 = vtanh.f32 %v3510_v32 }
 0x990   : > { %v3600_v48 = vmul.f32 %v3568_v7, %v3344_v55  ;;  %v5366_v57 = vpop.eup %5365 }
 0x991   : > { %v3687_v12 = vpack.c.bf16 %v3603_v3, %v3599_v14  ;;  %v3604_v24 = vmul.f32 %v3572_v9, %v3348_v60  ;;  %v3569_v1 = vadd.f32 1.0, %v5366_v57 }
 0x993   : > { %3909 = vmatmul.bf16.gmra.mxu0 %v3687_v12  ;;  %v5368_v5 = vpop.eup %5367  ;;  %v3688_v59 = vpack.c.bf16 %v3604_v24, %v3600_v48  ;;  %v3601_v30 = vmul.f32 %v3569_v1, %v3345_v61 }
 0x994   : > { %v3573_v58 = vadd.f32 1.0, %v5368_v5  ;;  %v5370_v33 = vpop.eup %5369 }
 0x995   : > { %3938 = vmatmul.bf16.gmra.mxu1 %v3688_v59  ;;  %v5372_v40 = vpop.eup %5371  ;;  %v3570_v13 = vadd.f32 1.0, %v5370_v33 }
 0x996   : > { %v3605_v17 = vmul.f32 %v3573_v58, %v3349_v50  ;;  %v3574_v49 = vadd.f32 1.0, %v5372_v40 }
 0x997   : > { %v3602_v11 = vmul.f32 %v3570_v13, %v3346_v26 }
 0x998   : > { %v3689_v22 = vpack.c.bf16 %v3605_v17, %v3601_v30  ;;  %v3606_v62 = vmul.f32 %v3574_v49, %v3350_v6 }
 0x99a   : > { %3967 = vmatmul.bf16.gmra.mxu2 %v3689_v22  ;;  %v3690_v15 = vpack.c.bf16 %v3606_v62, %v3602_v11 }
 0x99c   : > { %3996 = vmatmul.bf16.gmra.mxu3 %v3690_v15 }
 0x9ba   : > { %v3235_v20 = vpop.f32.mrf.mxu0  ;;  %v3264_v16 = vpop.f32.mrf.mxu1 }
 0x9bb   : > { %v7451_v18 = vadd.f32 %v3235_v20, %v7311_v43  ;;  %v7454_v21 = vadd.f32 %v3264_v16, %v7313_v28 }
 0x9bd   : > { %v3383_v4 = vmul.f32 0.044715, %v7451_v18  ;;  %v3384_v56 = vmul.f32 0.044715, %v7454_v21 }
 0x9bf   : > { %v3415_v41 = vmul.f32 %v3383_v4, %v7451_v18  ;;  %v3416_v8 = vmul.f32 %v3384_v56, %v7454_v21 }
 0x9c1   : > { %v3293_v42 = vpop.f32.mrf.mxu2  ;;  %v3322_v45 = vpop.f32.mrf.mxu3  ;;  %v3447_v51 = vmul.f32 %v3415_v41, %v7451_v18  ;;  %v3448_v53 = vmul.f32 %v3416_v8, %v7454_v21 }
 0x9c2   : > { %v7463_v39 = vadd.f32 %v3293_v42, %v7323_v29  ;;  %v7466_v63 = vadd.f32 %v3322_v45, %v7325_v27  ;;  %v3237_v0 = vpop.f32.mrf.mxu0  ;;  %v3266_v54 = vpop.f32.mrf.mxu1  ;;  %v3351_v45 = vmul.f32 0.5, %v7451_v18 }
 0x9c3   : > { %v3238_v35 = vadd.f32 %v3237_v0, %v7311_v43  ;;  %v3267_v37 = vadd.f32 %v3266_v54, %v7313_v28  ;;  %v3479_v46 = vadd.f32 %v3447_v51, %v7451_v18  ;;  %v3480_v32 = vadd.f32 %v3448_v53, %v7454_v21 }
 0x9c4   : > { %v3385_v19 = vmul.f32 0.044715, %v7463_v39  ;;  %v3386_v36 = vmul.f32 0.044715, %v7466_v63  ;;  %v3352_v0 = vmul.f32 0.5, %v7454_v21 }
 0x9c5   : > { %v3387_v25 = vmul.f32 0.044715, %v3238_v35  ;;  %v3388_v14 = vmul.f32 0.044715, %v3267_v37  ;;  %v3511_v9 = vmul.f32 0.7978846, %v3479_v46 }
 0x9c6   : > { %v3417_v3 = vmul.f32 %v3385_v19, %v7463_v39  ;;  %v3418_v7 = vmul.f32 %v3386_v36, %v7466_v63  ;;  %v3512_v43 = vmul.f32 0.7978846, %v3480_v32  ;;  %v3355_v51 = vmul.f32 0.5, %v3238_v35 }
 0x9c7   : > { %v3419_v55 = vmul.f32 %v3387_v25, %v3238_v35  ;;  %v3420_v60 = vmul.f32 %v3388_v14, %v3267_v37  ;;  %5373 = vtanh.f32 %v3511_v9  ;;  %v3356_v54 = vmul.f32 0.5, %v3267_v37 }
 0x9c8   : > { %v3449_v28 = vmul.f32 %v3417_v3, %v7463_v39  ;;  %v3450_v12 = vmul.f32 %v3418_v7, %v7466_v63  ;;  %5375 = vtanh.f32 %v3512_v43  ;;  %v3353_v43 = vmul.f32 0.5, %v7463_v39 }
 0x9c9   : > { %v3295_v48 = vpop.f32.mrf.mxu2  ;;  %v3324_v24 = vpop.f32.mrf.mxu3  ;;  %v3451_v57 = vmul.f32 %v3419_v55, %v3238_v35  ;;  %v3452_v5 = vmul.f32 %v3420_v60, %v3267_v37 }
 0x9ca   : > { %v3296_v59 = vadd.f32 %v3295_v48, %v7323_v29  ;;  %v3325_v1 = vadd.f32 %v3324_v24, %v7325_v27  ;;  %v3481_v61 = vadd.f32 %v3449_v28, %v7463_v39  ;;  %v3482_v33 = vadd.f32 %v3450_v12, %v7466_v63 }
 0x9cb   : > { %v3483_v50 = vadd.f32 %v3451_v57, %v3238_v35  ;;  %v3484_v58 = vadd.f32 %v3452_v5, %v3267_v37  ;;  %v3354_v28 = vmul.f32 0.5, %v7466_v63 }
 0x9cc   : > { %v3389_v40 = vmul.f32 0.044715, %v3296_v59  ;;  %v3390_v30 = vmul.f32 0.044715, %v3325_v1  ;;  %v3513_v49 = vmul.f32 0.7978846, %v3481_v61 }
 0x9cd   : > { %v3515_v17 = vmul.f32 0.7978846, %v3483_v50  ;;  %v3516_v13 = vmul.f32 0.7978846, %v3484_v58  ;;  %v3514_v22 = vmul.f32 0.7978846, %v3482_v33  ;;  %v5374_v11 = vpop.eup %5373 }
 0x9ce   : > { %v3421_v26 = vmul.f32 %v3389_v40, %v3296_v59  ;;  %v3422_v6 = vmul.f32 %v3390_v30, %v3325_v1  ;;  %v5376_v62 = vpop.eup %5375  ;;  %v3575_v16 = vadd.f32 1.0, %v5374_v11  ;;  %v3357_v21 = vmul.f32 0.5, %v3296_v59  ;;  %v7489_v40 = vld [vmem:[%s7743_s29] ss:$0 sm:$0xff]  ;;  %s5721_s29 = sshra.s32 %s4223_s25, 4  ;;  %s5722_s29 = int_to_ptr.hbm [resolvable:$true] %s5721_s29 }
 0x9cf   : > { %5377 = vtanh.f32 %v3515_v17  ;;  %v3576_v8 = vadd.f32 1.0, %v5376_v62  ;;  %v3358_v12 = vmul.f32 0.5, %v3325_v1  ;;  %s5723_s24 = scalar_lea.hbm %s5722_s29, 64  ;;  %p5728_p13 = scmp.lt.s32.totalorder %s5722_s29, %s7746_s3 }
 0x9d0   : > { %5379 = vtanh.f32 %v3516_v13  ;;  %v3453_v29 = vmul.f32 %v3421_v26, %v3296_v59  ;;  %v3454_v27 = vmul.f32 %v3422_v6, %v3325_v1  ;;  %v3607_v36 = vmul.f32 %v3575_v16, %v3351_v45  ;;  %p5724_p1 = scmp.ne.s32.totalorder %s5722_s29, %s5723_s24  ;;  %p5729_p7 = scmp.lt.s32.totalorder %s5727_s2, %s5723_s24 }
 0x9d1   : > { %5381 = vtanh.f32 %v3513_v49  ;;  %v3608_v14 = vmul.f32 %v3576_v8, %v3352_v0 }
 0x9d2   : > { %v3485_v15 = vadd.f32 %v3453_v29, %v3296_v59  ;;  %v3486_v20 = vadd.f32 %v3454_v27, %v3325_v1  ;;  %5383 = vtanh.f32 %v3514_v22  ;;  %p5725_p3 = pnand %p5724_p1, %p6008_p0  ;;  %p5730_p8 = por %p5729_p7, %p5728_p13 }
 0x9d4   : > { %v3517_v4 = vmul.f32 0.7978846, %v3485_v15  ;;  %v3518_v56 = vmul.f32 0.7978846, %v3486_v20  ;;  %p5726_p4 = pneg %p5725_p3 }
 0x9d5   : > { %v5378_v41 = vpop.eup %5377 }
 0x9d6   : > { %v5380_v42 = vpop.eup %5379  ;;  %v3579_v53 = vadd.f32 1.0, %v5378_v41  ;;  %5385 = vtanh.f32 %v3517_v4  ;;  %p5731_p9 = pnand %p5730_p8, %p5726_p4 }
 0x9d7   : > { %v3580_v46 = vadd.f32 1.0, %v5380_v42  ;;  %5387 = vtanh.f32 %v3518_v56  ;;  %v5382_v19 = vpop.eup %5381 }
 0x9d8   : > { %v3611_v32 = vmul.f32 %v3579_v53, %v3355_v51  ;;  %v5384_v25 = vpop.eup %5383  ;;  %v3577_v60 = vadd.f32 1.0, %v5382_v19 }
 0x9d9   : > { %v3612_v3 = vmul.f32 %v3580_v46, %v3356_v54  ;;  %v3578_v18 = vadd.f32 1.0, %v5384_v25 }
 0x9da   : > { %v3691_v7 = vpack.c.bf16 %v3611_v32, %v3607_v36  ;;  %v3609_v24 = vmul.f32 %v3577_v60, %v3353_v43 }
 0x9db   : > { %v3692_v55 = vpack.c.bf16 %v3612_v3, %v3608_v14  ;;  %v3610_v5 = vmul.f32 %v3578_v18, %v3354_v28 }
 0x9dc   : > { %v5386_v9 = vpop.eup %5385  ;;  %3914 = vmatmul.bf16.gmra.mxu0 %v3691_v7 }
 0x9dd   : > { %v5388_v35 = vpop.eup %5387  ;;  %3943 = vmatmul.bf16.gmra.mxu1 %v3692_v55  ;;  %v3581_v37 = vadd.f32 1.0, %v5386_v9 }
 0x9de   : > { %v3582_v48 = vadd.f32 1.0, %v5388_v35 }
 0x9df   : > { %v3613_v57 = vmul.f32 %v3581_v37, %v3357_v21  ;;  %v3900_v33 = vpop.f32.mrf.mxu0 }
 0x9e0   : > { %v3614_v61 = vmul.f32 %v3582_v48, %v3358_v12  ;;  %v3901_v39 = vadd.f32 %v7489_v40, %v3900_v33  ;;  %v3929_v59 = vpop.f32.mrf.mxu1 }
 0x9e1   : > { %v3693_v50 = vpack.c.bf16 %v3613_v57, %v3609_v24 }
 0x9e2   : > { %v3694_v58 = vpack.c.bf16 %v3614_v61, %v3610_v5  ;;  %v3930_v63 = vadd.f32 %v3929_v59, %v3901_v39 }
 0x9e3   : > { %3972 = vmatmul.bf16.gmra.mxu2 %v3693_v50 }
 0x9e4   : > { %4001 = vmatmul.bf16.gmra.mxu3 %v3694_v58 }
 0x9e7   : > { %v3902_v1 = vpop.f32.mrf.mxu0 }
 0x9e8   : > { %v3903_v26 = vadd.f32 %v7489_v40, %v3902_v1  ;;  %v3931_v22 = vpop.f32.mrf.mxu1 }
 0x9ea   : > { %v3932_v29 = vadd.f32 %v3931_v22, %v3903_v26 }
 0x9ec   : > { %v3958_v30 = vpop.f32.mrf.mxu2 }
 0x9ed   : > { %v3959_v17 = vadd.f32 %v3958_v30, %v3930_v63  ;;  %v3987_v13 = vpop.f32.mrf.mxu3 }
 0x9ef   : > { %v3988_v6 = vadd.f32 %v3987_v13, %v3959_v17 }
 0x9f1   : > { %v4007_v49 = vadd.f32 %v3988_v6, %v7259_v44 }
 0x9f3   : > { %4017 = vadd.xlane.f32.xlu2 %v4007_v49 }
 0x9f4   : > { %v3960_v27 = vpop.f32.mrf.mxu2 }
 0x9f5   : > { %v3961_v11 = vadd.f32 %v3960_v27, %v3932_v29  ;;  %v3989_v62 = vpop.f32.mrf.mxu3 }
 0x9f7   : > { %v3990_v15 = vadd.f32 %v3989_v62, %v3961_v11 }
 0x9f9   : > { %v7495_v20 = vadd.f32 %v3990_v15, %v7262_v23 }
 0x9fb   : > { %4019 = vadd.xlane.f32.xlu1 %v7495_v20 }
 0xa00   : > { %v3905_v16 = vpop.f32.mrf.mxu0 }
 0xa01   : > { %v3934_v4 = vpop.f32.mrf.mxu1  ;;  %v3906_v56 = vadd.f32 %v7489_v40, %v3905_v16 }
 0xa03   : > { %v3935_v8 = vadd.f32 %v3934_v4, %v3906_v56 }
 0xa08   : > { %v3907_v41 = vpop.f32.mrf.mxu0 }
 0xa09   : > { %v3908_v51 = vadd.f32 %v7489_v40, %v3907_v41  ;;  %v3936_v53 = vpop.f32.mrf.mxu1 }
 0xa0b   : > { %v3937_v46 = vadd.f32 %v3936_v53, %v3908_v51 }
 0xa0d   : > { %v3963_v42 = vpop.f32.mrf.mxu2 }
 0xa0e   : > { %v3964_v44 = vadd.f32 %v3963_v42, %v3935_v8  ;;  %v3992_v45 = vpop.f32.mrf.mxu3 }
 0xa10   : > { %v3993_v0 = vadd.f32 %v3992_v45, %v3964_v44  ;;  %v3910_v23 = vpop.f32.mrf.mxu0 }
 0xa11   : > { %v3911_v14 = vadd.f32 %v7489_v40, %v3910_v23 }
 0xa12   : > { %v4009_v54 = vadd.f32 %v3993_v0, %v7275_v34  ;;  %v3939_v3 = vpop.f32.mrf.mxu1 }
 0xa13   : > { %v3940_v55 = vadd.f32 %v3939_v3, %v3911_v14 }
 0xa14   : > { %4021 = vadd.xlane.f32.xlu0 %v4009_v54 }
 0xa15   : > { %v3965_v19 = vpop.f32.mrf.mxu2 }
 0xa16   : > { %v3966_v36 = vadd.f32 %v3965_v19, %v3937_v46  ;;  %v3994_v32 = vpop.f32.mrf.mxu3 }
 0xa18   : > { %v3995_v25 = vadd.f32 %v3994_v32, %v3966_v36  ;;  %v3912_v60 = vpop.f32.mrf.mxu0 }
 0xa19   : > { %v3913_v35 = vadd.f32 %v7489_v40, %v3912_v60 }
 0xa1a   : > { %v4010_v7 = vadd.f32 %v3995_v25, %v7278_v10  ;;  %v3941_v21 = vpop.f32.mrf.mxu1 }
 0xa1b   : > { %v3942_v28 = vadd.f32 %v3941_v21, %v3913_v35 }
 0xa1c   : > { %4023 = vadd.xlane.f32.xlu2 %v4010_v7 }
 0xa1d   : > { %v3968_v9 = vpop.f32.mrf.mxu2 }
 0xa1e   : > { %v3969_v18 = vadd.f32 %v3968_v9, %v3940_v55 }
 0xa1f   : > { %v3997_v34 = vpop.f32.mrf.mxu3 }
 0xa20   : > { %v3998_v43 = vadd.f32 %v3997_v34, %v3969_v18 }
 0xa22   : > { %v4011_v37 = vadd.f32 %v3998_v43, %v7287_v2 }
 0xa24   : > { %4025 = vadd.xlane.f32.xlu1 %v4011_v37 }
 0xa25   : > { %v3970_v12 = vpop.f32.mrf.mxu2 }
 0xa26   : > { %v3971_v48 = vadd.f32 %v3970_v12, %v3942_v28 }
 0xa27   : > { %v3999_v24 = vpop.f32.mrf.mxu3 }
 0xa28   : > { %v4000_v57 = vadd.f32 %v3999_v24, %v3971_v48 }
 0xa2a   : > { %v4012_v10 = vadd.f32 %v4000_v57, %v7290_v31 }
 0xa2c   : > { %4027 = vadd.xlane.f32.xlu0 %v4012_v10 }
 0xa59   : > { %v3915_v5 = vpop.f32.mrf.mxu0 }
 0xa5a   : > { %v3916_v61 = vadd.f32 %v7489_v40, %v3915_v5  ;;  %v3944_v50 = vpop.f32.mrf.mxu1 }
 0xa5c   : > { %v3945_v58 = vadd.f32 %v3944_v50, %v3916_v61  ;;  %v7556_v61 = vld [vmem:[%s7744_s14] ss:$0 sm:$0xff] }
 0xa61   : > { %v3917_v33 = vpop.f32.mrf.mxu0 }
 0xa62   : > { %v3918_v30 = vadd.f32 %v7489_v40, %v3917_v33  ;;  %v3946_v26 = vpop.f32.mrf.mxu1  ;;  %v7561_v33 = vld [vmem:[%s7745_s17] ss:$0 sm:$0xff] }
 0xa64   : > { %v3947_v22 = vadd.f32 %v3946_v26, %v3918_v30 }
 0xa66   : > { %v3973_v39 = vpop.f32.mrf.mxu2  ;;  %v4018_v1 = vpop.xlane.xlu2 %4017 }
 0xa67   : > { %v3974_v59 = vadd.f32 %v3973_v39, %v3945_v58  ;;  %v4002_v63 = vpop.f32.mrf.mxu3  ;;  %v4033_v2 = vmul.f32 %v4018_v1, %v7740_v52 }
 0xa69   : > { %v4003_v17 = vadd.f32 %v4002_v63, %v3974_v59  ;;  %v7509_v13 = vsub.f32 %v4007_v49, %v4033_v2 }
 0xa6b   : > { %v4013_v31 = vadd.f32 %v4003_v17, %v7301_v38  ;;  %v4049_v6 = vmul.f32 %v7509_v13, %v7509_v13 }
 0xa6d   : > { %4029 = vadd.xlane.f32.xlu2 %v4013_v31  ;;  %4057 = vadd.xlane.f32.xlu0 %v4049_v6 }
 0xa6e   : > { %v3975_v29 = vpop.f32.mrf.mxu2  ;;  %v4020_v11 = vpop.xlane.xlu1 %4019 }
 0xa6f   : > { %v3976_v27 = vadd.f32 %v3975_v29, %v3947_v22  ;;  %v4004_v62 = vpop.f32.mrf.mxu3  ;;  %v4034_v15 = vmul.f32 %v4020_v11, %v7740_v52 }
 0xa71   : > { %v4005_v16 = vadd.f32 %v4004_v62, %v3976_v27  ;;  %v7516_v40 = vsub.f32 %v7495_v20, %v4034_v15 }
 0xa73   : > { %v4014_v49 = vadd.f32 %v4005_v16, %v7304_v47  ;;  %v4050_v38 = vmul.f32 %v7516_v40, %v7516_v40 }
 0xa75   : > { %4031 = vadd.xlane.f32.xlu1 %v4014_v49  ;;  %4059 = vadd.xlane.f32.xlu2 %v4050_v38 }
 0xa87   : > { %v4022_v4 = vpop.xlane.xlu0 %4021 }
 0xa88   : > { %v4035_v56 = vmul.f32 %v4022_v4, %v7740_v52 }
 0xa8a   : > { %v7522_v41 = vsub.f32 %v4009_v54, %v4035_v56 }
 0xa8c   : > { %v4051_v8 = vmul.f32 %v7522_v41, %v7522_v41 }
 0xa8e   : > { %4061 = vadd.xlane.f32.xlu1 %v4051_v8 }
 0xa8f   : > { %v4024_v42 = vpop.xlane.xlu2 %4023 }
 0xa90   : > { %v4036_v20 = vmul.f32 %v4024_v42, %v7740_v52 }
 0xa92   : > { %v7527_v44 = vsub.f32 %v4010_v7, %v4036_v20 }
 0xa94   : > { %v4052_v47 = vmul.f32 %v7527_v44, %v7527_v44 }
 0xa96   : > { %4063 = vadd.xlane.f32.xlu0 %v4052_v47 }
 0xa97   : > { %v4026_v45 = vpop.xlane.xlu1 %4025 }
 0xa98   : > { %v4037_v51 = vmul.f32 %v4026_v45, %v7740_v52 }
 0xa9a   : > { %v7532_v53 = vsub.f32 %v4011_v37, %v4037_v51 }
 0xa9c   : > { %v4053_v0 = vmul.f32 %v7532_v53, %v7532_v53 }
 0xa9e   : > { %4065 = vadd.xlane.f32.xlu2 %v4053_v0 }
 0xa9f   : > { %v4028_v54 = vpop.xlane.xlu0 %4027 }
 0xaa0   : > { %v4038_v46 = vmul.f32 %v4028_v54, %v7740_v52 }
 0xaa2   : > { %v7537_v23 = vsub.f32 %v4012_v10, %v4038_v46 }
 0xaa4   : > { %v4054_v19 = vmul.f32 %v7537_v23, %v7537_v23 }
 0xaa6   : > { %4067 = vadd.xlane.f32.xlu1 %v4054_v19 }
 0xae0   : > { %v4030_v36 = vpop.xlane.xlu2 %4029  ;;  %v4058_v32 = vpop.xlane.xlu0 %4057 }
 0xae1   : > { %v4039_v25 = vmul.f32 %v4030_v36, %v7740_v52  ;;  %v4073_v14 = vmul.f32 %v4058_v32, %v7740_v52 }
 0xae3   : > { %v7543_v3 = vsub.f32 %v4013_v31, %v4039_v25  ;;  %v4081_v7 = vadd.f32 1e-12, %v4073_v14 }
 0xae5   : > { %v4055_v55 = vmul.f32 %v7543_v3, %v7543_v3  ;;  %5389 = vrsqrt.f32 %v4081_v7  ;;  %vm4095_vm10 = vweird.f32 %v4081_v7 }
 0xae7   : > { %4069 = vadd.xlane.f32.xlu0 %v4055_v55 }
 0xae8   : > { %v4032_v60 = vpop.xlane.xlu1 %4031  ;;  %v4060_v18 = vpop.xlane.xlu2 %4059 }
 0xae9   : > { %v4040_v9 = vmul.f32 %v4032_v60, %v7740_v52  ;;  %v4074_v35 = vmul.f32 %v4060_v18, %v7740_v52 }
 0xaeb   : > { %v7549_v34 = vsub.f32 %v4014_v49, %v4040_v9  ;;  %v5390_v43 = vpop.eup %5389  ;;  %v4082_v21 = vadd.f32 1e-12, %v4074_v35 }
 0xaec   : > { %v4090_v37 = vmul.f32 %v5390_v43, %v4081_v7  ;;  %vm4096_vm9 = vweird.f32 %v5390_v43 }
 0xaed   : > { %v4056_v28 = vmul.f32 %v7549_v34, %v7549_v34  ;;  %5391 = vrsqrt.f32 %v4082_v21  ;;  %vm4097_vm14 = vmor %vm4095_vm10, %vm4096_vm9  ;;  %vm4105_vm0 = vweird.f32 %v4082_v21 }
 0xaee   : > { %v4091_v12 = vmul.f32 %v5390_v43, %v4090_v37 }
 0xaef   : > { %4071 = vadd.xlane.f32.xlu2 %v4056_v28 }
 0xaf0   : > { %v4092_v48 = vmul.f32 0.5, %v4091_v12 }
 0xaf2   : > { %v4093_v24 = vsub.f32 1.5, %v4092_v48 }
 0xaf3   : > { %v5392_v57 = vpop.eup %5391 }
 0xaf4   : > { %v4094_v10 = vmul.f32 %v5390_v43, %v4093_v24  ;;  %v4100_v5 = vmul.f32 %v5392_v57, %v4082_v21  ;;  %vm4106_vm15 = vweird.f32 %v5392_v57 }
 0xaf5   : > { %vm4107_vm1 = vmor %vm4105_vm0, %vm4106_vm15 }
 0xaf6   : > { %v4098_v50 = vsel %vm4097_vm14, %v5390_v43, %v4094_v10  ;;  %v4101_v58 = vmul.f32 %v5392_v57, %v4100_v5 }
 0xaf7   : > { %v4169_v39 = vmul.f32 %v4098_v50, %v7509_v13 }
 0xaf8   : > { %v4102_v59 = vmul.f32 0.5, %v4101_v58 }
 0xaf9   : > { %v4180_v63 = vmul.f32 %v7556_v61, %v4169_v39 }
 0xafa   : > { %v4103_v1 = vsub.f32 1.5, %v4102_v59 }
 0xafb   : > { %v4191_v2 = vadd.f32 %v7561_v33, %v4180_v63 }
 0xafc   : > { %v4104_v30 = vmul.f32 %v5392_v57, %v4103_v1 }
 0xafd   : > { %4199 = vst [vmem:[%s7568_s28] sm:$0xff] %v4191_v2 }
 0xafe   : > { %v4108_v17 = vsel %vm4107_vm1, %v5392_v57, %v4104_v30 }
 0xaff   : > { %v4170_v31 = vmul.f32 %v4108_v17, %v7516_v40 }
 0xb01   : > { %v4181_v13 = vmul.f32 %v7556_v61, %v4170_v31  ;;  %v4062_v26 = vpop.xlane.xlu1 %4061 }
 0xb02   : > { %v4075_v6 = vmul.f32 %v4062_v26, %v7740_v52 }
 0xb03   : > { %v4192_v22 = vadd.f32 %v7561_v33, %v4181_v13 }
 0xb04   : > { %v4083_v29 = vadd.f32 1e-12, %v4075_v6 }
 0xb05   : > { %4200 = vst [vmem:[%s7568_s28 + $0x8] sm:$0xff] %v4192_v22 }
 0xb06   : > { %5393 = vrsqrt.f32 %v4083_v29  ;;  %vm4115_vm3 = vweird.f32 %v4083_v29 }
 0xb09   : > { %v4064_v27 = vpop.xlane.xlu0 %4063 }
 0xb0a   : > { %v4076_v11 = vmul.f32 %v4064_v27, %v7740_v52 }
 0xb0c   : > { %v5394_v62 = vpop.eup %5393  ;;  %v4084_v15 = vadd.f32 1e-12, %v4076_v11 }
 0xb0d   : > { %v4110_v16 = vmul.f32 %v5394_v62, %v4083_v29  ;;  %vm4116_vm2 = vweird.f32 %v5394_v62 }
 0xb0e   : > { %5395 = vrsqrt.f32 %v4084_v15  ;;  %vm4117_vm4 = vmor %vm4115_vm3, %vm4116_vm2  ;;  %vm4125_vm6 = vweird.f32 %v4084_v15 }
 0xb0f   : > { %v4111_v49 = vmul.f32 %v5394_v62, %v4110_v16 }
 0xb11   : > { %v4112_v38 = vmul.f32 0.5, %v4111_v49  ;;  %v4066_v4 = vpop.xlane.xlu2 %4065 }
 0xb12   : > { %v4077_v8 = vmul.f32 %v4066_v4, %v7740_v52 }
 0xb13   : > { %v4113_v40 = vsub.f32 1.5, %v4112_v38 }
 0xb14   : > { %v5396_v56 = vpop.eup %5395  ;;  %v4085_v47 = vadd.f32 1e-12, %v4077_v8 }
 0xb15   : > { %v4114_v42 = vmul.f32 %v5394_v62, %v4113_v40  ;;  %v4120_v20 = vmul.f32 %v5396_v56, %v4084_v15  ;;  %vm4126_vm5 = vweird.f32 %v5396_v56 }
 0xb16   : > { %5397 = vrsqrt.f32 %v4085_v47  ;;  %vm4127_vm7 = vmor %vm4125_vm6, %vm4126_vm5  ;;  %vm4135_vm11 = vweird.f32 %v4085_v47 }
 0xb17   : > { %v4118_v45 = vsel %vm4117_vm4, %v5394_v62, %v4114_v42  ;;  %v4121_v51 = vmul.f32 %v5396_v56, %v4120_v20 }
 0xb18   : > { %v4171_v0 = vmul.f32 %v4118_v45, %v7522_v41 }
 0xb19   : > { %v4122_v54 = vmul.f32 0.5, %v4121_v51  ;;  %v4068_v36 = vpop.xlane.xlu1 %4067 }
 0xb1a   : > { %v4182_v46 = vmul.f32 %v7556_v61, %v4171_v0  ;;  %v4078_v25 = vmul.f32 %v4068_v36, %v7740_v52 }
 0xb1b   : > { %v4123_v19 = vsub.f32 1.5, %v4122_v54 }
 0xb1c   : > { %v4193_v32 = vadd.f32 %v7561_v33, %v4182_v46  ;;  %v5398_v7 = vpop.eup %5397  ;;  %v4086_v55 = vadd.f32 1e-12, %v4078_v25 }
 0xb1d   : > { %v4124_v14 = vmul.f32 %v5396_v56, %v4123_v19  ;;  %v4130_v41 = vmul.f32 %v5398_v7, %v4085_v47  ;;  %vm4136_vm8 = vweird.f32 %v5398_v7 }
 0xb1e   : > { %4201 = vst [vmem:[%s7568_s28 + $0x10] sm:$0xff] %v4193_v32  ;;  %5399 = vrsqrt.f32 %v4086_v55  ;;  %vm4137_vm12 = vmor %vm4135_vm11, %vm4136_vm8  ;;  %vm4145_vm9 = vweird.f32 %v4086_v55 }
 0xb1f   : > { %v4128_v60 = vsel %vm4127_vm7, %v5396_v56, %v4124_v14  ;;  %v4131_v18 = vmul.f32 %v5398_v7, %v4130_v41 }
 0xb20   : > { %v4172_v9 = vmul.f32 %v4128_v60, %v7527_v44 }
 0xb21   : > { %v4132_v43 = vmul.f32 0.5, %v4131_v18 }
 0xb22   : > { %v4183_v35 = vmul.f32 %v7556_v61, %v4172_v9 }
 0xb23   : > { %v4133_v37 = vsub.f32 1.5, %v4132_v43 }
 0xb24   : > { %v4194_v21 = vadd.f32 %v7561_v33, %v4183_v35  ;;  %v5400_v28 = vpop.eup %5399 }
 0xb25   : > { %v4134_v12 = vmul.f32 %v5398_v7, %v4133_v37  ;;  %v4140_v48 = vmul.f32 %v5400_v28, %v4086_v55  ;;  %vm4146_vm13 = vweird.f32 %v5400_v28 }
 0xb26   : > { %4202 = vst [vmem:[%s7568_s28 + $0x18] sm:$0xff] %v4194_v21  ;;  %vm4147_vm10 = vmor %vm4145_vm9, %vm4146_vm13 }
 0xb27   : > { %v4138_v24 = vsel %vm4137_vm12, %v5398_v7, %v4134_v12  ;;  %v4141_v57 = vmul.f32 %v5400_v28, %v4140_v48 }
 0xb28   : > { %v4173_v44 = vmul.f32 %v4138_v24, %v7532_v53 }
 0xb29   : > { %v4142_v10 = vmul.f32 0.5, %v4141_v57 }
 0xb2a   : > { %v4184_v5 = vmul.f32 %v7556_v61, %v4173_v44 }
 0xb2b   : > { %v4143_v50 = vsub.f32 1.5, %v4142_v10 }
 0xb2c   : > { %v4195_v58 = vadd.f32 %v7561_v33, %v4184_v5 }
 0xb2d   : > { %v4144_v39 = vmul.f32 %v5400_v28, %v4143_v50 }
 0xb2e   : > { %4203 = vst [vmem:[%s7568_s28 + $0x20] sm:$0xff] %v4195_v58 }
 0xb2f   : > { %v4148_v59 = vsel %vm4147_vm10, %v5400_v28, %v4144_v39 }
 0xb30   : > { %v4174_v63 = vmul.f32 %v4148_v59, %v7537_v23 }
 0xb32   : > { %v4185_v1 = vmul.f32 %v7556_v61, %v4174_v63 }
 0xb34   : > { %v4196_v2 = vadd.f32 %v7561_v33, %v4185_v1 }
 0xb36   : > { %4204 = vst [vmem:[%s7568_s28 + $0x28] sm:$0xff] %v4196_v2 }
 0xb5a   : > { %v4070_v53 = vpop.xlane.xlu0 %4069 }
 0xb5b   : > { %v4079_v30 = vmul.f32 %v4070_v53, %v7740_v52 }
 0xb5d   : > { %v4087_v17 = vadd.f32 1e-12, %v4079_v30 }
 0xb5f   : > { %5401 = vrsqrt.f32 %v4087_v17  ;;  %vm4155_vm15 = vweird.f32 %v4087_v17 }
 0xb62   : > { %v4072_v31 = vpop.xlane.xlu2 %4071 }
 0xb63   : > { %v4080_v13 = vmul.f32 %v4072_v31, %v7740_v52 }
 0xb65   : > { %v5402_v26 = vpop.eup %5401  ;;  %v4088_v6 = vadd.f32 1e-12, %v4080_v13 }
 0xb66   : > { %v4150_v22 = vmul.f32 %v5402_v26, %v4087_v17  ;;  %vm4156_vm14 = vweird.f32 %v5402_v26 }
 0xb67   : > { %5403 = vrsqrt.f32 %v4088_v6  ;;  %vm4157_vm0 = vmor %vm4155_vm15, %vm4156_vm14  ;;  %vm4165_vm2 = vweird.f32 %v4088_v6 }
 0xb68   : > { %v4151_v29 = vmul.f32 %v5402_v26, %v4150_v22 }
 0xb6a   : > { %v4152_v23 = vmul.f32 0.5, %v4151_v29 }
 0xb6c   : > { %v4153_v27 = vsub.f32 1.5, %v4152_v23 }
 0xb6d   : > { %v5404_v11 = vpop.eup %5403 }
 0xb6e   : > { %v4154_v62 = vmul.f32 %v5402_v26, %v4153_v27  ;;  %v4160_v15 = vmul.f32 %v5404_v11, %v4088_v6  ;;  %vm4166_vm1 = vweird.f32 %v5404_v11 }
 0xb6f   : > { %vm4167_vm3 = vmor %vm4165_vm2, %vm4166_vm1 }
 0xb70   : > { %v4158_v16 = vsel %vm4157_vm0, %v5402_v26, %v4154_v62  ;;  %v4161_v49 = vmul.f32 %v5404_v11, %v4160_v15 }
 0xb71   : > { %v4175_v52 = vmul.f32 %v4158_v16, %v7543_v3 }
 0xb72   : > { %v4162_v38 = vmul.f32 0.5, %v4161_v49 }
 0xb73   : > { %v4186_v40 = vmul.f32 %v7556_v61, %v4175_v52 }
 0xb74   : > { %v4163_v4 = vsub.f32 1.5, %v4162_v38 }
 0xb75   : > { %v4197_v56 = vadd.f32 %v7561_v33, %v4186_v40 }
 0xb76   : > { %v4164_v8 = vmul.f32 %v5404_v11, %v4163_v4 }
 0xb77   : > { %4205 = vst [vmem:[%s7568_s28 + $0x30] sm:$0xff] %v4197_v56 }
 0xb78   : > { %v4168_v3 = vsel %vm4167_vm3, %v5404_v11, %v4164_v8 }
 0xb79   : > { %v4176_v42 = vmul.f32 %v4168_v3, %v7549_v34 }
 0xb7b   : > { %v4187_v20 = vmul.f32 %v7556_v61, %v4176_v42 }
 0xb7d   : > { %v4198_v47 = vadd.f32 %v7561_v33, %v4187_v20 }
 0xb7f   : > { %4206 = vst [vmem:[%s7568_s28 + $0x38] sm:$0xff] %v4198_v47 }
 0xb80   : > { %5734 = shalt.err (!%p5731_p9)
}
 0xb81   : > { %s5816_s23 = smov 128   ;;  %s5817_s28 = smov 8  }
 0xb82   : > { %4966 = dma.vmem_to_hbm [thread:$0]  (%p6008_p0), %s4221_s22, 1024, %s4223_s25, %s4208_s12, %s5816_s23, %s5816_s23, %s5817_s28  }
 0xb83 PF: > { %s4237_s5 = sand.u32 1, %s5781_s18   ;;  %p7747_p10 = scmp.ge.s32.totalorder %s5793_s21, 2 }
 0xb84   : > { %s4238_s16 = scalar_lea.sflag [#allocation4], %s4237_s5 }
 0xb85   : > { %p5001_p11 = pnand %p7747_p10, %p6014_p6 }
 0xb87   : > { %p5002_p12 = pneg %p5001_p11 }
 0xb89   : > { %5776 = dma.done.wait (%p5002_p12), %s4238_s16, 1024  }
 0xb8a   : > { %5778 = vsyncadd (%p5002_p12), %s4238_s16, 4294966272  ;;  %p33_p2 = scmp.ge.s32.totalorder %s5984_s15, 4   ;;  %s7748_s18 = smov %s5785_s19 }
 0xb8b   : > { %s7749_s19 = smov %s5789_s20  ;;  %s7750_s20 = smov %s5996_s27 }
 0xb8c   : > { %s7751_s21 = smov %s5984_s15  ;;  %35 = sbr.rel (!%p33_p2) target bundleno = 21 (0x15), region = 161 }
 0xb91   :  { %4244 = vsyncpa [#allocation3], 1 }
 0xb92   :  { %4246 = vsyncpa [#allocation3 + $0x1], 1 }
 0xb93   :  { %4247 = vsyncpa [#allocation6], 1 }
 0xb94   :  { %4248 = vsyncpa [#allocation9], 1 }
 0xb95   :  { %4249 = vsyncpa [#allocation12], 1 }
 0xb96   :  { %4250 = vsyncpa [#allocation15], 1 }
 0xb97   :  { %4251 = vsyncpa [#allocation18], 1 }
 0xb98   :  { %4252 = vsyncpa [#allocation4], 1 }
 0xb99   :  { %4254 = vsyncpa [#allocation4 + $0x1], 1 }

</bundles_post_ra>
